<compile_context>
chip_gen: v7x
topology: tpu7x:2x2x1
jax: 0.10.0
libtpu: 0.0.40
codegen_flags: <defaults>
</compile_context>

<pallas_src>
import math
from functools import partial

import numpy as np
import jax
import jax.numpy as jnp
from jax.experimental import pallas as pl
from jax.experimental.pallas import tpu as pltpu

BN_EPS = 1e-5

_COMPILER_PARAMS = pltpu.CompilerParams(
    dimension_semantics=("parallel",),
    vmem_limit_bytes=32 * 1024 * 1024,   # explicit (v5e default is only 16 MiB)
)


def _rep_spec(arr):
    """Full-array block replicated across the grid (weights / scalars)."""
    zeros = (0,) * arr.ndim
    return pl.BlockSpec(arr.shape, lambda i, _z=zeros: _z)


# --------------------------------------------------------------------------------------
# Kernels
# --------------------------------------------------------------------------------------
def _embed_kernel(x_ref, wp_ref, bp_ref, wpos_ref, h_ref):
    # x: (Nb, Q, P) ; W_P: (P, D) bf16 ; b_P: (1, D) ; W_pos: (Q, D) ; out: (Nb, Q, D)
    Nb, Q, P = x_ref.shape
    D = wp_ref.shape[1]
    x = x_ref[...].reshape(Nb * Q, P).astype(jnp.bfloat16)
    h = jnp.dot(x, wp_ref[...], preferred_element_type=jnp.float32) + bp_ref[...]
    h_ref[...] = h.reshape(Nb, Q, D) + wpos_ref[...][None]


def _make_attn_kernel(H, scale):
    """Fused: BN(prev sublayer) -> QKV -> MHA (+ residual attention) -> out proj
    -> residual add -> partial BN stats of the result."""

    def kernel(src_ref, prev_ref, nmean_ref, nvar_ref, ngamma_ref, nbeta_ref,
               wqkv_ref, bqkv_ref, wo_ref, bo_ref,
               out_ref, scores_ref, stats_ref):
        Nb, Q, D = src_ref.shape
        dk = D // H

        # ---- fused BatchNorm of the previous sub-layer (identity params for layer 0)
        x = src_ref[...].reshape(Nb * Q, D)
        inv = jax.lax.rsqrt(nvar_ref[...] + BN_EPS) * ngamma_ref[...]
        xn = (x - nmean_ref[...]) * inv + nbeta_ref[...]

        # ---- fused QKV projection: one (D, 3D) bf16 matmul, f32 accumulation
        qkv = jnp.dot(xn.astype(jnp.bfloat16), wqkv_ref[...],
                      preferred_element_type=jnp.float32) + bqkv_ref[...]
        q = (qkv[:, 0 * D:1 * D] * scale).reshape(Nb, Q, D)   # pre-scale q
        k = qkv[:, 1 * D:2 * D].reshape(Nb, Q, D)
        v = qkv[:, 2 * D:3 * D].reshape(Nb, Q, D)

        prev = prev_ref[...]
        new_scores = []
        head_out = []
        # Tiny per-head attention (Q x Q) kept in f32; the big matmuls above/below
        # are the MXU work.
        for hh in range(H):
            qh = q[:, :, hh * dk:(hh + 1) * dk]
            kh = k[:, :, hh * dk:(hh + 1) * dk]
            vh = v[:, :, hh * dk:(hh + 1) * dk]
            s = jnp.einsum('bqd,bkd->bqk', qh, kh,
                           preferred_element_type=jnp.float32)
            s = s + prev[:, hh]                      # residual attention scores
            new_scores.append(s)
            m = jnp.max(s, axis=-1, keepdims=True)
            e = jnp.exp(s - m)
            p = e * pl.reciprocal(jnp.sum(e, axis=-1, keepdims=True), approx=True)
            head_out.append(jnp.einsum('bqk,bkd->bqd', p, vh,
                                       preferred_element_type=jnp.float32))
        scores_ref[...] = jnp.stack(new_scores, axis=1)        # (Nb, H, Q, Q)

        attn = jnp.concatenate(head_out, axis=-1).reshape(Nb * Q, D)
        so = jnp.dot(attn.astype(jnp.bfloat16), wo_ref[...],
                     preferred_element_type=jnp.float32) + bo_ref[...]
        y = xn + so                                            # residual add
        out_ref[...] = y.reshape(Nb, Q, D)

        # ---- one-pass partial BatchNorm stats (sum, sum of squares) over block rows
        s1 = jnp.sum(y, axis=0, keepdims=True)
        s2 = jnp.sum(y * y, axis=0, keepdims=True)
        stats_ref[0] = jnp.concatenate([s1, s2], axis=0)

    return kernel


def _ffn_kernel(y_ref, m_ref, v_ref, g_ref, b_ref,
                w1_ref, b1_ref, w2_ref, b2_ref, out_ref, stats_ref):
    # Fused: BN(attn sublayer) -> Linear -> GELU -> Linear -> residual -> partial stats
    Nb, Q, D = y_ref.shape
    x = y_ref[...].reshape(Nb * Q, D)
    inv = jax.lax.rsqrt(v_ref[...] + BN_EPS) * g_ref[...]
    xn = (x - m_ref[...]) * inv + b_ref[...]

    f = jnp.dot(xn.astype(jnp.bfloat16), w1_ref[...],
                preferred_element_type=jnp.float32) + b1_ref[...]
    f = jax.nn.gelu(f, approximate=True)
    f = jnp.dot(f.astype(jnp.bfloat16), w2_ref[...],
                preferred_element_type=jnp.float32) + b2_ref[...]
    y = xn + f
    out_ref[...] = y.reshape(Nb, Q, D)

    s1 = jnp.sum(y, axis=0, keepdims=True)
    s2 = jnp.sum(y * y, axis=0, keepdims=True)
    stats_ref[0] = jnp.concatenate([s1, s2], axis=0)


def _bn_apply_kernel(y_ref, m_ref, v_ref, g_ref, b_ref, out_ref):
    Nb, Q, D = y_ref.shape
    x = y_ref[...].reshape(Nb * Q, D)
    inv = jax.lax.rsqrt(v_ref[...] + BN_EPS) * g_ref[...]
    out_ref[...] = ((x - m_ref[...]) * inv + b_ref[...]).reshape(Nb, Q, D)


# --------------------------------------------------------------------------------------
# pallas_call wrappers (grid tiled over the B = bs*n_vars axis, "parallel")
# --------------------------------------------------------------------------------------
def _embed_call(x_tok, wp, bp, wpos, block_b):
    B, Q, P = x_tok.shape
    D = wp.shape[1]
    nb = B // block_b
    act_in = pl.BlockSpec((block_b, Q, P), lambda i: (i, 0, 0))
    act_out = pl.BlockSpec((block_b, Q, D), lambda i: (i, 0, 0))
    cost = pl.CostEstimate(
        flops=int(2 * B * Q * P * D), transcendentals=0,
        bytes_accessed=int(B * Q * P * 4 + P * D * 2 + B * Q * D * 4))
    return pl.pallas_call(
        _embed_kernel,
        grid=(nb,),
        in_specs=[act_in, _rep_spec(wp), _rep_spec(bp), _rep_spec(wpos)],
        out_specs=act_out,
        out_shape=jax.ShapeDtypeStruct((B, Q, D), jnp.float32),
        compiler_params=_COMPILER_PARAMS,
        cost_estimate=cost,
    )(x_tok, wp, bp, wpos)


def _attn_call(src, prev_scores, nmean, nvar, ngamma, nbeta,
               wqkv, bqkv, wo, bo, n_heads, block_b):
    B, Q, D = src.shape
    H = n_heads
    dk = D // H
    nb = B // block_b
    act = pl.BlockSpec((block_b, Q, D), lambda i: (i, 0, 0))
    sc = pl.BlockSpec((block_b, H, Q, Q), lambda i: (i, 0, 0, 0))
    st = pl.BlockSpec((1, 2, D), lambda i: (i, 0, 0))
    flops = 2 * B * Q * D * (3 * D) + 2 * B * Q * D * D + 4 * B * H * Q * Q * dk
    cost = pl.CostEstimate(
        flops=int(flops),
        transcendentals=int(B * H * Q * Q),
        bytes_accessed=int(2 * (B * Q * D + B * H * Q * Q) * 4
                           + (wqkv.size + wo.size) * 2 + nb * 2 * D * 4))
    kernel = _make_attn_kernel(H, float(dk ** -0.5))
    return pl.pallas_call(
        kernel,
        grid=(nb,),
        in_specs=[act, sc,
                  _rep_spec(nmean), _rep_spec(nvar), _rep_spec(ngamma), _rep_spec(nbeta),
                  _rep_spec(wqkv), _rep_spec(bqkv), _rep_spec(wo), _rep_spec(bo)],
        out_specs=(act, sc, st),
        out_shape=(jax.ShapeDtypeStruct((B, Q, D), jnp.float32),
                   jax.ShapeDtypeStruct((B, H, Q, Q), jnp.float32),
                   jax.ShapeDtypeStruct((nb, 2, D), jnp.float32)),
        compiler_params=_COMPILER_PARAMS,
        cost_estimate=cost,
    )(src, prev_scores, nmean, nvar, ngamma, nbeta, wqkv, bqkv, wo, bo)


def _ffn_call(y1, mean1, var1, g1, be1, w1, b1, w2, b2, block_b):
    B, Q, D = y1.shape
    DFF = w1.shape[1]
    nb = B // block_b
    act = pl.BlockSpec((block_b, Q, D), lambda i: (i, 0, 0))
    st = pl.BlockSpec((1, 2, D), lambda i: (i, 0, 0))
    cost = pl.CostEstimate(
        flops=int(4 * B * Q * D * DFF),
        transcendentals=int(B * Q * DFF),
        bytes_accessed=int(2 * B * Q * D * 4 + (w1.size + w2.size) * 2 + nb * 2 * D * 4))
    return pl.pallas_call(
        _ffn_kernel,
        grid=(nb,),
        in_specs=[act, _rep_spec(mean1), _rep_spec(var1), _rep_spec(g1), _rep_spec(be1),
                  _rep_spec(w1), _rep_spec(b1), _rep_spec(w2), _rep_spec(b2)],
        out_specs=(act, st),
        out_shape=(jax.ShapeDtypeStruct((B, Q, D), jnp.float32),
                   jax.ShapeDtypeStruct((nb, 2, D), jnp.float32)),
        compiler_params=_COMPILER_PARAMS,
        cost_estimate=cost,
    )(y1, mean1, var1, g1, be1, w1, b1, w2, b2)


def _bn_apply_call(y, mean, var, gamma, beta, block_b):
    B, Q, D = y.shape
    nb = B // block_b
    act = pl.BlockSpec((block_b, Q, D), lambda i: (i, 0, 0))
    return pl.pallas_call(
        _bn_apply_kernel,
        grid=(nb,),
        in_specs=[act, _rep_spec(mean), _rep_spec(var), _rep_spec(gamma), _rep_spec(beta)],
        out_specs=act,
        out_shape=jax.ShapeDtypeStruct((B, Q, D), jnp.float32),
        compiler_params=_COMPILER_PARAMS,
    )(y, mean, var, gamma, beta)


def _finalize_stats(stats, n_rows):
    """Reduce per-block (sum, sumsq) partials -> full-batch mean/var (biased, like BN)."""
    s = jnp.sum(stats, axis=0)                       # (2, D)
    mean = s[0:1, :] / n_rows
    var = jnp.maximum(s[1:2, :] / n_rows - mean * mean, 0.0)
    return mean, var


# --------------------------------------------------------------------------------------
# Forward pass (TSTiEncoder.forward semantics)
# --------------------------------------------------------------------------------------
@partial(jax.jit, static_argnames=("n_heads", "block_b"))
def tsti_encoder_forward(x, params, *, n_heads, block_b=None):
    # x: [bs, n_vars, patch_len, patch_num]  ->  [bs, n_vars, d_model, patch_num]
    bs, nvars, P, Q = x.shape
    D = params['W_P'].shape[1]
    H = n_heads
    assert D % H == 0
    B = bs * nvars
    if block_b is None:   # ~512 rows per block, must divide B (exact BN stats)
        target = max(1, 512 // max(Q, 1))
        block_b = max(d for d in range(1, B + 1) if B % d == 0 and d <= target)
    assert B % block_b == 0
    n_rows = B * Q
    bf16 = jnp.bfloat16

    # x.permute(0,1,3,2) then fold (bs, n_vars) -> token slab [B, Q, P]
    x_tok = jnp.transpose(x, (0, 1, 3, 2)).reshape(B, Q, P).astype(jnp.float32)

    # W_P(x) + W_pos   (dropout p=0.0 -> identity)
    src = _embed_call(x_tok, params['W_P'].astype(bf16), params['b_P'],
                      params['W_pos'], block_b)

    prev_scores = jnp.zeros((B, H, Q, Q), jnp.float32)
    # identity "input norm" for layer 0 (exact: rsqrt((1-eps)+eps) == 1)
    norm_in = (jnp.zeros((1, D), jnp.float32),
               jnp.full((1, D), 1.0 - BN_EPS, jnp.float32),
               jnp.ones((1, D), jnp.float32),
               jnp.zeros((1, D), jnp.float32))

    for lp in params['layers']:
        (wqkv, bqkv, wo, bo, g1, be1, w1, b1, w2, b2, g2, be2) = lp
        src, prev_scores, st1 = _attn_call(src, prev_scores, *norm_in,
                                           wqkv.astype(bf16), bqkv,
                                           wo.astype(bf16), bo, H, block_b)
        mean1, var1 = _finalize_stats(st1, n_rows)
        src, st2 = _ffn_call(src, mean1, var1, g1, be1,
                             w1.astype(bf16), b1, w2.astype(bf16), b2, block_b)
        mean2, var2 = _finalize_stats(st2, n_rows)
        norm_in = (mean2, var2, g2, be2)

    # apply the last layer's norm_ffn, then un-fold + permute to PyTorch output layout
    z = _bn_apply_call(src, *norm_in, block_b)
    z = z.reshape(bs, nvars, Q, D)
    return jnp.transpose(z, (0, 1, 3, 2))


# --------------------------------------------------------------------------------------
# Pure-JAX reference (faithful f32 TSTiEncoder math) for the correctness check
# --------------------------------------------------------------------------------------
def tsti_encoder_ref(x, params, *, n_heads):
    bs, nvars, P, Q = x.shape
    D = params['W_P'].shape[1]
    H = n_heads
    dk = D // H
    scale = dk ** -0.5
    B = bs * nvars

    xt = jnp.transpose(x, (0, 1, 3, 2)).reshape(B, Q, P)
    u = xt @ params['W_P'] + params['b_P']
    u = u + params['W_pos'][None]
    src = u.reshape(B * Q, D)

    prev = None
    for lp in params['layers']:
        (wqkv, bqkv, wo, bo, g1, be1, w1, b1, w2, b2, g2, be2) = lp
        qkv = src @ wqkv + bqkv
        q = qkv[:, :D].reshape(B, Q, H, dk).transpose(0, 2, 1, 3)
        k = qkv[:, D:2 * D].reshape(B, Q, H, dk).transpose(0, 2, 1, 3)
        v = qkv[:, 2 * D:].reshape(B, Q, H, dk).transpose(0, 2, 1, 3)
        scores = jnp.einsum('bhqd,bhkd->bhqk', q, k) * scale
        if prev is not None:
            scores = scores + prev
        prev = scores
        attn = jax.nn.softmax(scores, axis=-1)
        o = jnp.einsum('bhqk,bhkd->bhqd', attn, v)
        o = o.transpose(0, 2, 1, 3).reshape(B * Q, D)
        y = src + (o @ wo + bo)
        mean = y.mean(0, keepdims=True)
        var = ((y - mean) ** 2).mean(0, keepdims=True)
        y = (y - mean) / jnp.sqrt(var + BN_EPS) * g1 + be1
        f = jax.nn.gelu(y @ w1 + b1, approximate=False) @ w2 + b2
        y2 = y + f
        mean = y2.mean(0, keepdims=True)
        var = ((y2 - mean) ** 2).mean(0, keepdims=True)
        src = (y2 - mean) / jnp.sqrt(var + BN_EPS) * g2 + be2

    z = src.reshape(bs, nvars, Q, D)
    return jnp.transpose(z, (0, 1, 3, 2))


# --------------------------------------------------------------------------------------
# Deterministic parameter init (PyTorch-like Linear init; BN gamma=1, beta=0; pe='zeros')
# --------------------------------------------------------------------------------------
def _linear_init(key, fan_in, fan_out):
    k1, k2 = jax.random.split(key)
    bound = 1.0 / math.sqrt(fan_in)
    w = jax.random.uniform(k1, (fan_in, fan_out), minval=-bound, maxval=bound,
                           dtype=jnp.float32)
    b = jax.random.uniform(k2, (1, fan_out), minval=-bound, maxval=bound,
                           dtype=jnp.float32)
    return w, b


def init_params(key, *, patch_len, patch_num, d_model, d_ff, n_layers):
    keys = jax.random.split(key, 2 + 6 * n_layers)
    ki = iter(keys)
    W_P, b_P = _linear_init(next(ki), patch_len, d_model)
    W_pos = jax.random.uniform(next(ki), (patch_num, d_model),
                               minval=-0.02, maxval=0.02, dtype=jnp.float32)
    layers = []
    for _ in range(n_layers):
        wq, bq = _linear_init(next(ki), d_model, d_model)
        wk, bk = _linear_init(next(ki), d_model, d_model)
        wv, bv = _linear_init(next(ki), d_model, d_model)
        wqkv = jnp.concatenate([wq, wk, wv], axis=1)
        bqkv = jnp.concatenate([bq, bk, bv], axis=1)
        wo, bo = _linear_init(next(ki), d_model, d_model)
        g1 = jnp.ones((1, d_model), jnp.float32)
        be1 = jnp.zeros((1, d_model), jnp.float32)
        w1, b1 = _linear_init(next(ki), d_model, d_ff)
        w2, b2 = _linear_init(next(ki), d_ff, d_model)
        g2 = jnp.ones((1, d_model), jnp.float32)
        be2 = jnp.zeros((1, d_model), jnp.float32)
        layers.append((wqkv, bqkv, wo, bo, g1, be1, w1, b1, w2, b2, g2, be2))
    return {'W_P': W_P, 'b_P': b_P, 'W_pos': W_pos, 'layers': layers}


# --------------------------------------------------------------------------------------
if __name__ == "__main__":
    bs, n_vars = 2, 4
    patch_len, patch_num = 16, 8
    d_model, d_ff = 128, 256
    n_heads, n_layers = 4, 2

    key = jax.random.PRNGKey(0)
    kx, kp = jax.random.split(key)
    x = jax.random.normal(kx, (bs, n_vars, patch_len, patch_num), dtype=jnp.float32)
    params = init_params(kp, patch_len=patch_len, patch_num=patch_num,
                         d_model=d_model, d_ff=d_ff, n_layers=n_layers)

    # block_b=2 -> grid of 4 "parallel" blocks over B = bs*n_vars = 8 sequences,
    # exercising cross-block BatchNorm statistics and the pipelined path.
    out = tsti_encoder_forward(x, params, n_heads=n_heads, block_b=2)
    out = jax.block_until_ready(out)

    ref = jax.block_until_ready(tsti_encoder_ref(x, params, n_heads=n_heads))

    assert out.shape == (bs, n_vars, d_model, patch_num), out.shape
    out_np = np.asarray(out)
    ref_np = np.asarray(ref)
    assert np.all(np.isfinite(out_np))
    max_err = float(np.max(np.abs(out_np - ref_np)))
    assert np.allclose(out_np, ref_np, rtol=5e-2, atol=5e-2), \
        f"max abs diff = {max_err}"

    print("KERNEL_OK")
</pallas_src>

<mosaic_0001>
module attributes {stable_mosaic.version = 11 : i64} {
  func.func @_embed_kernel(%arg0: i32, %arg1: memref<2x8x16xf32, #tpu.memory_space<vmem>>, %arg2: memref<16x128xbf16, #tpu.memory_space<vmem>>, %arg3: memref<1x128xf32, #tpu.memory_space<vmem>>, %arg4: memref<8x128xf32, #tpu.memory_space<vmem>>, %arg5: memref<2x8x128xf32, #tpu.memory_space<vmem>>) attributes {dimension_semantics = [#tpu.dimension_semantics<parallel>], iteration_bounds = array<i64: 4>, scalar_prefetch = 0 : i64, scratch_operands = 0 : i64, tpu.core_type = #tpu.core_type<tc>, window_params = [{transform_indices = @transform_0, window_bounds = array<i64: 2, 8, 16>}, {pipeline_mode = #tpu.pipeline_mode<synchronous>, transform_indices = @transform_1, window_bounds = array<i64: 16, 128>}, {pipeline_mode = #tpu.pipeline_mode<synchronous>, transform_indices = @transform_2, window_bounds = array<i64: 1, 128>}, {pipeline_mode = #tpu.pipeline_mode<synchronous>, transform_indices = @transform_3, window_bounds = array<i64: 8, 128>}, {transform_indices = @transform_4, window_bounds = array<i64: 2, 8, 128>}]} {
    %c0 = arith.constant 0 : index
    %c0_0 = arith.constant 0 : index
    %c0_1 = arith.constant 0 : index
    %0 = vector.load %arg1[%c0, %c0_0, %c0_1] : memref<2x8x16xf32, #tpu.memory_space<vmem>>, vector<2x8x16xf32>
    %1 = vector.shape_cast %0 : vector<2x8x16xf32> to vector<16x16xf32>
    %2 = arith.truncf %1 : vector<16x16xf32> to vector<16x16xbf16>
    %c0_2 = arith.constant 0 : index
    %c0_3 = arith.constant 0 : index
    %3 = vector.load %arg2[%c0_2, %c0_3] : memref<16x128xbf16, #tpu.memory_space<vmem>>, vector<16x128xbf16>
    %cst = arith.constant dense<0.000000e+00> : vector<16x128xf32>
    %4 = tpu.matmul %2, %3, %cst {dimension_numbers = #tpu.dot_dimension_numbers<[1], [0], [0], [1], [0, 0, 1, 1], [], []>} : vector<16x16xbf16>, vector<16x128xbf16>, vector<16x128xf32> -> vector<16x128xf32>
    %c0_4 = arith.constant 0 : index
    %c0_5 = arith.constant 0 : index
    %5 = vector.load %arg3[%c0_4, %c0_5] : memref<1x128xf32, #tpu.memory_space<vmem>>, vector<1x128xf32>
    %6 = vector.broadcast %5 : vector<1x128xf32> to vector<16x128xf32>
    %7 = arith.addf %4, %6 : vector<16x128xf32>
    %8 = vector.shape_cast %7 : vector<16x128xf32> to vector<2x8x128xf32>
    %c0_6 = arith.constant 0 : index
    %c0_7 = arith.constant 0 : index
    %9 = vector.load %arg4[%c0_6, %c0_7] : memref<8x128xf32, #tpu.memory_space<vmem>>, vector<8x128xf32>
    %10 = vector.shape_cast %9 : vector<8x128xf32> to vector<1x8x128xf32>
    %11 = vector.broadcast %10 : vector<1x8x128xf32> to vector<2x8x128xf32>
    %12 = arith.addf %8, %11 : vector<2x8x128xf32>
    %c0_8 = arith.constant 0 : index
    %c0_9 = arith.constant 0 : index
    %c0_10 = arith.constant 0 : index
    %13 = vector.load %arg5[%c0_8, %c0_9, %c0_10] : memref<2x8x128xf32, #tpu.memory_space<vmem>>, vector<2x8x128xf32>
    tpu.vector_store %arg5[%c0_8, %c0_9, %c0_10], %12 {strides = array<i32>} : memref<2x8x128xf32, #tpu.memory_space<vmem>>, vector<2x8x128xf32>,
    return
  }
  func.func @transform_0(%arg0: i32) -> (i32, i32, i32) {
    %c0_i32 = arith.constant 0 : i32
    %c0_i32_0 = arith.constant 0 : i32
    %c0_i32_1 = arith.constant 0 : i32
    return %arg0, %c0_i32, %c0_i32_0 : i32, i32, i32
  }
  func.func @transform_1(%arg0: i32) -> (i32, i32) {
    %c0_i32 = arith.constant 0 : i32
    %c0_i32_0 = arith.constant 0 : i32
    %c0_i32_1 = arith.constant 0 : i32
    return %c0_i32, %c0_i32_0 : i32, i32
  }
  func.func @transform_2(%arg0: i32) -> (i32, i32) {
    %c0_i32 = arith.constant 0 : i32
    %c0_i32_0 = arith.constant 0 : i32
    %c0_i32_1 = arith.constant 0 : i32
    return %c0_i32, %c0_i32_0 : i32, i32
  }
  func.func @transform_3(%arg0: i32) -> (i32, i32) {
    %c0_i32 = arith.constant 0 : i32
    %c0_i32_0 = arith.constant 0 : i32
    %c0_i32_1 = arith.constant 0 : i32
    return %c0_i32, %c0_i32_0 : i32, i32
  }
  func.func @transform_4(%arg0: i32) -> (i32, i32, i32) {
    %c0_i32 = arith.constant 0 : i32
    %c0_i32_0 = arith.constant 0 : i32
    %c0_i32_1 = arith.constant 0 : i32
    return %arg0, %c0_i32, %c0_i32_0 : i32, i32, i32
  }
}

module attributes {stable_mosaic.version = 11 : i64} {
  func.func @kernel(%arg0: i32, %arg1: memref<2x8x128xf32, #tpu.memory_space<vmem>>, %arg2: memref<2x4x8x8xf32, #tpu.memory_space<vmem>>, %arg3: memref<1x128xf32, #tpu.memory_space<vmem>>, %arg4: memref<1x128xf32, #tpu.memory_space<vmem>>, %arg5: memref<1x128xf32, #tpu.memory_space<vmem>>, %arg6: memref<1x128xf32, #tpu.memory_space<vmem>>, %arg7: memref<128x384xbf16, #tpu.memory_space<vmem>>, %arg8: memref<1x384xf32, #tpu.memory_space<vmem>>, %arg9: memref<128x128xbf16, #tpu.memory_space<vmem>>, %arg10: memref<1x128xf32, #tpu.memory_space<vmem>>, %arg11: memref<2x8x128xf32, #tpu.memory_space<vmem>>, %arg12: memref<2x4x8x8xf32, #tpu.memory_space<vmem>>, %arg13: memref<1x2x128xf32, #tpu.memory_space<vmem>>) attributes {dimension_semantics = [#tpu.dimension_semantics<parallel>], iteration_bounds = array<i64: 4>, scalar_prefetch = 0 : i64, scratch_operands = 0 : i64, tpu.core_type = #tpu.core_type<tc>, window_params = [{transform_indices = @transform_0, window_bounds = array<i64: 2, 8, 128>}, {transform_indices = @transform_1, window_bounds = array<i64: 2, 4, 8, 8>}, {pipeline_mode = #tpu.pipeline_mode<synchronous>, transform_indices = @transform_2, window_bounds = array<i64: 1, 128>}, {pipeline_mode = #tpu.pipeline_mode<synchronous>, transform_indices = @transform_3, window_bounds = array<i64: 1, 128>}, {pipeline_mode = #tpu.pipeline_mode<synchronous>, transform_indices = @transform_4, window_bounds = array<i64: 1, 128>}, {pipeline_mode = #tpu.pipeline_mode<synchronous>, transform_indices = @transform_5, window_bounds = array<i64: 1, 128>}, {pipeline_mode = #tpu.pipeline_mode<synchronous>, transform_indices = @transform_6, window_bounds = array<i64: 128, 384>}, {pipeline_mode = #tpu.pipeline_mode<synchronous>, transform_indices = @transform_7, window_bounds = array<i64: 1, 384>}, {pipeline_mode = #tpu.pipeline_mode<synchronous>, transform_indices = @transform_8, window_bounds = array<i64: 128, 128>}, {pipeline_mode = #tpu.pipeline_mode<synchronous>, transform_indices = @transform_9, window_bounds = array<i64: 1, 128>}, {transform_indices = @transform_10, window_bounds = array<i64: 2, 8, 128>}, {transform_indices = @transform_11, window_bounds = array<i64: 2, 4, 8, 8>}, {transform_indices = @transform_12, window_bounds = array<i64: 1, 2, 128>}]} {
    %c0 = arith.constant 0 : index
    %c0_0 = arith.constant 0 : index
    %c0_1 = arith.constant 0 : index
    %0 = vector.load %arg1[%c0, %c0_0, %c0_1] : memref<2x8x128xf32, #tpu.memory_space<vmem>>, vector<2x8x128xf32>
    %1 = vector.shape_cast %0 : vector<2x8x128xf32> to vector<16x128xf32>
    %c0_2 = arith.constant 0 : index
    %c0_3 = arith.constant 0 : index
    %2 = vector.load %arg4[%c0_2, %c0_3] : memref<1x128xf32, #tpu.memory_space<vmem>>, vector<1x128xf32>
    %cst = arith.constant 9.99999974E-6 : f32
    %3 = vector.broadcast %cst : f32 to vector<1x128xf32>
    %4 = arith.addf %2, %3 : vector<1x128xf32>
    %5 = math.rsqrt %4 : vector<1x128xf32>
    %c0_4 = arith.constant 0 : index
    %c0_5 = arith.constant 0 : index
    %6 = vector.load %arg5[%c0_4, %c0_5] : memref<1x128xf32, #tpu.memory_space<vmem>>, vector<1x128xf32>
    %7 = arith.mulf %5, %6 : vector<1x128xf32>
    %c0_6 = arith.constant 0 : index
    %c0_7 = arith.constant 0 : index
    %8 = vector.load %arg3[%c0_6, %c0_7] : memref<1x128xf32, #tpu.memory_space<vmem>>, vector<1x128xf32>
    %9 = vector.broadcast %8 : vector<1x128xf32> to vector<16x128xf32>
    %10 = arith.subf %1, %9 : vector<16x128xf32>
    %11 = vector.broadcast %7 : vector<1x128xf32> to vector<16x128xf32>
    %12 = arith.mulf %10, %11 : vector<16x128xf32>
    %c0_8 = arith.constant 0 : index
    %c0_9 = arith.constant 0 : index
    %13 = vector.load %arg6[%c0_8, %c0_9] : memref<1x128xf32, #tpu.memory_space<vmem>>, vector<1x128xf32>
    %14 = vector.broadcast %13 : vector<1x128xf32> to vector<16x128xf32>
    %15 = arith.addf %12, %14 : vector<16x128xf32>
    %16 = arith.truncf %15 : vector<16x128xf32> to vector<16x128xbf16>
    %c0_10 = arith.constant 0 : index
    %c0_11 = arith.constant 0 : index
    %17 = vector.load %arg7[%c0_10, %c0_11] : memref<128x384xbf16, #tpu.memory_space<vmem>>, vector<128x384xbf16>
    %cst_12 = arith.constant dense<0.000000e+00> : vector<16x384xf32>
    %18 = tpu.matmul %16, %17, %cst_12 {dimension_numbers = #tpu.dot_dimension_numbers<[1], [0], [0], [1], [0, 0, 1, 1], [], []>} : vector<16x128xbf16>, vector<128x384xbf16>, vector<16x384xf32> -> vector<16x384xf32>
    %c0_13 = arith.constant 0 : index
    %c0_14 = arith.constant 0 : index
    %19 = vector.load %arg8[%c0_13, %c0_14] : memref<1x384xf32, #tpu.memory_space<vmem>>, vector<1x384xf32>
    %20 = vector.broadcast %19 : vector<1x384xf32> to vector<16x384xf32>
    %21 = arith.addf %18, %20 : vector<16x384xf32>
    %22 = vector.extract_strided_slice %21 {offsets = [0, 0], sizes = [16, 128], strides = [1, 1]} : vector<16x384xf32> to vector<16x128xf32>
    %cst_15 = arith.constant 0.176776692 : f32
    %23 = vector.broadcast %cst_15 : f32 to vector<16x128xf32>
    %24 = arith.mulf %22, %23 : vector<16x128xf32>
    %25 = vector.shape_cast %24 : vector<16x128xf32> to vector<2x8x128xf32>
    %26 = vector.extract_strided_slice %21 {offsets = [0, 128], sizes = [16, 128], strides = [1, 1]} : vector<16x384xf32> to vector<16x128xf32>
    %27 = vector.shape_cast %26 : vector<16x128xf32> to vector<2x8x128xf32>
    %28 = vector.extract_strided_slice %21 {offsets = [0, 256], sizes = [16, 128], strides = [1, 1]} : vector<16x384xf32> to vector<16x128xf32>
    %29 = vector.shape_cast %28 : vector<16x128xf32> to vector<2x8x128xf32>
    %c0_16 = arith.constant 0 : index
    %c0_17 = arith.constant 0 : index
    %c0_18 = arith.constant 0 : index
    %c0_19 = arith.constant 0 : index
    %30 = vector.load %arg2[%c0_16, %c0_17, %c0_18, %c0_19] : memref<2x4x8x8xf32, #tpu.memory_space<vmem>>, vector<2x4x8x8xf32>
    %31 = vector.extract_strided_slice %25 {offsets = [0, 0, 0], sizes = [2, 8, 32], strides = [1, 1, 1]} : vector<2x8x128xf32> to vector<2x8x32xf32>
    %32 = vector.extract_strided_slice %27 {offsets = [0, 0, 0], sizes = [2, 8, 32], strides = [1, 1, 1]} : vector<2x8x128xf32> to vector<2x8x32xf32>
    %33 = vector.extract_strided_slice %29 {offsets = [0, 0, 0], sizes = [2, 8, 32], strides = [1, 1, 1]} : vector<2x8x128xf32> to vector<2x8x32xf32>
    "tpu.trace_start"() <{level = 10 : i32, message = "bqd,bkd->bqk"}> : () -> ()
    %cst_20 = arith.constant dense<0.000000e+00> : vector<2x8x8xf32>
    %34 = tpu.matmul %31, %32, %cst_20 {dimension_numbers = #tpu.dot_dimension_numbers<[2], [2], [1], [1], [0, 0, 0, 1, 1, 1], [0], [0]>} : vector<2x8x32xf32>, vector<2x8x32xf32>, vector<2x8x8xf32> -> vector<2x8x8xf32>
    "tpu.trace_stop"() : () -> ()
    %35 = vector.extract_strided_slice %30 {offsets = [0, 0, 0, 0], sizes = [2, 1, 8, 8], strides = [1, 1, 1, 1]} : vector<2x4x8x8xf32> to vector<2x1x8x8xf32>
    %36 = vector.shape_cast %35 : vector<2x1x8x8xf32> to vector<2x8x8xf32>
    %37 = arith.addf %34, %36 : vector<2x8x8xf32>
    %cst_21 = arith.constant dense<0xFF800000> : vector<2x8xf32>
    %38 = vector.multi_reduction <maximumf>, %37, %cst_21 [2] : vector<2x8x8xf32> to vector<2x8xf32>
    %39 = vector.shape_cast %38 : vector<2x8xf32> to vector<2x8x1xf32>
    %40 = vector.broadcast %39 : vector<2x8x1xf32> to vector<2x8x8xf32>
    %41 = arith.subf %37, %40 : vector<2x8x8xf32>
    %42 = math.exp %41 : vector<2x8x8xf32>
    %cst_22 = arith.constant dense<0.000000e+00> : vector<2x8xf32>
    %43 = vector.multi_reduction <add>, %42, %cst_22 [2] : vector<2x8x8xf32> to vector<2x8xf32>
    %44 = vector.shape_cast %43 : vector<2x8xf32> to vector<2x8x1xf32>
    %45 = tpu.reciprocal %44 {approx = true} : vector<2x8x1xf32> -> vector<2x8x1xf32>
    %46 = vector.broadcast %45 : vector<2x8x1xf32> to vector<2x8x8xf32>
    %47 = arith.mulf %42, %46 : vector<2x8x8xf32>
    "tpu.trace_start"() <{level = 10 : i32, message = "bqk,bkd->bqd"}> : () -> ()
    %cst_23 = arith.constant dense<0.000000e+00> : vector<2x8x32xf32>
    %48 = tpu.matmul %47, %33, %cst_23 {dimension_numbers = #tpu.dot_dimension_numbers<[2], [1], [1], [2], [0, 0, 0, 1, 1, 2], [0], [0]>} : vector<2x8x8xf32>, vector<2x8x32xf32>, vector<2x8x32xf32> -> vector<2x8x32xf32>
    "tpu.trace_stop"() : () -> ()
    %49 = vector.extract_strided_slice %25 {offsets = [0, 0, 32], sizes = [2, 8, 32], strides = [1, 1, 1]} : vector<2x8x128xf32> to vector<2x8x32xf32>
    %50 = vector.extract_strided_slice %27 {offsets = [0, 0, 32], sizes = [2, 8, 32], strides = [1, 1, 1]} : vector<2x8x128xf32> to vector<2x8x32xf32>
    %51 = vector.extract_strided_slice %29 {offsets = [0, 0, 32], sizes = [2, 8, 32], strides = [1, 1, 1]} : vector<2x8x128xf32> to vector<2x8x32xf32>
    "tpu.trace_start"() <{level = 10 : i32, message = "bqd,bkd->bqk"}> : () -> ()
    %cst_24 = arith.constant dense<0.000000e+00> : vector<2x8x8xf32>
    %52 = tpu.matmul %49, %50, %cst_24 {dimension_numbers = #tpu.dot_dimension_numbers<[2], [2], [1], [1], [0, 0, 0, 1, 1, 1], [0], [0]>} : vector<2x8x32xf32>, vector<2x8x32xf32>, vector<2x8x8xf32> -> vector<2x8x8xf32>
    "tpu.trace_stop"() : () -> ()
    %53 = vector.extract_strided_slice %30 {offsets = [0, 1, 0, 0], sizes = [2, 1, 8, 8], strides = [1, 1, 1, 1]} : vector<2x4x8x8xf32> to vector<2x1x8x8xf32>
    %54 = vector.shape_cast %53 : vector<2x1x8x8xf32> to vector<2x8x8xf32>
    %55 = arith.addf %52, %54 : vector<2x8x8xf32>
    %cst_25 = arith.constant dense<0xFF800000> : vector<2x8xf32>
    %56 = vector.multi_reduction <maximumf>, %55, %cst_25 [2] : vector<2x8x8xf32> to vector<2x8xf32>
    %57 = vector.shape_cast %56 : vector<2x8xf32> to vector<2x8x1xf32>
    %58 = vector.broadcast %57 : vector<2x8x1xf32> to vector<2x8x8xf32>
    %59 = arith.subf %55, %58 : vector<2x8x8xf32>
    %60 = math.exp %59 : vector<2x8x8xf32>
    %cst_26 = arith.constant dense<0.000000e+00> : vector<2x8xf32>
    %61 = vector.multi_reduction <add>, %60, %cst_26 [2] : vector<2x8x8xf32> to vector<2x8xf32>
    %62 = vector.shape_cast %61 : vector<2x8xf32> to vector<2x8x1xf32>
    %63 = tpu.reciprocal %62 {approx = true} : vector<2x8x1xf32> -> vector<2x8x1xf32>
    %64 = vector.broadcast %63 : vector<2x8x1xf32> to vector<2x8x8xf32>
    %65 = arith.mulf %60, %64 : vector<2x8x8xf32>
    "tpu.trace_start"() <{level = 10 : i32, message = "bqk,bkd->bqd"}> : () -> ()
    %cst_27 = arith.constant dense<0.000000e+00> : vector<2x8x32xf32>
    %66 = tpu.matmul %65, %51, %cst_27 {dimension_numbers = #tpu.dot_dimension_numbers<[2], [1], [1], [2], [0, 0, 0, 1, 1, 2], [0], [0]>} : vector<2x8x8xf32>, vector<2x8x32xf32>, vector<2x8x32xf32> -> vector<2x8x32xf32>
    "tpu.trace_stop"() : () -> ()
    %67 = vector.extract_strided_slice %25 {offsets = [0, 0, 64], sizes = [2, 8, 32], strides = [1, 1, 1]} : vector<2x8x128xf32> to vector<2x8x32xf32>
    %68 = vector.extract_strided_slice %27 {offsets = [0, 0, 64], sizes = [2, 8, 32], strides = [1, 1, 1]} : vector<2x8x128xf32> to vector<2x8x32xf32>
    %69 = vector.extract_strided_slice %29 {offsets = [0, 0, 64], sizes = [2, 8, 32], strides = [1, 1, 1]} : vector<2x8x128xf32> to vector<2x8x32xf32>
    "tpu.trace_start"() <{level = 10 : i32, message = "bqd,bkd->bqk"}> : () -> ()
    %cst_28 = arith.constant dense<0.000000e+00> : vector<2x8x8xf32>
    %70 = tpu.matmul %67, %68, %cst_28 {dimension_numbers = #tpu.dot_dimension_numbers<[2], [2], [1], [1], [0, 0, 0, 1, 1, 1], [0], [0]>} : vector<2x8x32xf32>, vector<2x8x32xf32>, vector<2x8x8xf32> -> vector<2x8x8xf32>
    "tpu.trace_stop"() : () -> ()
    %71 = vector.extract_strided_slice %30 {offsets = [0, 2, 0, 0], sizes = [2, 1, 8, 8], strides = [1, 1, 1, 1]} : vector<2x4x8x8xf32> to vector<2x1x8x8xf32>
    %72 = vector.shape_cast %71 : vector<2x1x8x8xf32> to vector<2x8x8xf32>
    %73 = arith.addf %70, %72 : vector<2x8x8xf32>
    %cst_29 = arith.constant dense<0xFF800000> : vector<2x8xf32>
    %74 = vector.multi_reduction <maximumf>, %73, %cst_29 [2] : vector<2x8x8xf32> to vector<2x8xf32>
    %75 = vector.shape_cast %74 : vector<2x8xf32> to vector<2x8x1xf32>
    %76 = vector.broadcast %75 : vector<2x8x1xf32> to vector<2x8x8xf32>
    %77 = arith.subf %73, %76 : vector<2x8x8xf32>
    %78 = math.exp %77 : vector<2x8x8xf32>
    %cst_30 = arith.constant dense<0.000000e+00> : vector<2x8xf32>
    %79 = vector.multi_reduction <add>, %78, %cst_30 [2] : vector<2x8x8xf32> to vector<2x8xf32>
    %80 = vector.shape_cast %79 : vector<2x8xf32> to vector<2x8x1xf32>
    %81 = tpu.reciprocal %80 {approx = true} : vector<2x8x1xf32> -> vector<2x8x1xf32>
    %82 = vector.broadcast %81 : vector<2x8x1xf32> to vector<2x8x8xf32>
    %83 = arith.mulf %78, %82 : vector<2x8x8xf32>
    "tpu.trace_start"() <{level = 10 : i32, message = "bqk,bkd->bqd"}> : () -> ()
    %cst_31 = arith.constant dense<0.000000e+00> : vector<2x8x32xf32>
    %84 = tpu.matmul %83, %69, %cst_31 {dimension_numbers = #tpu.dot_dimension_numbers<[2], [1], [1], [2], [0, 0, 0, 1, 1, 2], [0], [0]>} : vector<2x8x8xf32>, vector<2x8x32xf32>, vector<2x8x32xf32> -> vector<2x8x32xf32>
    "tpu.trace_stop"() : () -> ()
    %85 = vector.extract_strided_slice %25 {offsets = [0, 0, 96], sizes = [2, 8, 32], strides = [1, 1, 1]} : vector<2x8x128xf32> to vector<2x8x32xf32>
    %86 = vector.extract_strided_slice %27 {offsets = [0, 0, 96], sizes = [2, 8, 32], strides = [1, 1, 1]} : vector<2x8x128xf32> to vector<2x8x32xf32>
    %87 = vector.extract_strided_slice %29 {offsets = [0, 0, 96], sizes = [2, 8, 32], strides = [1, 1, 1]} : vector<2x8x128xf32> to vector<2x8x32xf32>
    "tpu.trace_start"() <{level = 10 : i32, message = "bqd,bkd->bqk"}> : () -> ()
    %cst_32 = arith.constant dense<0.000000e+00> : vector<2x8x8xf32>
    %88 = tpu.matmul %85, %86, %cst_32 {dimension_numbers = #tpu.dot_dimension_numbers<[2], [2], [1], [1], [0, 0, 0, 1, 1, 1], [0], [0]>} : vector<2x8x32xf32>, vector<2x8x32xf32>, vector<2x8x8xf32> -> vector<2x8x8xf32>
    "tpu.trace_stop"() : () -> ()
    %89 = vector.extract_strided_slice %30 {offsets = [0, 3, 0, 0], sizes = [2, 1, 8, 8], strides = [1, 1, 1, 1]} : vector<2x4x8x8xf32> to vector<2x1x8x8xf32>
    %90 = vector.shape_cast %89 : vector<2x1x8x8xf32> to vector<2x8x8xf32>
    %91 = arith.addf %88, %90 : vector<2x8x8xf32>
    %cst_33 = arith.constant dense<0xFF800000> : vector<2x8xf32>
    %92 = vector.multi_reduction <maximumf>, %91, %cst_33 [2] : vector<2x8x8xf32> to vector<2x8xf32>
    %93 = vector.shape_cast %92 : vector<2x8xf32> to vector<2x8x1xf32>
    %94 = vector.broadcast %93 : vector<2x8x1xf32> to vector<2x8x8xf32>
    %95 = arith.subf %91, %94 : vector<2x8x8xf32>
    %96 = math.exp %95 : vector<2x8x8xf32>
    %cst_34 = arith.constant dense<0.000000e+00> : vector<2x8xf32>
    %97 = vector.multi_reduction <add>, %96, %cst_34 [2] : vector<2x8x8xf32> to vector<2x8xf32>
    %98 = vector.shape_cast %97 : vector<2x8xf32> to vector<2x8x1xf32>
    %99 = tpu.reciprocal %98 {approx = true} : vector<2x8x1xf32> -> vector<2x8x1xf32>
    %100 = vector.broadcast %99 : vector<2x8x1xf32> to vector<2x8x8xf32>
    %101 = arith.mulf %96, %100 : vector<2x8x8xf32>
    "tpu.trace_start"() <{level = 10 : i32, message = "bqk,bkd->bqd"}> : () -> ()
    %cst_35 = arith.constant dense<0.000000e+00> : vector<2x8x32xf32>
    %102 = tpu.matmul %101, %87, %cst_35 {dimension_numbers = #tpu.dot_dimension_numbers<[2], [1], [1], [2], [0, 0, 0, 1, 1, 2], [0], [0]>} : vector<2x8x8xf32>, vector<2x8x32xf32>, vector<2x8x32xf32> -> vector<2x8x32xf32>
    "tpu.trace_stop"() : () -> ()
    %103 = vector.shape_cast %37 : vector<2x8x8xf32> to vector<2x1x8x8xf32>
    %104 = vector.shape_cast %55 : vector<2x8x8xf32> to vector<2x1x8x8xf32>
    %105 = vector.shape_cast %73 : vector<2x8x8xf32> to vector<2x1x8x8xf32>
    %106 = vector.shape_cast %91 : vector<2x8x8xf32> to vector<2x1x8x8xf32>
    %107 = tpu.concatenate %103, %104, %105, %106 in 1 : vector<2x1x8x8xf32>, vector<2x1x8x8xf32>, vector<2x1x8x8xf32>, vector<2x1x8x8xf32> -> vector<2x4x8x8xf32>
    %c0_36 = arith.constant 0 : index
    %c0_37 = arith.constant 0 : index
    %c0_38 = arith.constant 0 : index
    %c0_39 = arith.constant 0 : index
    %108 = vector.load %arg12[%c0_36, %c0_37, %c0_38, %c0_39] : memref<2x4x8x8xf32, #tpu.memory_space<vmem>>, vector<2x4x8x8xf32>
    tpu.vector_store %arg12[%c0_36, %c0_37, %c0_38, %c0_39], %107 {strides = array<i32>} : memref<2x4x8x8xf32, #tpu.memory_space<vmem>>, vector<2x4x8x8xf32>,
    %109 = tpu.concatenate %48, %66, %84, %102 in 2 : vector<2x8x32xf32>, vector<2x8x32xf32>, vector<2x8x32xf32>, vector<2x8x32xf32> -> vector<2x8x128xf32>
    %110 = vector.shape_cast %109 : vector<2x8x128xf32> to vector<16x128xf32>
    %111 = arith.truncf %110 : vector<16x128xf32> to vector<16x128xbf16>
    %c0_40 = arith.constant 0 : index
    %c0_41 = arith.constant 0 : index
    %112 = vector.load %arg9[%c0_40, %c0_41] : memref<128x128xbf16, #tpu.memory_space<vmem>>, vector<128x128xbf16>
    %cst_42 = arith.constant dense<0.000000e+00> : vector<16x128xf32>
    %113 = tpu.matmul %111, %112, %cst_42 {dimension_numbers = #tpu.dot_dimension_numbers<[1], [0], [0], [1], [0, 0, 1, 1], [], []>} : vector<16x128xbf16>, vector<128x128xbf16>, vector<16x128xf32> -> vector<16x128xf32>
    %c0_43 = arith.constant 0 : index
    %c0_44 = arith.constant 0 : index
    %114 = vector.load %arg10[%c0_43, %c0_44] : memref<1x128xf32, #tpu.memory_space<vmem>>, vector<1x128xf32>
    %115 = vector.broadcast %114 : vector<1x128xf32> to vector<16x128xf32>
    %116 = arith.addf %113, %115 : vector<16x128xf32>
    %117 = arith.addf %15, %116 : vector<16x128xf32>
    %118 = vector.shape_cast %117 : vector<16x128xf32> to vector<2x8x128xf32>
    %c0_45 = arith.constant 0 : index
    %c0_46 = arith.constant 0 : index
    %c0_47 = arith.constant 0 : index
    %119 = vector.load %arg11[%c0_45, %c0_46, %c0_47] : memref<2x8x128xf32, #tpu.memory_space<vmem>>, vector<2x8x128xf32>
    tpu.vector_store %arg11[%c0_45, %c0_46, %c0_47], %118 {strides = array<i32>} : memref<2x8x128xf32, #tpu.memory_space<vmem>>, vector<2x8x128xf32>,
    %cst_48 = arith.constant dense<0.000000e+00> : vector<128xf32>
    %120 = vector.multi_reduction <add>, %117, %cst_48 [0] : vector<16x128xf32> to vector<128xf32>
    %121 = vector.shape_cast %120 : vector<128xf32> to vector<1x128xf32>
    %122 = arith.mulf %117, %117 : vector<16x128xf32>
    %cst_49 = arith.constant dense<0.000000e+00> : vector<128xf32>
    %123 = vector.multi_reduction <add>, %122, %cst_49 [0] : vector<16x128xf32> to vector<128xf32>
    %124 = vector.shape_cast %123 : vector<128xf32> to vector<1x128xf32>
    %125 = tpu.concatenate %121, %124 in 0 : vector<1x128xf32>, vector<1x128xf32> -> vector<2x128xf32>
    %c0_50 = arith.constant 0 : index
    %c0_51 = arith.constant 0 : index
    %c0_52 = arith.constant 0 : index
    %126 = vector.load %arg13[%c0_50, %c0_51, %c0_52] : memref<1x2x128xf32, #tpu.memory_space<vmem>>, vector<1x2x128xf32>
    %127 = vector.shape_cast %126 : vector<1x2x128xf32> to vector<2x128xf32>
    %128 = vector.shape_cast %125 : vector<2x128xf32> to vector<1x2x128xf32>
    tpu.vector_store %arg13[%c0_50, %c0_51, %c0_52], %128 {strides = array<i32>} : memref<1x2x128xf32, #tpu.memory_space<vmem>>, vector<1x2x128xf32>,
    return
  }
  func.func @transform_0(%arg0: i32) -> (i32, i32, i32) {
    %c0_i32 = arith.constant 0 : i32
    %c0_i32_0 = arith.constant 0 : i32
    %c0_i32_1 = arith.constant 0 : i32
    return %arg0, %c0_i32, %c0_i32_0 : i32, i32, i32
  }
  func.func @transform_1(%arg0: i32) -> (i32, i32, i32, i32) {
    %c0_i32 = arith.constant 0 : i32
    %c0_i32_0 = arith.constant 0 : i32
    %c0_i32_1 = arith.constant 0 : i32
    %c0_i32_2 = arith.constant 0 : i32
    return %arg0, %c0_i32, %c0_i32_0, %c0_i32_1 : i32, i32, i32, i32
  }
  func.func @transform_2(%arg0: i32) -> (i32, i32) {
    %c0_i32 = arith.constant 0 : i32
    %c0_i32_0 = arith.constant 0 : i32
    %c0_i32_1 = arith.constant 0 : i32
    return %c0_i32, %c0_i32_0 : i32, i32
  }
  func.func @transform_3(%arg0: i32) -> (i32, i32) {
    %c0_i32 = arith.constant 0 : i32
    %c0_i32_0 = arith.constant 0 : i32
    %c0_i32_1 = arith.constant 0 : i32
    return %c0_i32, %c0_i32_0 : i32, i32
  }
  func.func @transform_4(%arg0: i32) -> (i32, i32) {
    %c0_i32 = arith.constant 0 : i32
    %c0_i32_0 = arith.constant 0 : i32
    %c0_i32_1 = arith.constant 0 : i32
    return %c0_i32, %c0_i32_0 : i32, i32
  }
  func.func @transform_5(%arg0: i32) -> (i32, i32) {
    %c0_i32 = arith.constant 0 : i32
    %c0_i32_0 = arith.constant 0 : i32
    %c0_i32_1 = arith.constant 0 : i32
    return %c0_i32, %c0_i32_0 : i32, i32
  }
  func.func @transform_6(%arg0: i32) -> (i32, i32) {
    %c0_i32 = arith.constant 0 : i32
    %c0_i32_0 = arith.constant 0 : i32
    %c0_i32_1 = arith.constant 0 : i32
    return %c0_i32, %c0_i32_0 : i32, i32
  }
  func.func @transform_7(%arg0: i32) -> (i32, i32) {
    %c0_i32 = arith.constant 0 : i32
    %c0_i32_0 = arith.constant 0 : i32
    %c0_i32_1 = arith.constant 0 : i32
    return %c0_i32, %c0_i32_0 : i32, i32
  }
  func.func @transform_8(%arg0: i32) -> (i32, i32) {
    %c0_i32 = arith.constant 0 : i32
    %c0_i32_0 = arith.constant 0 : i32
    %c0_i32_1 = arith.constant 0 : i32
    return %c0_i32, %c0_i32_0 : i32, i32
  }
  func.func @transform_9(%arg0: i32) -> (i32, i32) {
    %c0_i32 = arith.constant 0 : i32
    %c0_i32_0 = arith.constant 0 : i32
    %c0_i32_1 = arith.constant 0 : i32
    return %c0_i32, %c0_i32_0 : i32, i32
  }
  func.func @transform_10(%arg0: i32) -> (i32, i32, i32) {
    %c0_i32 = arith.constant 0 : i32
    %c0_i32_0 = arith.constant 0 : i32
    %c0_i32_1 = arith.constant 0 : i32
    return %arg0, %c0_i32, %c0_i32_0 : i32, i32, i32
  }
  func.func @transform_11(%arg0: i32) -> (i32, i32, i32, i32) {
    %c0_i32 = arith.constant 0 : i32
    %c0_i32_0 = arith.constant 0 : i32
    %c0_i32_1 = arith.constant 0 : i32
    %c0_i32_2 = arith.constant 0 : i32
    return %arg0, %c0_i32, %c0_i32_0, %c0_i32_1 : i32, i32, i32, i32
  }
  func.func @transform_12(%arg0: i32) -> (i32, i32, i32) {
    %c0_i32 = arith.constant 0 : i32
    %c0_i32_0 = arith.constant 0 : i32
    %c0_i32_1 = arith.constant 0 : i32
    return %arg0, %c0_i32, %c0_i32_0 : i32, i32, i32
  }
}

module attributes {stable_mosaic.version = 11 : i64} {
  func.func @_ffn_kernel(%arg0: i32, %arg1: memref<2x8x128xf32, #tpu.memory_space<vmem>>, %arg2: memref<1x128xf32, #tpu.memory_space<vmem>>, %arg3: memref<1x128xf32, #tpu.memory_space<vmem>>, %arg4: memref<1x128xf32, #tpu.memory_space<vmem>>, %arg5: memref<1x128xf32, #tpu.memory_space<vmem>>, %arg6: memref<128x256xbf16, #tpu.memory_space<vmem>>, %arg7: memref<1x256xf32, #tpu.memory_space<vmem>>, %arg8: memref<256x128xbf16, #tpu.memory_space<vmem>>, %arg9: memref<1x128xf32, #tpu.memory_space<vmem>>, %arg10: memref<2x8x128xf32, #tpu.memory_space<vmem>>, %arg11: memref<1x2x128xf32, #tpu.memory_space<vmem>>) attributes {dimension_semantics = [#tpu.dimension_semantics<parallel>], iteration_bounds = array<i64: 4>, scalar_prefetch = 0 : i64, scratch_operands = 0 : i64, tpu.core_type = #tpu.core_type<tc>, window_params = [{transform_indices = @transform_0, window_bounds = array<i64: 2, 8, 128>}, {pipeline_mode = #tpu.pipeline_mode<synchronous>, transform_indices = @transform_1, window_bounds = array<i64: 1, 128>}, {pipeline_mode = #tpu.pipeline_mode<synchronous>, transform_indices = @transform_2, window_bounds = array<i64: 1, 128>}, {pipeline_mode = #tpu.pipeline_mode<synchronous>, transform_indices = @transform_3, window_bounds = array<i64: 1, 128>}, {pipeline_mode = #tpu.pipeline_mode<synchronous>, transform_indices = @transform_4, window_bounds = array<i64: 1, 128>}, {pipeline_mode = #tpu.pipeline_mode<synchronous>, transform_indices = @transform_5, window_bounds = array<i64: 128, 256>}, {pipeline_mode = #tpu.pipeline_mode<synchronous>, transform_indices = @transform_6, window_bounds = array<i64: 1, 256>}, {pipeline_mode = #tpu.pipeline_mode<synchronous>, transform_indices = @transform_7, window_bounds = array<i64: 256, 128>}, {pipeline_mode = #tpu.pipeline_mode<synchronous>, transform_indices = @transform_8, window_bounds = array<i64: 1, 128>}, {transform_indices = @transform_9, window_bounds = array<i64: 2, 8, 128>}, {transform_indices = @transform_10, window_bounds = array<i64: 1, 2, 128>}]} {
    %c0 = arith.constant 0 : index
    %c0_0 = arith.constant 0 : index
    %c0_1 = arith.constant 0 : index
    %0 = vector.load %arg1[%c0, %c0_0, %c0_1] : memref<2x8x128xf32, #tpu.memory_space<vmem>>, vector<2x8x128xf32>
    %1 = vector.shape_cast %0 : vector<2x8x128xf32> to vector<16x128xf32>
    %c0_2 = arith.constant 0 : index
    %c0_3 = arith.constant 0 : index
    %2 = vector.load %arg3[%c0_2, %c0_3] : memref<1x128xf32, #tpu.memory_space<vmem>>, vector<1x128xf32>
    %cst = arith.constant 9.99999974E-6 : f32
    %3 = vector.broadcast %cst : f32 to vector<1x128xf32>
    %4 = arith.addf %2, %3 : vector<1x128xf32>
    %5 = math.rsqrt %4 : vector<1x128xf32>
    %c0_4 = arith.constant 0 : index
    %c0_5 = arith.constant 0 : index
    %6 = vector.load %arg4[%c0_4, %c0_5] : memref<1x128xf32, #tpu.memory_space<vmem>>, vector<1x128xf32>
    %7 = arith.mulf %5, %6 : vector<1x128xf32>
    %c0_6 = arith.constant 0 : index
    %c0_7 = arith.constant 0 : index
    %8 = vector.load %arg2[%c0_6, %c0_7] : memref<1x128xf32, #tpu.memory_space<vmem>>, vector<1x128xf32>
    %9 = vector.broadcast %8 : vector<1x128xf32> to vector<16x128xf32>
    %10 = arith.subf %1, %9 : vector<16x128xf32>
    %11 = vector.broadcast %7 : vector<1x128xf32> to vector<16x128xf32>
    %12 = arith.mulf %10, %11 : vector<16x128xf32>
    %c0_8 = arith.constant 0 : index
    %c0_9 = arith.constant 0 : index
    %13 = vector.load %arg5[%c0_8, %c0_9] : memref<1x128xf32, #tpu.memory_space<vmem>>, vector<1x128xf32>
    %14 = vector.broadcast %13 : vector<1x128xf32> to vector<16x128xf32>
    %15 = arith.addf %12, %14 : vector<16x128xf32>
    %16 = arith.truncf %15 : vector<16x128xf32> to vector<16x128xbf16>
    %c0_10 = arith.constant 0 : index
    %c0_11 = arith.constant 0 : index
    %17 = vector.load %arg6[%c0_10, %c0_11] : memref<128x256xbf16, #tpu.memory_space<vmem>>, vector<128x256xbf16>
    %cst_12 = arith.constant dense<0.000000e+00> : vector<16x256xf32>
    %18 = tpu.matmul %16, %17, %cst_12 {dimension_numbers = #tpu.dot_dimension_numbers<[1], [0], [0], [1], [0, 0, 1, 1], [], []>} : vector<16x128xbf16>, vector<128x256xbf16>, vector<16x256xf32> -> vector<16x256xf32>
    %c0_13 = arith.constant 0 : index
    %c0_14 = arith.constant 0 : index
    %19 = vector.load %arg7[%c0_13, %c0_14] : memref<1x256xf32, #tpu.memory_space<vmem>>, vector<1x256xf32>
    %20 = vector.broadcast %19 : vector<1x256xf32> to vector<16x256xf32>
    %21 = arith.addf %18, %20 : vector<16x256xf32>
    %22 = arith.mulf %21, %21 : vector<16x256xf32>
    %23 = arith.mulf %21, %22 : vector<16x256xf32>
    %cst_15 = arith.constant 4.471500e-02 : f32
    %24 = vector.broadcast %cst_15 : f32 to vector<16x256xf32>
    %25 = arith.mulf %24, %23 : vector<16x256xf32>
    %26 = arith.addf %21, %25 : vector<16x256xf32>
    %cst_16 = arith.constant 0.797884583 : f32
    %27 = vector.broadcast %cst_16 : f32 to vector<16x256xf32>
    %28 = arith.mulf %27, %26 : vector<16x256xf32>
    %29 = math.tanh %28 : vector<16x256xf32>
    %cst_17 = arith.constant 1.000000e+00 : f32
    %30 = vector.broadcast %cst_17 : f32 to vector<16x256xf32>
    %31 = arith.addf %30, %29 : vector<16x256xf32>
    %cst_18 = arith.constant 5.000000e-01 : f32
    %32 = vector.broadcast %cst_18 : f32 to vector<16x256xf32>
    %33 = arith.mulf %32, %31 : vector<16x256xf32>
    %34 = arith.mulf %21, %33 : vector<16x256xf32>
    %35 = arith.truncf %34 : vector<16x256xf32> to vector<16x256xbf16>
    %c0_19 = arith.constant 0 : index
    %c0_20 = arith.constant 0 : index
    %36 = vector.load %arg8[%c0_19, %c0_20] : memref<256x128xbf16, #tpu.memory_space<vmem>>, vector<256x128xbf16>
    %cst_21 = arith.constant dense<0.000000e+00> : vector<16x128xf32>
    %37 = tpu.matmul %35, %36, %cst_21 {dimension_numbers = #tpu.dot_dimension_numbers<[1], [0], [0], [1], [0, 0, 1, 1], [], []>} : vector<16x256xbf16>, vector<256x128xbf16>, vector<16x128xf32> -> vector<16x128xf32>
    %c0_22 = arith.constant 0 : index
    %c0_23 = arith.constant 0 : index
    %38 = vector.load %arg9[%c0_22, %c0_23] : memref<1x128xf32, #tpu.memory_space<vmem>>, vector<1x128xf32>
    %39 = vector.broadcast %38 : vector<1x128xf32> to vector<16x128xf32>
    %40 = arith.addf %37, %39 : vector<16x128xf32>
    %41 = arith.addf %15, %40 : vector<16x128xf32>
    %42 = vector.shape_cast %41 : vector<16x128xf32> to vector<2x8x128xf32>
    %c0_24 = arith.constant 0 : index
    %c0_25 = arith.constant 0 : index
    %c0_26 = arith.constant 0 : index
    %43 = vector.load %arg10[%c0_24, %c0_25, %c0_26] : memref<2x8x128xf32, #tpu.memory_space<vmem>>, vector<2x8x128xf32>
    tpu.vector_store %arg10[%c0_24, %c0_25, %c0_26], %42 {strides = array<i32>} : memref<2x8x128xf32, #tpu.memory_space<vmem>>, vector<2x8x128xf32>,
    %cst_27 = arith.constant dense<0.000000e+00> : vector<128xf32>
    %44 = vector.multi_reduction <add>, %41, %cst_27 [0] : vector<16x128xf32> to vector<128xf32>
    %45 = vector.shape_cast %44 : vector<128xf32> to vector<1x128xf32>
    %46 = arith.mulf %41, %41 : vector<16x128xf32>
    %cst_28 = arith.constant dense<0.000000e+00> : vector<128xf32>
    %47 = vector.multi_reduction <add>, %46, %cst_28 [0] : vector<16x128xf32> to vector<128xf32>
    %48 = vector.shape_cast %47 : vector<128xf32> to vector<1x128xf32>
    %49 = tpu.concatenate %45, %48 in 0 : vector<1x128xf32>, vector<1x128xf32> -> vector<2x128xf32>
    %c0_29 = arith.constant 0 : index
    %c0_30 = arith.constant 0 : index
    %c0_31 = arith.constant 0 : index
    %50 = vector.load %arg11[%c0_29, %c0_30, %c0_31] : memref<1x2x128xf32, #tpu.memory_space<vmem>>, vector<1x2x128xf32>
    %51 = vector.shape_cast %50 : vector<1x2x128xf32> to vector<2x128xf32>
    %52 = vector.shape_cast %49 : vector<2x128xf32> to vector<1x2x128xf32>
    tpu.vector_store %arg11[%c0_29, %c0_30, %c0_31], %52 {strides = array<i32>} : memref<1x2x128xf32, #tpu.memory_space<vmem>>, vector<1x2x128xf32>,
    return
  }
  func.func @transform_0(%arg0: i32) -> (i32, i32, i32) {
    %c0_i32 = arith.constant 0 : i32
    %c0_i32_0 = arith.constant 0 : i32
    %c0_i32_1 = arith.constant 0 : i32
    return %arg0, %c0_i32, %c0_i32_0 : i32, i32, i32
  }
  func.func @transform_1(%arg0: i32) -> (i32, i32) {
    %c0_i32 = arith.constant 0 : i32
    %c0_i32_0 = arith.constant 0 : i32
    %c0_i32_1 = arith.constant 0 : i32
    return %c0_i32, %c0_i32_0 : i32, i32
  }
  func.func @transform_2(%arg0: i32) -> (i32, i32) {
    %c0_i32 = arith.constant 0 : i32
    %c0_i32_0 = arith.constant 0 : i32
    %c0_i32_1 = arith.constant 0 : i32
    return %c0_i32, %c0_i32_0 : i32, i32
  }
  func.func @transform_3(%arg0: i32) -> (i32, i32) {
    %c0_i32 = arith.constant 0 : i32
    %c0_i32_0 = arith.constant 0 : i32
    %c0_i32_1 = arith.constant 0 : i32
    return %c0_i32, %c0_i32_0 : i32, i32
  }
  func.func @transform_4(%arg0: i32) -> (i32, i32) {
    %c0_i32 = arith.constant 0 : i32
    %c0_i32_0 = arith.constant 0 : i32
    %c0_i32_1 = arith.constant 0 : i32
    return %c0_i32, %c0_i32_0 : i32, i32
  }
  func.func @transform_5(%arg0: i32) -> (i32, i32) {
    %c0_i32 = arith.constant 0 : i32
    %c0_i32_0 = arith.constant 0 : i32
    %c0_i32_1 = arith.constant 0 : i32
    return %c0_i32, %c0_i32_0 : i32, i32
  }
  func.func @transform_6(%arg0: i32) -> (i32, i32) {
    %c0_i32 = arith.constant 0 : i32
    %c0_i32_0 = arith.constant 0 : i32
    %c0_i32_1 = arith.constant 0 : i32
    return %c0_i32, %c0_i32_0 : i32, i32
  }
  func.func @transform_7(%arg0: i32) -> (i32, i32) {
    %c0_i32 = arith.constant 0 : i32
    %c0_i32_0 = arith.constant 0 : i32
    %c0_i32_1 = arith.constant 0 : i32
    return %c0_i32, %c0_i32_0 : i32, i32
  }
  func.func @transform_8(%arg0: i32) -> (i32, i32) {
    %c0_i32 = arith.constant 0 : i32
    %c0_i32_0 = arith.constant 0 : i32
    %c0_i32_1 = arith.constant 0 : i32
    return %c0_i32, %c0_i32_0 : i32, i32
  }
  func.func @transform_9(%arg0: i32) -> (i32, i32, i32) {
    %c0_i32 = arith.constant 0 : i32
    %c0_i32_0 = arith.constant 0 : i32
    %c0_i32_1 = arith.constant 0 : i32
    return %arg0, %c0_i32, %c0_i32_0 : i32, i32, i32
  }
  func.func @transform_10(%arg0: i32) -> (i32, i32, i32) {
    %c0_i32 = arith.constant 0 : i32
    %c0_i32_0 = arith.constant 0 : i32
    %c0_i32_1 = arith.constant 0 : i32
    return %arg0, %c0_i32, %c0_i32_0 : i32, i32, i32
  }
}

module attributes {stable_mosaic.version = 11 : i64} {
  func.func @kernel(%arg0: i32, %arg1: memref<2x8x128xf32, #tpu.memory_space<vmem>>, %arg2: memref<2x4x8x8xf32, #tpu.memory_space<vmem>>, %arg3: memref<1x128xf32, #tpu.memory_space<vmem>>, %arg4: memref<1x128xf32, #tpu.memory_space<vmem>>, %arg5: memref<1x128xf32, #tpu.memory_space<vmem>>, %arg6: memref<1x128xf32, #tpu.memory_space<vmem>>, %arg7: memref<128x384xbf16, #tpu.memory_space<vmem>>, %arg8: memref<1x384xf32, #tpu.memory_space<vmem>>, %arg9: memref<128x128xbf16, #tpu.memory_space<vmem>>, %arg10: memref<1x128xf32, #tpu.memory_space<vmem>>, %arg11: memref<2x8x128xf32, #tpu.memory_space<vmem>>, %arg12: memref<2x4x8x8xf32, #tpu.memory_space<vmem>>, %arg13: memref<1x2x128xf32, #tpu.memory_space<vmem>>) attributes {dimension_semantics = [#tpu.dimension_semantics<parallel>], iteration_bounds = array<i64: 4>, scalar_prefetch = 0 : i64, scratch_operands = 0 : i64, tpu.core_type = #tpu.core_type<tc>, window_params = [{transform_indices = @transform_0, window_bounds = array<i64: 2, 8, 128>}, {transform_indices = @transform_1, window_bounds = array<i64: 2, 4, 8, 8>}, {pipeline_mode = #tpu.pipeline_mode<synchronous>, transform_indices = @transform_2, window_bounds = array<i64: 1, 128>}, {pipeline_mode = #tpu.pipeline_mode<synchronous>, transform_indices = @transform_3, window_bounds = array<i64: 1, 128>}, {pipeline_mode = #tpu.pipeline_mode<synchronous>, transform_indices = @transform_4, window_bounds = array<i64: 1, 128>}, {pipeline_mode = #tpu.pipeline_mode<synchronous>, transform_indices = @transform_5, window_bounds = array<i64: 1, 128>}, {pipeline_mode = #tpu.pipeline_mode<synchronous>, transform_indices = @transform_6, window_bounds = array<i64: 128, 384>}, {pipeline_mode = #tpu.pipeline_mode<synchronous>, transform_indices = @transform_7, window_bounds = array<i64: 1, 384>}, {pipeline_mode = #tpu.pipeline_mode<synchronous>, transform_indices = @transform_8, window_bounds = array<i64: 128, 128>}, {pipeline_mode = #tpu.pipeline_mode<synchronous>, transform_indices = @transform_9, window_bounds = array<i64: 1, 128>}, {transform_indices = @transform_10, window_bounds = array<i64: 2, 8, 128>}, {transform_indices = @transform_11, window_bounds = array<i64: 2, 4, 8, 8>}, {transform_indices = @transform_12, window_bounds = array<i64: 1, 2, 128>}]} {
    %c0 = arith.constant 0 : index
    %c0_0 = arith.constant 0 : index
    %c0_1 = arith.constant 0 : index
    %0 = vector.load %arg1[%c0, %c0_0, %c0_1] : memref<2x8x128xf32, #tpu.memory_space<vmem>>, vector<2x8x128xf32>
    %1 = vector.shape_cast %0 : vector<2x8x128xf32> to vector<16x128xf32>
    %c0_2 = arith.constant 0 : index
    %c0_3 = arith.constant 0 : index
    %2 = vector.load %arg4[%c0_2, %c0_3] : memref<1x128xf32, #tpu.memory_space<vmem>>, vector<1x128xf32>
    %cst = arith.constant 9.99999974E-6 : f32
    %3 = vector.broadcast %cst : f32 to vector<1x128xf32>
    %4 = arith.addf %2, %3 : vector<1x128xf32>
    %5 = math.rsqrt %4 : vector<1x128xf32>
    %c0_4 = arith.constant 0 : index
    %c0_5 = arith.constant 0 : index
    %6 = vector.load %arg5[%c0_4, %c0_5] : memref<1x128xf32, #tpu.memory_space<vmem>>, vector<1x128xf32>
    %7 = arith.mulf %5, %6 : vector<1x128xf32>
    %c0_6 = arith.constant 0 : index
    %c0_7 = arith.constant 0 : index
    %8 = vector.load %arg3[%c0_6, %c0_7] : memref<1x128xf32, #tpu.memory_space<vmem>>, vector<1x128xf32>
    %9 = vector.broadcast %8 : vector<1x128xf32> to vector<16x128xf32>
    %10 = arith.subf %1, %9 : vector<16x128xf32>
    %11 = vector.broadcast %7 : vector<1x128xf32> to vector<16x128xf32>
    %12 = arith.mulf %10, %11 : vector<16x128xf32>
    %c0_8 = arith.constant 0 : index
    %c0_9 = arith.constant 0 : index
    %13 = vector.load %arg6[%c0_8, %c0_9] : memref<1x128xf32, #tpu.memory_space<vmem>>, vector<1x128xf32>
    %14 = vector.broadcast %13 : vector<1x128xf32> to vector<16x128xf32>
    %15 = arith.addf %12, %14 : vector<16x128xf32>
    %16 = arith.truncf %15 : vector<16x128xf32> to vector<16x128xbf16>
    %c0_10 = arith.constant 0 : index
    %c0_11 = arith.constant 0 : index
    %17 = vector.load %arg7[%c0_10, %c0_11] : memref<128x384xbf16, #tpu.memory_space<vmem>>, vector<128x384xbf16>
    %cst_12 = arith.constant dense<0.000000e+00> : vector<16x384xf32>
    %18 = tpu.matmul %16, %17, %cst_12 {dimension_numbers = #tpu.dot_dimension_numbers<[1], [0], [0], [1], [0, 0, 1, 1], [], []>} : vector<16x128xbf16>, vector<128x384xbf16>, vector<16x384xf32> -> vector<16x384xf32>
    %c0_13 = arith.constant 0 : index
    %c0_14 = arith.constant 0 : index
    %19 = vector.load %arg8[%c0_13, %c0_14] : memref<1x384xf32, #tpu.memory_space<vmem>>, vector<1x384xf32>
    %20 = vector.broadcast %19 : vector<1x384xf32> to vector<16x384xf32>
    %21 = arith.addf %18, %20 : vector<16x384xf32>
    %22 = vector.extract_strided_slice %21 {offsets = [0, 0], sizes = [16, 128], strides = [1, 1]} : vector<16x384xf32> to vector<16x128xf32>
    %cst_15 = arith.constant 0.176776692 : f32
    %23 = vector.broadcast %cst_15 : f32 to vector<16x128xf32>
    %24 = arith.mulf %22, %23 : vector<16x128xf32>
    %25 = vector.shape_cast %24 : vector<16x128xf32> to vector<2x8x128xf32>
    %26 = vector.extract_strided_slice %21 {offsets = [0, 128], sizes = [16, 128], strides = [1, 1]} : vector<16x384xf32> to vector<16x128xf32>
    %27 = vector.shape_cast %26 : vector<16x128xf32> to vector<2x8x128xf32>
    %28 = vector.extract_strided_slice %21 {offsets = [0, 256], sizes = [16, 128], strides = [1, 1]} : vector<16x384xf32> to vector<16x128xf32>
    %29 = vector.shape_cast %28 : vector<16x128xf32> to vector<2x8x128xf32>
    %c0_16 = arith.constant 0 : index
    %c0_17 = arith.constant 0 : index
    %c0_18 = arith.constant 0 : index
    %c0_19 = arith.constant 0 : index
    %30 = vector.load %arg2[%c0_16, %c0_17, %c0_18, %c0_19] : memref<2x4x8x8xf32, #tpu.memory_space<vmem>>, vector<2x4x8x8xf32>
    %31 = vector.extract_strided_slice %25 {offsets = [0, 0, 0], sizes = [2, 8, 32], strides = [1, 1, 1]} : vector<2x8x128xf32> to vector<2x8x32xf32>
    %32 = vector.extract_strided_slice %27 {offsets = [0, 0, 0], sizes = [2, 8, 32], strides = [1, 1, 1]} : vector<2x8x128xf32> to vector<2x8x32xf32>
    %33 = vector.extract_strided_slice %29 {offsets = [0, 0, 0], sizes = [2, 8, 32], strides = [1, 1, 1]} : vector<2x8x128xf32> to vector<2x8x32xf32>
    "tpu.trace_start"() <{level = 10 : i32, message = "bqd,bkd->bqk"}> : () -> ()
    %cst_20 = arith.constant dense<0.000000e+00> : vector<2x8x8xf32>
    %34 = tpu.matmul %31, %32, %cst_20 {dimension_numbers = #tpu.dot_dimension_numbers<[2], [2], [1], [1], [0, 0, 0, 1, 1, 1], [0], [0]>} : vector<2x8x32xf32>, vector<2x8x32xf32>, vector<2x8x8xf32> -> vector<2x8x8xf32>
    "tpu.trace_stop"() : () -> ()
    %35 = vector.extract_strided_slice %30 {offsets = [0, 0, 0, 0], sizes = [2, 1, 8, 8], strides = [1, 1, 1, 1]} : vector<2x4x8x8xf32> to vector<2x1x8x8xf32>
    %36 = vector.shape_cast %35 : vector<2x1x8x8xf32> to vector<2x8x8xf32>
    %37 = arith.addf %34, %36 : vector<2x8x8xf32>
    %cst_21 = arith.constant dense<0xFF800000> : vector<2x8xf32>
    %38 = vector.multi_reduction <maximumf>, %37, %cst_21 [2] : vector<2x8x8xf32> to vector<2x8xf32>
    %39 = vector.shape_cast %38 : vector<2x8xf32> to vector<2x8x1xf32>
    %40 = vector.broadcast %39 : vector<2x8x1xf32> to vector<2x8x8xf32>
    %41 = arith.subf %37, %40 : vector<2x8x8xf32>
    %42 = math.exp %41 : vector<2x8x8xf32>
    %cst_22 = arith.constant dense<0.000000e+00> : vector<2x8xf32>
    %43 = vector.multi_reduction <add>, %42, %cst_22 [2] : vector<2x8x8xf32> to vector<2x8xf32>
    %44 = vector.shape_cast %43 : vector<2x8xf32> to vector<2x8x1xf32>
    %45 = tpu.reciprocal %44 {approx = true} : vector<2x8x1xf32> -> vector<2x8x1xf32>
    %46 = vector.broadcast %45 : vector<2x8x1xf32> to vector<2x8x8xf32>
    %47 = arith.mulf %42, %46 : vector<2x8x8xf32>
    "tpu.trace_start"() <{level = 10 : i32, message = "bqk,bkd->bqd"}> : () -> ()
    %cst_23 = arith.constant dense<0.000000e+00> : vector<2x8x32xf32>
    %48 = tpu.matmul %47, %33, %cst_23 {dimension_numbers = #tpu.dot_dimension_numbers<[2], [1], [1], [2], [0, 0, 0, 1, 1, 2], [0], [0]>} : vector<2x8x8xf32>, vector<2x8x32xf32>, vector<2x8x32xf32> -> vector<2x8x32xf32>
    "tpu.trace_stop"() : () -> ()
    %49 = vector.extract_strided_slice %25 {offsets = [0, 0, 32], sizes = [2, 8, 32], strides = [1, 1, 1]} : vector<2x8x128xf32> to vector<2x8x32xf32>
    %50 = vector.extract_strided_slice %27 {offsets = [0, 0, 32], sizes = [2, 8, 32], strides = [1, 1, 1]} : vector<2x8x128xf32> to vector<2x8x32xf32>
    %51 = vector.extract_strided_slice %29 {offsets = [0, 0, 32], sizes = [2, 8, 32], strides = [1, 1, 1]} : vector<2x8x128xf32> to vector<2x8x32xf32>
    "tpu.trace_start"() <{level = 10 : i32, message = "bqd,bkd->bqk"}> : () -> ()
    %cst_24 = arith.constant dense<0.000000e+00> : vector<2x8x8xf32>
    %52 = tpu.matmul %49, %50, %cst_24 {dimension_numbers = #tpu.dot_dimension_numbers<[2], [2], [1], [1], [0, 0, 0, 1, 1, 1], [0], [0]>} : vector<2x8x32xf32>, vector<2x8x32xf32>, vector<2x8x8xf32> -> vector<2x8x8xf32>
    "tpu.trace_stop"() : () -> ()
    %53 = vector.extract_strided_slice %30 {offsets = [0, 1, 0, 0], sizes = [2, 1, 8, 8], strides = [1, 1, 1, 1]} : vector<2x4x8x8xf32> to vector<2x1x8x8xf32>
    %54 = vector.shape_cast %53 : vector<2x1x8x8xf32> to vector<2x8x8xf32>
    %55 = arith.addf %52, %54 : vector<2x8x8xf32>
    %cst_25 = arith.constant dense<0xFF800000> : vector<2x8xf32>
    %56 = vector.multi_reduction <maximumf>, %55, %cst_25 [2] : vector<2x8x8xf32> to vector<2x8xf32>
    %57 = vector.shape_cast %56 : vector<2x8xf32> to vector<2x8x1xf32>
    %58 = vector.broadcast %57 : vector<2x8x1xf32> to vector<2x8x8xf32>
    %59 = arith.subf %55, %58 : vector<2x8x8xf32>
    %60 = math.exp %59 : vector<2x8x8xf32>
    %cst_26 = arith.constant dense<0.000000e+00> : vector<2x8xf32>
    %61 = vector.multi_reduction <add>, %60, %cst_26 [2] : vector<2x8x8xf32> to vector<2x8xf32>
    %62 = vector.shape_cast %61 : vector<2x8xf32> to vector<2x8x1xf32>
    %63 = tpu.reciprocal %62 {approx = true} : vector<2x8x1xf32> -> vector<2x8x1xf32>
    %64 = vector.broadcast %63 : vector<2x8x1xf32> to vector<2x8x8xf32>
    %65 = arith.mulf %60, %64 : vector<2x8x8xf32>
    "tpu.trace_start"() <{level = 10 : i32, message = "bqk,bkd->bqd"}> : () -> ()
    %cst_27 = arith.constant dense<0.000000e+00> : vector<2x8x32xf32>
    %66 = tpu.matmul %65, %51, %cst_27 {dimension_numbers = #tpu.dot_dimension_numbers<[2], [1], [1], [2], [0, 0, 0, 1, 1, 2], [0], [0]>} : vector<2x8x8xf32>, vector<2x8x32xf32>, vector<2x8x32xf32> -> vector<2x8x32xf32>
    "tpu.trace_stop"() : () -> ()
    %67 = vector.extract_strided_slice %25 {offsets = [0, 0, 64], sizes = [2, 8, 32], strides = [1, 1, 1]} : vector<2x8x128xf32> to vector<2x8x32xf32>
    %68 = vector.extract_strided_slice %27 {offsets = [0, 0, 64], sizes = [2, 8, 32], strides = [1, 1, 1]} : vector<2x8x128xf32> to vector<2x8x32xf32>
    %69 = vector.extract_strided_slice %29 {offsets = [0, 0, 64], sizes = [2, 8, 32], strides = [1, 1, 1]} : vector<2x8x128xf32> to vector<2x8x32xf32>
    "tpu.trace_start"() <{level = 10 : i32, message = "bqd,bkd->bqk"}> : () -> ()
    %cst_28 = arith.constant dense<0.000000e+00> : vector<2x8x8xf32>
    %70 = tpu.matmul %67, %68, %cst_28 {dimension_numbers = #tpu.dot_dimension_numbers<[2], [2], [1], [1], [0, 0, 0, 1, 1, 1], [0], [0]>} : vector<2x8x32xf32>, vector<2x8x32xf32>, vector<2x8x8xf32> -> vector<2x8x8xf32>
    "tpu.trace_stop"() : () -> ()
    %71 = vector.extract_strided_slice %30 {offsets = [0, 2, 0, 0], sizes = [2, 1, 8, 8], strides = [1, 1, 1, 1]} : vector<2x4x8x8xf32> to vector<2x1x8x8xf32>
    %72 = vector.shape_cast %71 : vector<2x1x8x8xf32> to vector<2x8x8xf32>
    %73 = arith.addf %70, %72 : vector<2x8x8xf32>
    %cst_29 = arith.constant dense<0xFF800000> : vector<2x8xf32>
    %74 = vector.multi_reduction <maximumf>, %73, %cst_29 [2] : vector<2x8x8xf32> to vector<2x8xf32>
    %75 = vector.shape_cast %74 : vector<2x8xf32> to vector<2x8x1xf32>
    %76 = vector.broadcast %75 : vector<2x8x1xf32> to vector<2x8x8xf32>
    %77 = arith.subf %73, %76 : vector<2x8x8xf32>
    %78 = math.exp %77 : vector<2x8x8xf32>
    %cst_30 = arith.constant dense<0.000000e+00> : vector<2x8xf32>
    %79 = vector.multi_reduction <add>, %78, %cst_30 [2] : vector<2x8x8xf32> to vector<2x8xf32>
    %80 = vector.shape_cast %79 : vector<2x8xf32> to vector<2x8x1xf32>
    %81 = tpu.reciprocal %80 {approx = true} : vector<2x8x1xf32> -> vector<2x8x1xf32>
    %82 = vector.broadcast %81 : vector<2x8x1xf32> to vector<2x8x8xf32>
    %83 = arith.mulf %78, %82 : vector<2x8x8xf32>
    "tpu.trace_start"() <{level = 10 : i32, message = "bqk,bkd->bqd"}> : () -> ()
    %cst_31 = arith.constant dense<0.000000e+00> : vector<2x8x32xf32>
    %84 = tpu.matmul %83, %69, %cst_31 {dimension_numbers = #tpu.dot_dimension_numbers<[2], [1], [1], [2], [0, 0, 0, 1, 1, 2], [0], [0]>} : vector<2x8x8xf32>, vector<2x8x32xf32>, vector<2x8x32xf32> -> vector<2x8x32xf32>
    "tpu.trace_stop"() : () -> ()
    %85 = vector.extract_strided_slice %25 {offsets = [0, 0, 96], sizes = [2, 8, 32], strides = [1, 1, 1]} : vector<2x8x128xf32> to vector<2x8x32xf32>
    %86 = vector.extract_strided_slice %27 {offsets = [0, 0, 96], sizes = [2, 8, 32], strides = [1, 1, 1]} : vector<2x8x128xf32> to vector<2x8x32xf32>
    %87 = vector.extract_strided_slice %29 {offsets = [0, 0, 96], sizes = [2, 8, 32], strides = [1, 1, 1]} : vector<2x8x128xf32> to vector<2x8x32xf32>
    "tpu.trace_start"() <{level = 10 : i32, message = "bqd,bkd->bqk"}> : () -> ()
    %cst_32 = arith.constant dense<0.000000e+00> : vector<2x8x8xf32>
    %88 = tpu.matmul %85, %86, %cst_32 {dimension_numbers = #tpu.dot_dimension_numbers<[2], [2], [1], [1], [0, 0, 0, 1, 1, 1], [0], [0]>} : vector<2x8x32xf32>, vector<2x8x32xf32>, vector<2x8x8xf32> -> vector<2x8x8xf32>
    "tpu.trace_stop"() : () -> ()
    %89 = vector.extract_strided_slice %30 {offsets = [0, 3, 0, 0], sizes = [2, 1, 8, 8], strides = [1, 1, 1, 1]} : vector<2x4x8x8xf32> to vector<2x1x8x8xf32>
    %90 = vector.shape_cast %89 : vector<2x1x8x8xf32> to vector<2x8x8xf32>
    %91 = arith.addf %88, %90 : vector<2x8x8xf32>
    %cst_33 = arith.constant dense<0xFF800000> : vector<2x8xf32>
    %92 = vector.multi_reduction <maximumf>, %91, %cst_33 [2] : vector<2x8x8xf32> to vector<2x8xf32>
    %93 = vector.shape_cast %92 : vector<2x8xf32> to vector<2x8x1xf32>
    %94 = vector.broadcast %93 : vector<2x8x1xf32> to vector<2x8x8xf32>
    %95 = arith.subf %91, %94 : vector<2x8x8xf32>
    %96 = math.exp %95 : vector<2x8x8xf32>
    %cst_34 = arith.constant dense<0.000000e+00> : vector<2x8xf32>
    %97 = vector.multi_reduction <add>, %96, %cst_34 [2] : vector<2x8x8xf32> to vector<2x8xf32>
    %98 = vector.shape_cast %97 : vector<2x8xf32> to vector<2x8x1xf32>
    %99 = tpu.reciprocal %98 {approx = true} : vector<2x8x1xf32> -> vector<2x8x1xf32>
    %100 = vector.broadcast %99 : vector<2x8x1xf32> to vector<2x8x8xf32>
    %101 = arith.mulf %96, %100 : vector<2x8x8xf32>
    "tpu.trace_start"() <{level = 10 : i32, message = "bqk,bkd->bqd"}> : () -> ()
    %cst_35 = arith.constant dense<0.000000e+00> : vector<2x8x32xf32>
    %102 = tpu.matmul %101, %87, %cst_35 {dimension_numbers = #tpu.dot_dimension_numbers<[2], [1], [1], [2], [0, 0, 0, 1, 1, 2], [0], [0]>} : vector<2x8x8xf32>, vector<2x8x32xf32>, vector<2x8x32xf32> -> vector<2x8x32xf32>
    "tpu.trace_stop"() : () -> ()
    %103 = vector.shape_cast %37 : vector<2x8x8xf32> to vector<2x1x8x8xf32>
    %104 = vector.shape_cast %55 : vector<2x8x8xf32> to vector<2x1x8x8xf32>
    %105 = vector.shape_cast %73 : vector<2x8x8xf32> to vector<2x1x8x8xf32>
    %106 = vector.shape_cast %91 : vector<2x8x8xf32> to vector<2x1x8x8xf32>
    %107 = tpu.concatenate %103, %104, %105, %106 in 1 : vector<2x1x8x8xf32>, vector<2x1x8x8xf32>, vector<2x1x8x8xf32>, vector<2x1x8x8xf32> -> vector<2x4x8x8xf32>
    %c0_36 = arith.constant 0 : index
    %c0_37 = arith.constant 0 : index
    %c0_38 = arith.constant 0 : index
    %c0_39 = arith.constant 0 : index
    %108 = vector.load %arg12[%c0_36, %c0_37, %c0_38, %c0_39] : memref<2x4x8x8xf32, #tpu.memory_space<vmem>>, vector<2x4x8x8xf32>
    tpu.vector_store %arg12[%c0_36, %c0_37, %c0_38, %c0_39], %107 {strides = array<i32>} : memref<2x4x8x8xf32, #tpu.memory_space<vmem>>, vector<2x4x8x8xf32>,
    %109 = tpu.concatenate %48, %66, %84, %102 in 2 : vector<2x8x32xf32>, vector<2x8x32xf32>, vector<2x8x32xf32>, vector<2x8x32xf32> -> vector<2x8x128xf32>
    %110 = vector.shape_cast %109 : vector<2x8x128xf32> to vector<16x128xf32>
    %111 = arith.truncf %110 : vector<16x128xf32> to vector<16x128xbf16>
    %c0_40 = arith.constant 0 : index
    %c0_41 = arith.constant 0 : index
    %112 = vector.load %arg9[%c0_40, %c0_41] : memref<128x128xbf16, #tpu.memory_space<vmem>>, vector<128x128xbf16>
    %cst_42 = arith.constant dense<0.000000e+00> : vector<16x128xf32>
    %113 = tpu.matmul %111, %112, %cst_42 {dimension_numbers = #tpu.dot_dimension_numbers<[1], [0], [0], [1], [0, 0, 1, 1], [], []>} : vector<16x128xbf16>, vector<128x128xbf16>, vector<16x128xf32> -> vector<16x128xf32>
    %c0_43 = arith.constant 0 : index
    %c0_44 = arith.constant 0 : index
    %114 = vector.load %arg10[%c0_43, %c0_44] : memref<1x128xf32, #tpu.memory_space<vmem>>, vector<1x128xf32>
    %115 = vector.broadcast %114 : vector<1x128xf32> to vector<16x128xf32>
    %116 = arith.addf %113, %115 : vector<16x128xf32>
    %117 = arith.addf %15, %116 : vector<16x128xf32>
    %118 = vector.shape_cast %117 : vector<16x128xf32> to vector<2x8x128xf32>
    %c0_45 = arith.constant 0 : index
    %c0_46 = arith.constant 0 : index
    %c0_47 = arith.constant 0 : index
    %119 = vector.load %arg11[%c0_45, %c0_46, %c0_47] : memref<2x8x128xf32, #tpu.memory_space<vmem>>, vector<2x8x128xf32>
    tpu.vector_store %arg11[%c0_45, %c0_46, %c0_47], %118 {strides = array<i32>} : memref<2x8x128xf32, #tpu.memory_space<vmem>>, vector<2x8x128xf32>,
    %cst_48 = arith.constant dense<0.000000e+00> : vector<128xf32>
    %120 = vector.multi_reduction <add>, %117, %cst_48 [0] : vector<16x128xf32> to vector<128xf32>
    %121 = vector.shape_cast %120 : vector<128xf32> to vector<1x128xf32>
    %122 = arith.mulf %117, %117 : vector<16x128xf32>
    %cst_49 = arith.constant dense<0.000000e+00> : vector<128xf32>
    %123 = vector.multi_reduction <add>, %122, %cst_49 [0] : vector<16x128xf32> to vector<128xf32>
    %124 = vector.shape_cast %123 : vector<128xf32> to vector<1x128xf32>
    %125 = tpu.concatenate %121, %124 in 0 : vector<1x128xf32>, vector<1x128xf32> -> vector<2x128xf32>
    %c0_50 = arith.constant 0 : index
    %c0_51 = arith.constant 0 : index
    %c0_52 = arith.constant 0 : index
    %126 = vector.load %arg13[%c0_50, %c0_51, %c0_52] : memref<1x2x128xf32, #tpu.memory_space<vmem>>, vector<1x2x128xf32>
    %127 = vector.shape_cast %126 : vector<1x2x128xf32> to vector<2x128xf32>
    %128 = vector.shape_cast %125 : vector<2x128xf32> to vector<1x2x128xf32>
    tpu.vector_store %arg13[%c0_50, %c0_51, %c0_52], %128 {strides = array<i32>} : memref<1x2x128xf32, #tpu.memory_space<vmem>>, vector<1x2x128xf32>,
    return
  }
  func.func @transform_0(%arg0: i32) -> (i32, i32, i32) {
    %c0_i32 = arith.constant 0 : i32
    %c0_i32_0 = arith.constant 0 : i32
    %c0_i32_1 = arith.constant 0 : i32
    return %arg0, %c0_i32, %c0_i32_0 : i32, i32, i32
  }
  func.func @transform_1(%arg0: i32) -> (i32, i32, i32, i32) {
    %c0_i32 = arith.constant 0 : i32
    %c0_i32_0 = arith.constant 0 : i32
    %c0_i32_1 = arith.constant 0 : i32
    %c0_i32_2 = arith.constant 0 : i32
    return %arg0, %c0_i32, %c0_i32_0, %c0_i32_1 : i32, i32, i32, i32
  }
  func.func @transform_2(%arg0: i32) -> (i32, i32) {
    %c0_i32 = arith.constant 0 : i32
    %c0_i32_0 = arith.constant 0 : i32
    %c0_i32_1 = arith.constant 0 : i32
    return %c0_i32, %c0_i32_0 : i32, i32
  }
  func.func @transform_3(%arg0: i32) -> (i32, i32) {
    %c0_i32 = arith.constant 0 : i32
    %c0_i32_0 = arith.constant 0 : i32
    %c0_i32_1 = arith.constant 0 : i32
    return %c0_i32, %c0_i32_0 : i32, i32
  }
  func.func @transform_4(%arg0: i32) -> (i32, i32) {
    %c0_i32 = arith.constant 0 : i32
    %c0_i32_0 = arith.constant 0 : i32
    %c0_i32_1 = arith.constant 0 : i32
    return %c0_i32, %c0_i32_0 : i32, i32
  }
  func.func @transform_5(%arg0: i32) -> (i32, i32) {
    %c0_i32 = arith.constant 0 : i32
    %c0_i32_0 = arith.constant 0 : i32
    %c0_i32_1 = arith.constant 0 : i32
    return %c0_i32, %c0_i32_0 : i32, i32
  }
  func.func @transform_6(%arg0: i32) -> (i32, i32) {
    %c0_i32 = arith.constant 0 : i32
    %c0_i32_0 = arith.constant 0 : i32
    %c0_i32_1 = arith.constant 0 : i32
    return %c0_i32, %c0_i32_0 : i32, i32
  }
  func.func @transform_7(%arg0: i32) -> (i32, i32) {
    %c0_i32 = arith.constant 0 : i32
    %c0_i32_0 = arith.constant 0 : i32
    %c0_i32_1 = arith.constant 0 : i32
    return %c0_i32, %c0_i32_0 : i32, i32
  }
  func.func @transform_8(%arg0: i32) -> (i32, i32) {
    %c0_i32 = arith.constant 0 : i32
    %c0_i32_0 = arith.constant 0 : i32
    %c0_i32_1 = arith.constant 0 : i32
    return %c0_i32, %c0_i32_0 : i32, i32
  }
  func.func @transform_9(%arg0: i32) -> (i32, i32) {
    %c0_i32 = arith.constant 0 : i32
    %c0_i32_0 = arith.constant 0 : i32
    %c0_i32_1 = arith.constant 0 : i32
    return %c0_i32, %c0_i32_0 : i32, i32
  }
  func.func @transform_10(%arg0: i32) -> (i32, i32, i32) {
    %c0_i32 = arith.constant 0 : i32
    %c0_i32_0 = arith.constant 0 : i32
    %c0_i32_1 = arith.constant 0 : i32
    return %arg0, %c0_i32, %c0_i32_0 : i32, i32, i32
  }
  func.func @transform_11(%arg0: i32) -> (i32, i32, i32, i32) {
    %c0_i32 = arith.constant 0 : i32
    %c0_i32_0 = arith.constant 0 : i32
    %c0_i32_1 = arith.constant 0 : i32
    %c0_i32_2 = arith.constant 0 : i32
    return %arg0, %c0_i32, %c0_i32_0, %c0_i32_1 : i32, i32, i32, i32
  }
  func.func @transform_12(%arg0: i32) -> (i32, i32, i32) {
    %c0_i32 = arith.constant 0 : i32
    %c0_i32_0 = arith.constant 0 : i32
    %c0_i32_1 = arith.constant 0 : i32
    return %arg0, %c0_i32, %c0_i32_0 : i32, i32, i32
  }
}

module attributes {stable_mosaic.version = 11 : i64} {
  func.func @_bn_apply_kernel(%arg0: i32, %arg1: memref<2x8x128xf32, #tpu.memory_space<vmem>>, %arg2: memref<1x128xf32, #tpu.memory_space<vmem>>, %arg3: memref<1x128xf32, #tpu.memory_space<vmem>>, %arg4: memref<1x128xf32, #tpu.memory_space<vmem>>, %arg5: memref<1x128xf32, #tpu.memory_space<vmem>>, %arg6: memref<2x8x128xf32, #tpu.memory_space<vmem>>) attributes {dimension_semantics = [#tpu.dimension_semantics<parallel>], iteration_bounds = array<i64: 4>, scalar_prefetch = 0 : i64, scratch_operands = 0 : i64, tpu.core_type = #tpu.core_type<tc>, window_params = [{transform_indices = @transform_0, window_bounds = array<i64: 2, 8, 128>}, {pipeline_mode = #tpu.pipeline_mode<synchronous>, transform_indices = @transform_1, window_bounds = array<i64: 1, 128>}, {pipeline_mode = #tpu.pipeline_mode<synchronous>, transform_indices = @transform_2, window_bounds = array<i64: 1, 128>}, {pipeline_mode = #tpu.pipeline_mode<synchronous>, transform_indices = @transform_3, window_bounds = array<i64: 1, 128>}, {pipeline_mode = #tpu.pipeline_mode<synchronous>, transform_indices = @transform_4, window_bounds = array<i64: 1, 128>}, {transform_indices = @transform_5, window_bounds = array<i64: 2, 8, 128>}]} {
    %c0 = arith.constant 0 : index
    %c0_0 = arith.constant 0 : index
    %c0_1 = arith.constant 0 : index
    %0 = vector.load %arg1[%c0, %c0_0, %c0_1] : memref<2x8x128xf32, #tpu.memory_space<vmem>>, vector<2x8x128xf32>
    %1 = vector.shape_cast %0 : vector<2x8x128xf32> to vector<16x128xf32>
    %c0_2 = arith.constant 0 : index
    %c0_3 = arith.constant 0 : index
    %2 = vector.load %arg3[%c0_2, %c0_3] : memref<1x128xf32, #tpu.memory_space<vmem>>, vector<1x128xf32>
    %cst = arith.constant 9.99999974E-6 : f32
    %3 = vector.broadcast %cst : f32 to vector<1x128xf32>
    %4 = arith.addf %2, %3 : vector<1x128xf32>
    %5 = math.rsqrt %4 : vector<1x128xf32>
    %c0_4 = arith.constant 0 : index
    %c0_5 = arith.constant 0 : index
    %6 = vector.load %arg4[%c0_4, %c0_5] : memref<1x128xf32, #tpu.memory_space<vmem>>, vector<1x128xf32>
    %7 = arith.mulf %5, %6 : vector<1x128xf32>
    %c0_6 = arith.constant 0 : index
    %c0_7 = arith.constant 0 : index
    %8 = vector.load %arg2[%c0_6, %c0_7] : memref<1x128xf32, #tpu.memory_space<vmem>>, vector<1x128xf32>
    %9 = vector.broadcast %8 : vector<1x128xf32> to vector<16x128xf32>
    %10 = arith.subf %1, %9 : vector<16x128xf32>
    %11 = vector.broadcast %7 : vector<1x128xf32> to vector<16x128xf32>
    %12 = arith.mulf %10, %11 : vector<16x128xf32>
    %c0_8 = arith.constant 0 : index
    %c0_9 = arith.constant 0 : index
    %13 = vector.load %arg5[%c0_8, %c0_9] : memref<1x128xf32, #tpu.memory_space<vmem>>, vector<1x128xf32>
    %14 = vector.broadcast %13 : vector<1x128xf32> to vector<16x128xf32>
    %15 = arith.addf %12, %14 : vector<16x128xf32>
    %16 = vector.shape_cast %15 : vector<16x128xf32> to vector<2x8x128xf32>
    %c0_10 = arith.constant 0 : index
    %c0_11 = arith.constant 0 : index
    %c0_12 = arith.constant 0 : index
    %17 = vector.load %arg6[%c0_10, %c0_11, %c0_12] : memref<2x8x128xf32, #tpu.memory_space<vmem>>, vector<2x8x128xf32>
    tpu.vector_store %arg6[%c0_10, %c0_11, %c0_12], %16 {strides = array<i32>} : memref<2x8x128xf32, #tpu.memory_space<vmem>>, vector<2x8x128xf32>,
    return
  }
  func.func @transform_0(%arg0: i32) -> (i32, i32, i32) {
    %c0_i32 = arith.constant 0 : i32
    %c0_i32_0 = arith.constant 0 : i32
    %c0_i32_1 = arith.constant 0 : i32
    return %arg0, %c0_i32, %c0_i32_0 : i32, i32, i32
  }
  func.func @transform_1(%arg0: i32) -> (i32, i32) {
    %c0_i32 = arith.constant 0 : i32
    %c0_i32_0 = arith.constant 0 : i32
    %c0_i32_1 = arith.constant 0 : i32
    return %c0_i32, %c0_i32_0 : i32, i32
  }
  func.func @transform_2(%arg0: i32) -> (i32, i32) {
    %c0_i32 = arith.constant 0 : i32
    %c0_i32_0 = arith.constant 0 : i32
    %c0_i32_1 = arith.constant 0 : i32
    return %c0_i32, %c0_i32_0 : i32, i32
  }
  func.func @transform_3(%arg0: i32) -> (i32, i32) {
    %c0_i32 = arith.constant 0 : i32
    %c0_i32_0 = arith.constant 0 : i32
    %c0_i32_1 = arith.constant 0 : i32
    return %c0_i32, %c0_i32_0 : i32, i32
  }
  func.func @transform_4(%arg0: i32) -> (i32, i32) {
    %c0_i32 = arith.constant 0 : i32
    %c0_i32_0 = arith.constant 0 : i32
    %c0_i32_1 = arith.constant 0 : i32
    return %c0_i32, %c0_i32_0 : i32, i32
  }
  func.func @transform_5(%arg0: i32) -> (i32, i32, i32) {
    %c0_i32 = arith.constant 0 : i32
    %c0_i32_0 = arith.constant 0 : i32
    %c0_i32_1 = arith.constant 0 : i32
    return %arg0, %c0_i32, %c0_i32_0 : i32, i32, i32
  }
}

</mosaic_0001>

<bundles_post_ra>
// kernel: tsti_encoder_forward.6
= control target key start
LH: loop header
LB: loop body
LE: loop exit
PB: predicated region body
PF: predicated region fallthrough
CT: control target
= control target key end

     0   :  { %s394_s15 = smov 0   ;;  %s420_s0 = inlined_call_operand.vmem [shape: f32[8,8,16], index: 0, kind: input, shape index: {}]   ;;  %s421_s1 = inlined_call_operand.vmem [shape: bf16[16,128], index: 1, kind: input, shape index: {}]   ;;  %s422_s2 = inlined_call_operand.vmem [shape: f32[1,128], index: 2, kind: input, shape index: {}]   ;;  %s423_s3 = inlined_call_operand.vmem [shape: f32[8,128], index: 3, kind: input, shape index: {}]   ;;  %s424_s4 = inlined_call_operand.vmem [shape: f32[8,8,128], index: 4, kind: output, shape index: {}]  }
   0x1 LB: > { %s326_s16 = sadd.s32 4294967295, %s365_s15   ;;  %p330_p0 = scmp.ge.s32.totalorder %s365_s15, 1  ;;  %s365_s15 = sphi %s394_s15, %s14_s15  }
   0x2   : > { %p163_p1 = scmp.lt.s32.totalorder %s365_s15, 5 }
   0x4   : > { %p164_p2 = pnand %p330_p0, %p163_p1 }
   0x5   : > { %v358_v0 = vld [vmem:[%s421_s1] sm:$0xff] (!%p164_p2)   ;;  %v367_v1 = vmov (!%p164_p2), 0.0   ;;  %s331_s19 = sshll.u32 (!%p164_p2), %s326_s16, 1  ;;  %vm368_vm0 = vmmov (!%p164_p2), 0   ;;  %vm220_vm1 = vcmask (!%p164_p2), 130048  }
   0x6   : > { %167 = sbr.rel (%p164_p2) target bundleno = 238 (0xee), region = 36  ;;  %342 = vmatprep.subr.bf16.mxu0 (!%p164_p2), %v367_v1  ;;  %344 = vmatprep.mubr.msk.bf16.mxu0 (!%p164_p2), %vm368_vm0, %v367_v1  ;;  %p190_p3 = scmp.lt.s32.totalorder (!%p164_p2), %s331_s19, 7  ;;  %v335_v5 = vld [vmem:[%s422_s2] ss:$0 sm:$0xff] (!%p164_p2) }
   0x7   : > { %343 = vmatpush3.bf16.msra.mxu0 (!%p164_p2), %v358_v0  ;;  %v265_v7 = vld [vmem:[%s423_s3] sm:$0xff] (!%p164_p2) }
   0xd   : > { %s426_s19 = smov (!%p190_p3, %s331_s19), 7 }
   0xe   : > { %s332_s20 = sshll.u32 %s426_s19, 3 }
   0xf   : > { %s193_s23 = scalar_lea.vmem %s420_s0, %s332_s20  ;;  %s199_s30 = scalar_lea.vmem %s424_s4, %s332_s20 }
  0x10   : > { %v202_v2 = vld [vmem:[%s193_s23] sm:$0xff]  ;;  %v203_v3 = vld [vmem:[%s193_s23 + $0x8] sm:$0xff] }
  0x11   : > { %v204_v4 = vpack.c.bf16 %v203_v3, %v202_v2 }
  0x13   : > { %345 = vmatmul.mubr.msk.bf16.vlgmr.msra.gmra.mrb[0].mxu0 %vm220_vm1, %v204_v4 }
  0xe6   : > { %v258_v6 = vpop.f32.mrb[0].mxu0 }
  0xe7   : > { %v259_v8 = vadd.f32 %v335_v5, %v258_v6  ;;  %v346_v9 = vpop.f32.mrb[1].mxu0 }
  0xe8   : > { %v261_v10 = vpop.f32.mrb[2].mxu0 }
  0xe9   : > { %v266_v11 = vadd.f32 %v265_v7, %v259_v8  ;;  %v262_v12 = vadd.f32 %v335_v5, %v261_v10  ;;  %v347_v13 = vpop.f32.mrb[3].mxu0 }
  0xeb   : > { %268 = vst [vmem:[%s199_s30] sm:$0xff] %v266_v11  ;;  %v267_v14 = vadd.f32 %v265_v7, %v262_v12 }
  0xed   : > { %269 = vst [vmem:[%s199_s30 + $0x8] sm:$0xff] %v267_v14 }
  0xee PF: > { %s14_s15 = sadd.s32 1, %s365_s15  }
  0xef   : > { %p11_p4 = scmp.ge.s32.totalorder %s14_s15, 6  }
  0xf1   :  { %13 = sbr.rel (!%p11_p4) target bundleno = 1 (0x1), region = 66 }

// kernel: tsti_encoder_forward.11
= control target key start
LH: loop header
LB: loop body
LE: loop exit
PB: predicated region body
PF: predicated region fallthrough
CT: control target
= control target key end

     0   :  { %10 = vsyncpa [#allocation3], 0  ;;  %s606_s0 = inlined_call_operand.vmem [shape: f32[8,8,128], index: 0, kind: input, shape index: {}]   ;;  %s607_s1 = inlined_call_operand.vmem [shape: f32[1,128], index: 1, kind: input, shape index: {}]   ;;  %s608_s2 = inlined_call_operand.vmem [shape: f32[1,128], index: 2, kind: input, shape index: {}]   ;;  %s609_s3 = inlined_call_operand.vmem [shape: f32[1,128], index: 3, kind: input, shape index: {}]   ;;  %s610_s4 = inlined_call_operand.vmem [shape: f32[1,128], index: 4, kind: input, shape index: {}]   ;;  %s611_s5 = inlined_call_operand.hbm [shape: f32[8,8,128], index: 5, kind: output, shape index: {}]  }
   0x1   :  { %12 = vsyncpa [#allocation3 + $0x1], 0  ;;  %s492_s18 = smov 0   ;;  %s494_s19 = smov 0  }
   0x2   :  { %s496_s20 = smov 0   ;;  %s498_s21 = smov 0  }
   0x3 LB: > { %s513_s22 = sadd.s32 4294967295, %s457_s21   ;;  %s337_s23 = sadd.s32 4294967294, %s457_s21   ;;  %s457_s21 = sphi %s498_s21, %s617_s21   ;;  %s453_s20 = sphi %s496_s20, %s616_s20   ;;  %s449_s19 = sphi %s494_s19, %s615_s19   ;;  %s445_s18 = sphi %s492_s18, %s614_s18  }
   0x4   : > { %s517_s24 = sadd.s32 1, %s457_s21   ;;  %s135_s25 = sadd.s32 1, %s453_s20 }
   0x5   : > { %s132_s26 = ssub.s32 %s457_s21, %s517_s24  ;;  %p145_p0 = scmp.ne.s32.totalorder %s453_s20, %s449_s19 }
   0x6   : > { %p133_p1 = scmp.eq.s32.totalorder %s132_s26, 0  ;;  %p146_p2 = scmp.eq.s32.totalorder %s513_s22, 3 }
   0x7   : > { %p151_p3 = scmp.ne.s32.totalorder %s449_s19, %s445_s18  ;;  %p152_p4 = scmp.eq.s32.totalorder %s337_s23, 3 }
   0x8   : > { %s528_s27 = scalar_select %p133_p1, %s453_s20, %s135_s25  }
   0x9   : > { %p530_p5 = por %p146_p2, %p145_p0  ;;  %p534_p6 = por %p152_p4, %p151_p3 }
   0xa   : > { %p340_p7 = scmp.ge.s32.totalorder %s457_s21, 1  ;;  %p191_p8 = scmp.lt.s32.totalorder %s457_s21, 5 }
   0xc   : > { %p192_p9 = pnand %p340_p7, %p191_p8 }
   0xd   : > { %s342_s30 = sshll.u32 (!%p192_p9), %s513_s22, 1  ;;  %v228_v0 = vld [vmem:[%s608_s2] sm:$0x1] (!%p192_p9)  ;;  %v243_v2 = vlaneseq (!%p192_p9)  ;;  %s216_s9 = sand.u32 (!%p192_p9), 1, %s449_s19  }
   0xe   : > { %195 = sbr.rel (%p192_p9) target bundleno = 50 (0x32), region = 40  ;;  %p220_p10 = scmp.lt.s32.totalorder (!%p192_p9), %s342_s30, 7  ;;  %v229_v1 = vadd.f32 (!%p192_p9), 1e-05, %v228_v0  ;;  %v231_v4 = vld [vmem:[%s609_s3] sm:$0x1] (!%p192_p9) }
   0xf   : > { %v244_v3 = vshrl.u32 (!%p192_p9), %v243_v2, 7  ;;  %s341_s13 = sshll.u32 (!%p192_p9), %s216_s9, 4  ;;  %v344_v6 = vld [vmem:[%s607_s1] ss:$0 sm:$0xff] (!%p192_p9)  ;;  %s351_s26 = sshll.u32 (!%p192_p9), %s513_s22, 8 }
  0x10   : > { %393 = vrsqrt.f32 (!%p192_p9), %v229_v1  ;;  %s218_s23 = scalar_lea.vmem (!%p192_p9), [#allocation2], %s341_s13  ;;  %v345_v14 = vld [vmem:[%s610_s4] ss:$0 sm:$0xff] (!%p192_p9)  ;;  %s563_s10 = scalar_lea.hbm (!%p192_p9), %s611_s5, %s351_s26 }
  0x11   : > { %v245_v8 = vsub.s32 (!%p192_p9), 0, %v244_v3  ;;  %s275_s25 = sshll.u32 (!%p192_p9), %s218_s23, 4  ;;  %s565_s22 = scalar_lea.sflag (!%p192_p9), [#allocation3], %s216_s9  ;;  %s558_s25 = int_to_ptr.vmem [resolvable:$true] %s275_s25 }
  0x12   : > { %s395_s11 = scalar_lea.vmem (!%p192_p9), %s558_s25, 256 }
  0x13   : > { %p396_p11 = scmp.ne.s32.totalorder (!%p192_p9), %s558_s25, %s395_s11 }
  0x15   : > { %s619_s30 = smov (!%p220_p10, %s342_s30), 7  ;;  %p397_p12 = pnand %p396_p11, %p530_p5 }
  0x16   : > { %s343_s8 = sshll.u32 %s619_s30, 3 }
  0x17   : > { %s223_s12 = scalar_lea.vmem %s606_s0, %s343_s8  ;;  %p398_p13 = pneg %p397_p12 }
  0x18   : > { %v226_v5 = vld [vmem:[%s223_s12] sm:$0xff]  ;;  %v227_v7 = vld [vmem:[%s223_s12 + $0x8] sm:$0xff]  ;;  %s459_s12 = smov [#allocation2]  }
  0x19   : > { %v240_v11 = vsub.f32 %v226_v5, %v344_v6  ;;  %v241_v12 = vsub.f32 %v227_v7, %v344_v6  ;;  %s399_s13 = sshll.u32 %s459_s12, 4  ;;  %s400_s13 = int_to_ptr.vmem [resolvable:$false] %s399_s13 }
  0x1a   : > { %v394_v9 = vpop.eup %393  ;;  %s401_s14 = scalar_lea.vmem %s400_s13, 512  ;;  %p402_p0 = scmp.lt.s32.totalorder %s558_s25, %s400_s13 }
  0x1b   : > { %v232_v10 = vmul.f32 %v394_v9, %v231_v4  ;;  %p403_p1 = scmp.lt.s32.totalorder %s401_s14, %s395_s11 }
  0x1d   : > { %v246_v13 = vrot.slane %v232_v10, %v245_v8  ;;  %p404_p2 = por %p403_p1, %p402_p0 }
  0x1f   : > { %v248_v15 = vmul.f32 %v246_v13, %v240_v11  ;;  %v249_v16 = vmul.f32 %v246_v13, %v241_v12  ;;  %p405_p3 = pnand %p404_p2, %p398_p13 }
  0x21   : > { %v257_v17 = vadd.f32 %v345_v14, %v248_v15  ;;  %v258_v18 = vadd.f32 %v345_v14, %v249_v16 }
  0x23   : > { %259 = vst [vmem:[%s218_s23] sm:$0xff] %v257_v17  ;;  %260 = vst [vmem:[%s218_s23 + $0x8] sm:$0xff] %v258_v18 }
  0x24   : > { %408 = shalt.err (!%p405_p3)
}
  0x25   : > { %s409_s9 = scalar_lea.hbm %s563_s10, 256  ;;  %s413_s17 = scalar_lea.hbm %s611_s5, 1024 }
  0x26   : > { %p410_p4 = scmp.ne.s32.totalorder %s563_s10, %s409_s9  ;;  %p414_p9 = scmp.lt.u32.totalorder %s563_s10, %s611_s5 }
  0x27   : > { %p415_p10 = scmp.lt.u32.totalorder %s413_s17, %s409_s9  ;;  %p417_p12 = scmp.lt.u32.totalorder %s409_s9, %s563_s10 }
  0x28   : > { %p411_p7 = pnand %p410_p4, %p530_p5 }
  0x29   : > { %p416_p11 = por %p415_p10, %p414_p9 }
  0x2a   : > { %p412_p8 = pneg %p411_p7 }
  0x2b   : > { %p418_p13 = por %p417_p12, %p416_p11 }
  0x2d   : > { %p419_p0 = pnand %p418_p13, %p412_p8 }
  0x2f   : > { %422 = shalt.err (!%p419_p0)
}
  0x30   : > { %s460_s30 = smov 128   ;;  %s461_s6 = smov 8  }
  0x31   : > { %352 = dma.vmem_to_hbm [thread:$0]  (%p530_p5), %s558_s25, 256, %s563_s10, %s565_s22, %s460_s30, %s460_s30, %s461_s6  }
  0x32 PF: > { %p358_p1 = scmp.ge.s32.totalorder %s457_s21, 2  ;;  %s290_s7 = sand.u32 1, %s445_s18  }
  0x33   : > { %s291_s8 = scalar_lea.sflag [#allocation3], %s290_s7 }
  0x34   : > { %p355_p2 = pnand %p358_p1, %p534_p6 }
  0x36   : > { %440 = dma.done.wait (!%p355_p2), %s291_s8, 256  }
  0x37   : > { %442 = vsyncadd (!%p355_p2), %s291_s8, 4294967040  ;;  %p15_p3 = scmp.ge.s32.totalorder %s517_s24, 6   ;;  %s614_s18 = smov %s449_s19 }
  0x38   : > { %s615_s19 = smov %s453_s20  ;;  %s616_s20 = smov %s528_s27 }
  0x39   : > { %s617_s21 = smov %s517_s24  ;;  %17 = sbr.rel (!%p15_p3) target bundleno = 3 (0x3), region = 75 }
  0x40   :  { %296 = vsyncpa [#allocation3], 1 }
  0x41   :  { %298 = vsyncpa [#allocation3 + $0x1], 1 }

// kernel: tsti_encoder_forward.8
= control target key start
LH: loop header
LB: loop body
LE: loop exit
PB: predicated region body
PF: predicated region fallthrough
CT: control target
= control target key end

     0   :  { %s1076_s13 = smov 0   ;;  %s1238_s0 = inlined_call_operand.vmem [shape: f32[8,8,128], index: 0, kind: input, shape index: {}]   ;;  %s1239_s1 = inlined_call_operand.vmem [shape: f32[1,128], index: 1, kind: input, shape index: {}]   ;;  %s1240_s2 = inlined_call_operand.vmem [shape: f32[1,128], index: 2, kind: input, shape index: {}]   ;;  %s1241_s3 = inlined_call_operand.vmem [shape: f32[1,128], index: 3, kind: input, shape index: {}]   ;;  %s1242_s4 = inlined_call_operand.vmem [shape: f32[1,128], index: 4, kind: input, shape index: {}]   ;;  %s1243_s5 = inlined_call_operand.vmem [shape: bf16[128,256], index: 5, kind: input, shape index: {}]   ;;  %s1244_s6 = inlined_call_operand.vmem [shape: f32[1,256], index: 6, kind: input, shape index: {}]   ;;  %s1245_s7 = inlined_call_operand.vmem [shape: bf16[256,128], index: 7, kind: input, shape index: {}]   ;;  %s1246_s8 = inlined_call_operand.vmem [shape: f32[1,128], index: 8, kind: input, shape index: {}]   ;;  %s1247_s9 = inlined_call_operand.vmem [shape: f32[8,8,128], index: 9, kind: output, shape index: {0}]   ;;  %s1248_s10 = inlined_call_operand.vmem [shape: f32[4,2,128], index: 10, kind: output, shape index: {1}]  }
   0x1 LB: > { %s1082_s14 = sadd.s32 4294967295, %s1018_s13   ;;  %p888_p0 = scmp.ge.s32.totalorder %s1018_s13, 1  ;;  %s1018_s13 = sphi %s1076_s13, %s21_s13  }
   0x2   : > { %p316_p1 = scmp.lt.s32.totalorder %s1018_s13, 5 }
   0x4   : > { %p317_p2 = pnand %p888_p0, %p316_p1 }
   0x5   : > { %v962_v0 = vld [vmem:[%s1243_s5 + $0x4] ss:$8 sps:$4 sm:$0xff] (!%p317_p2)   ;;  %v964_v1 = vld [vmem:[%s1243_s5] ss:$8 sps:$4 sm:$0xff] (!%p317_p2)   ;;  %v1020_v2 = vmov (!%p317_p2), 0   ;;  %s889_s19 = sshll.u32 (!%p317_p2), %s1082_s14, 1  ;;  %v392_v6 = vlaneseq (!%p317_p2) }
   0x6   : > { %320 = sbr.rel (%p317_p2) target bundleno = 524 (0x20c), region = 56  ;;  %549 = vmatprep.mubr.bf16.mxu0 (!%p317_p2), %v1020_v2  ;;  %517 = vmatprep.subr.bf16.mxu0 (!%p317_p2), %v962_v0  ;;  %v965_v3 = vld [vmem:[%s1243_s5 + $0x14] ss:$8 sps:$4 sm:$0xff] (!%p317_p2)   ;;  %v967_v4 = vld [vmem:[%s1243_s5 + $0x10] ss:$8 sps:$4 sm:$0xff] (!%p317_p2)   ;;  %p359_p3 = scmp.lt.s32.totalorder (!%p317_p2), %s889_s19, 7 }
   0x7   : > { %518 = vmatpush1.bf16.msra.mxu0 (!%p317_p2), %v964_v1  ;;  %v968_v5 = vld [vmem:[%s1243_s5 + $0x24] ss:$8 sps:$4 sm:$0xff] (!%p317_p2)   ;;  %v970_v7 = vld [vmem:[%s1243_s5 + $0x20] ss:$8 sps:$4 sm:$0xff] (!%p317_p2)   ;;  %v971_v8 = vld [vmem:[%s1243_s5 + $0x34] ss:$8 sps:$4 sm:$0xff] (!%p317_p2)  }
   0x8   : > { %519 = vmatprep.subr.bf16.mxu0 (!%p317_p2), %v965_v3  ;;  %v1110_v9 = vshrl.u32 (!%p317_p2), %v392_v6, 7  ;;  %v973_v10 = vld [vmem:[%s1243_s5 + $0x30] ss:$8 sps:$4 sm:$0xff] (!%p317_p2)   ;;  %v377_v11 = vld [vmem:[%s1240_s2] sm:$0x1] (!%p317_p2)  ;;  %v988_v39 = vld [vmem:[%s1245_s7 + $0x48] sm:$0xff] (!%p317_p2)  }
   0x9   : > { %v974_v12 = vld [vmem:[%s1243_s5 + $0x44] ss:$8 sps:$4 sm:$0xff] (!%p317_p2)   ;;  %v378_v13 = vadd.f32 (!%p317_p2), 1e-05, %v377_v11  ;;  %v976_v15 = vld [vmem:[%s1243_s5 + $0x40] ss:$8 sps:$4 sm:$0xff] (!%p317_p2)  }
   0xa   : > { %v394_v14 = vsub.s32 (!%p317_p2), 0, %v1110_v9  ;;  %v977_v16 = vld [vmem:[%s1243_s5 + $0x54] ss:$8 sps:$4 sm:$0xff] (!%p317_p2)   ;;  %v979_v17 = vld [vmem:[%s1243_s5 + $0x50] ss:$8 sps:$4 sm:$0xff] (!%p317_p2)   ;;  %v986_v37 = vld [vmem:[%s1245_s7 + $0x40] sm:$0xff] (!%p317_p2)  }
   0xb   : > { %520 = vmatpush1.bf16.msra.mxu0 (!%p317_p2), %v967_v4  ;;  %1002 = vrsqrt.f32 (!%p317_p2), %v378_v13  ;;  %v980_v18 = vld [vmem:[%s1243_s5 + $0x64] ss:$8 sps:$4 sm:$0xff] (!%p317_p2)   ;;  %v380_v21 = vld [vmem:[%s1241_s3] sm:$0x1] (!%p317_p2)  ;;  %v983_v25 = vld [vmem:[%s1243_s5 + $0x74] ss:$8 sps:$4 sm:$0xff] (!%p317_p2)   ;;  %931 = vmatprep.subr.bf16.mxu1 (!%p317_p2), %v986_v37 }
   0xc   : > { %521 = vmatprep.subr.bf16.mxu0 (!%p317_p2), %v968_v5  ;;  %v894_v22 = vld [vmem:[%s1239_s1] ss:$0 sm:$0xff] (!%p317_p2)  ;;  %v985_v29 = vld [vmem:[%s1243_s5 + $0x70] ss:$8 sps:$4 sm:$0xff] (!%p317_p2)   ;;  %v989_v40 = vld [vmem:[%s1245_s7 + $0x8] sm:$0xff] (!%p317_p2)   ;;  %v433_v54 = vsub.s32 (!%p317_p2), 1, %v1110_v9 }
   0xd   : > { %s1250_s19 = smov (!%p359_p3, %s889_s19), 7  ;;  %v982_v23 = vld [vmem:[%s1243_s5 + $0x60] ss:$8 sps:$4 sm:$0xff]   ;;  %v990_v41 = vld [vmem:[%s1245_s7 + $0x50] sm:$0xff]   ;;  %v992_v43 = vld [vmem:[%s1245_s7 + $0x58] sm:$0xff]   ;;  %p370_p4 = scmp.lt.s32.totalorder %s1082_s14, 3 }
   0xe   : > { %s890_s18 = sshll.u32 %s1250_s19, 3  ;;  %v895_v31 = vld [vmem:[%s1242_s4] ss:$0 sm:$0xff]  ;;  %v991_v42 = vld [vmem:[%s1245_s7 + $0x10] sm:$0xff]   ;;  %v993_v44 = vld [vmem:[%s1245_s7 + $0x18] sm:$0xff]   ;;  %vm794_vm0 = vcmask 1040384  }
   0xf   : > { %522 = vmatpush1.bf16.msra.mxu0 %v970_v7  ;;  %s362_s28 = scalar_lea.vmem %s1238_s0, %s890_s18  ;;  %v987_v38 = vld [vmem:[%s1245_s7] sm:$0xff]   ;;  %v996_v47 = vld [vmem:[%s1245_s7 + $0x68] sm:$0xff]   ;;  %v998_v49 = vld [vmem:[%s1245_s7 + $0x70] sm:$0xff]   ;;  %s368_s15 = scalar_lea.vmem %s1247_s9, %s890_s18 }
  0x10   : > { %523 = vmatprep.subr.bf16.mxu0 %v971_v8  ;;  %v375_v19 = vld [vmem:[%s362_s28] sm:$0xff]  ;;  %v376_v20 = vld [vmem:[%s362_s28 + $0x8] sm:$0xff]  ;;  %932 = vmatpush3.bf16.msra.mxu1 %v987_v38  ;;  %v999_v50 = vld [vmem:[%s1245_s7 + $0x30] sm:$0xff]   ;;  %s1252_s14 = smov (!%p370_p4, %s1082_s14), 3 }
  0x11   : > { %v389_v27 = vsub.f32 %v375_v19, %v894_v22  ;;  %v390_v28 = vsub.f32 %v376_v20, %v894_v22  ;;  %933 = vmatprep.subr.bf16.mxu1 %v988_v39  ;;  %v994_v45 = vld [vmem:[%s1245_s7 + $0x60] sm:$0xff]   ;;  %v997_v48 = vld [vmem:[%s1245_s7 + $0x28] sm:$0xff]   ;;  %v1000_v51 = vld [vmem:[%s1245_s7 + $0x78] sm:$0xff]   ;;  %s893_s19 = sshll.u32 %s1252_s14, 1 }
  0x12   : > { %v995_v46 = vld [vmem:[%s1245_s7 + $0x20] sm:$0xff]   ;;  %v1001_v52 = vld [vmem:[%s1245_s7 + $0x38] sm:$0xff]   ;;  %s373_s17 = scalar_lea.vmem %s1248_s10, %s893_s19 }
  0x13   : > { %524 = vmatpush1.bf16.msra.mxu0 %v973_v10  ;;  %v425_v53 = vld [vmem:[%s1244_s6] sm:$0x3] }
  0x14   : > { %525 = vmatprep.subr.bf16.mxu0 %v974_v12  ;;  %934 = vmatpush3.bf16.msra.mxu1 %v989_v40  ;;  %v430_v55 = vrot.slane %v425_v53, %v394_v14  ;;  %v434_v56 = vrot.slane %v425_v53, %v433_v54 }
  0x15   : > { %v1003_v24 = vpop.eup %1002  ;;  %935 = vmatprep.subr.bf16.mxu1 %v990_v41 }
  0x16   : > { %v381_v26 = vmul.f32 %v1003_v24, %v380_v21 }
  0x17   : > { %526 = vmatpush1.bf16.msra.mxu0 %v976_v15 }
  0x18   : > { %527 = vmatprep.subr.bf16.mxu0 %v977_v16  ;;  %v395_v30 = vrot.slane %v381_v26, %v394_v14  ;;  %936 = vmatpush3.bf16.msra.mxu1 %v991_v42  ;;  %v912_v42 = vld [vmem:[%s1246_s8] ss:$0 sm:$0xff] }
  0x19   : > { %937 = vmatprep.subr.bf16.mxu1 %v992_v43 }
  0x1a   : > { %v397_v32 = vmul.f32 %v395_v30, %v389_v27  ;;  %v398_v33 = vmul.f32 %v395_v30, %v390_v28 }
  0x1b   : > { %528 = vmatpush1.bf16.msra.mxu0 %v979_v17 }
  0x1c   : > { %529 = vmatprep.subr.bf16.mxu0 %v980_v18  ;;  %v1160_v34 = vadd.f32 %v895_v31, %v397_v32  ;;  %v1162_v35 = vadd.f32 %v895_v31, %v398_v33  ;;  %938 = vmatpush3.bf16.msra.mxu1 %v993_v44 }
  0x1d   : > { %939 = vmatprep.subr.bf16.mxu1 %v994_v45 }
  0x1e   : > { %v408_v36 = vpack.c.bf16 %v1162_v35, %v1160_v34 }
  0x1f   : > { %530 = vmatpush1.bf16.msra.mxu0 %v982_v23 }
  0x20   : > { %531 = vmatprep.subr.bf16.mxu0 %v983_v25  ;;  %940 = vmatpush3.bf16.msra.mxu1 %v995_v46 }
  0x21   : > { %941 = vmatprep.subr.bf16.mxu1 %v996_v47 }
  0x23   : > { %532 = vmatpush1.bf16.msra.mxu0 %v985_v29 }
  0x24   : > { %942 = vmatpush3.bf16.msra.mxu1 %v997_v48 }
  0x25   : > { %943 = vmatprep.subr.bf16.mxu1 %v998_v49 }
  0x26   : > { %550 = vmatmul.mubr.bf16.vlgmr.msra.gmra.mrb[0].mxu0 %v408_v36 }
  0x28   : > { %944 = vmatpush3.bf16.msra.mxu1 %v999_v50 }
  0x29   : > { %945 = vmatprep.subr.bf16.mxu1 %v1000_v51 }
  0x2c   : > { %946 = vmatpush3.bf16.msra.mxu1 %v1001_v52 }
  0xf9   : > { %v551_v57 = vpop.f32.mrb[0].mxu0 }
  0xfa   : > { %v552_v58 = vadd.f32 %v551_v57, %v430_v55  ;;  %v553_v59 = vpop.f32.mrb[1].mxu0 }
  0xfb   : > { %v554_v60 = vadd.f32 %v553_v59, %v434_v56  ;;  %v555_v61 = vpop.f32.mrb[2].mxu0 }
  0xfc   : > { %v560_v62 = vmul.f32 %v552_v58, %v552_v58  ;;  %v556_v63 = vadd.f32 %v555_v61, %v430_v55  ;;  %v557_v0 = vpop.f32.mrb[3].mxu0 }
  0xfd   : > { %v561_v1 = vmul.f32 %v554_v60, %v554_v60  ;;  %v558_v2 = vadd.f32 %v557_v0, %v434_v56 }
  0xfe   : > { %v564_v3 = vmul.f32 %v560_v62, %v552_v58  ;;  %v562_v4 = vmul.f32 %v556_v63, %v556_v63 }
  0xff   : > { %v565_v5 = vmul.f32 %v561_v1, %v554_v60  ;;  %v563_v6 = vmul.f32 %v558_v2, %v558_v2 }
 0x100   : > { %v568_v7 = vmul.f32 0.044715, %v564_v3  ;;  %v566_v8 = vmul.f32 %v562_v4, %v556_v63 }
 0x101   : > { %v569_v10 = vmul.f32 0.044715, %v565_v5  ;;  %v567_v9 = vmul.f32 %v563_v6, %v558_v2 }
 0x102   : > { %v572_v11 = vadd.f32 %v568_v7, %v552_v58  ;;  %v570_v12 = vmul.f32 0.044715, %v566_v8 }
 0x103   : > { %v571_v13 = vmul.f32 0.044715, %v567_v9  ;;  %v573_v14 = vadd.f32 %v569_v10, %v554_v60 }
 0x104   : > { %v576_v15 = vmul.f32 0.7978846, %v572_v11  ;;  %v574_v16 = vadd.f32 %v570_v12, %v556_v63 }
 0x105   : > { %v575_v17 = vadd.f32 %v571_v13, %v558_v2  ;;  %v577_v18 = vmul.f32 0.7978846, %v573_v14 }
 0x106   : > { %1004 = vtanh.f32 %v576_v15  ;;  %v578_v19 = vmul.f32 0.7978846, %v574_v16 }
 0x107   : > { %v579_v20 = vmul.f32 0.7978846, %v575_v17  ;;  %1006 = vtanh.f32 %v577_v18 }
 0x108   : > { %1008 = vtanh.f32 %v578_v19 }
 0x109   : > { %1010 = vtanh.f32 %v579_v20 }
 0x110   : > { %v1005_v21 = vpop.eup %1004 }
 0x111   : > { %v1007_v22 = vpop.eup %1006  ;;  %v584_v23 = vadd.f32 1.0, %v1005_v21 }
 0x112   : > { %v1009_v24 = vpop.eup %1008  ;;  %v585_v25 = vadd.f32 1.0, %v1007_v22 }
 0x113   : > { %v1011_v26 = vpop.eup %1010  ;;  %v586_v27 = vadd.f32 1.0, %v1009_v24  ;;  %v588_v28 = vmul.f32 0.5, %v584_v23 }
 0x114   : > { %v587_v29 = vadd.f32 1.0, %v1011_v26  ;;  %v589_v30 = vmul.f32 0.5, %v585_v25 }
 0x115   : > { %v590_v31 = vmul.f32 0.5, %v586_v27  ;;  %v592_v33 = vmul.f32 %v588_v28, %v552_v58 }
 0x116   : > { %v591_v32 = vmul.f32 0.5, %v587_v29  ;;  %v593_v37 = vmul.f32 %v589_v30, %v554_v60 }
 0x117   : > { %v594_v36 = vmul.f32 %v590_v31, %v556_v63 }
 0x118   : > { %v595_v38 = vmul.f32 %v591_v32, %v558_v2 }
 0x119   : > { %v596_v39 = vpack.c.bf16 %v594_v36, %v592_v33 }
 0x11a   : > { %v597_v40 = vpack.c.bf16 %v595_v38, %v593_v37 }
 0x11c   : > { %765 = vmatprep.mubr.bf16.mxu1 %v597_v40 }
 0x11d   : > { %766 = vmatmul.mubr.bf16.vlgmr.msra.gmra.mrb[0].mxu1 %v596_v39 }
 0x1f0   : > { %v947_v41 = vpop.f32.mrb[0].mxu1 }
 0x1f1   : > { %v948_v43 = vpop.f32.mrb[1].mxu1 }
 0x1f2   : > { %v949_v44 = vadd.f32 %v948_v43, %v947_v41  ;;  %v950_v45 = vpop.f32.mrb[2].mxu1 }
 0x1f3   : > { %v951_v46 = vpop.f32.mrb[3].mxu1 }
 0x1f4   : > { %v768_v47 = vadd.f32 %v949_v44, %v912_v42  ;;  %v952_v48 = vadd.f32 %v951_v46, %v950_v45 }
 0x1f6   : > { %v774_v49 = vadd.f32 %v768_v47, %v1160_v34  ;;  %v771_v50 = vadd.f32 %v952_v48, %v912_v42 }
 0x1f8   : > { %776 = vst [vmem:[%s368_s15] sm:$0xff] %v774_v49  ;;  %v775_v51 = vadd.f32 %v771_v50, %v1162_v35  ;;  %v785_v52 = vmul.f32 %v774_v49, %v774_v49 }
 0x1fa   : > { %777 = vst [vmem:[%s368_s15 + $0x8] sm:$0xff] %v775_v51  ;;  %v778_v53 = vadd.f32 %v775_v51, %v774_v49  ;;  %v786_v54 = vmul.f32 %v775_v51, %v775_v51 }
 0x1fc   : > { %v779_v55 = vrot.slane %v778_v53, 4  ;;  %v787_v56 = vadd.f32 %v786_v54, %v785_v52 }
 0x1fe   : > { %v780_v57 = vadd.f32 %v779_v55, %v778_v53  ;;  %v788_v58 = vrot.slane %v787_v56, 4 }
 0x200   : > { %v781_v59 = vrot.slane %v780_v57, 2  ;;  %v789_v60 = vadd.f32 %v788_v58, %v787_v56 }
 0x202   : > { %v782_v61 = vadd.f32 %v781_v59, %v780_v57  ;;  %v790_v62 = vrot.slane %v789_v60, 2 }
 0x204   : > { %v783_v63 = vrot.slane %v782_v61, 1  ;;  %v791_v34 = vadd.f32 %v790_v62, %v789_v60 }
 0x206   : > { %v792_v0 = vrot.slane %v791_v34, 1  ;;  %v784_v35 = vadd.f32 %v783_v63, %v782_v61 }
 0x208   : > { %v793_v1 = vadd.f32 %v792_v0, %v791_v34 }
 0x20a   : > { %v795_v2 = vsel %vm794_vm0, %v784_v35, %v793_v1 }
 0x20b   : > { %796 = vst [vmem:[%s373_s17] sm:$0x3] %v795_v2 }
 0x20c PF: > { %s21_s13 = sadd.s32 1, %s1018_s13  }
 0x20d   : > { %p18_p5 = scmp.ge.s32.totalorder %s21_s13, 6  }
 0x20f   :  { %20 = sbr.rel (!%p18_p5) target bundleno = 1 (0x1), region = 98 }

// kernel: tsti_encoder_forward.7
= control target key start
LH: loop header
LB: loop body
LE: loop exit
PB: predicated region body
PF: predicated region fallthrough
CT: control target
= control target key end

     0   :  { %s2830_s21 = smov 0   ;;  %s3205_s0 = inlined_call_operand.vmem [shape: f32[8,8,128], index: 0, kind: input, shape index: {}]   ;;  %s3206_s1 = inlined_call_operand.vmem [shape: f32[8,4,8,8], index: 1, kind: input, shape index: {}]   ;;  %s3207_s2 = inlined_call_operand.vmem [shape: f32[1,128], index: 2, kind: input, shape index: {}, may-alias: {2,5}]   ;;  %s3208_s3 = inlined_call_operand.vmem [shape: f32[1,128], index: 3, kind: input, shape index: {}]   ;;  %s3209_s4 = inlined_call_operand.vmem [shape: f32[1,128], index: 4, kind: input, shape index: {}]   ;;  %s3210_s5 = inlined_call_operand.vmem [shape: f32[1,128], index: 5, kind: input, shape index: {}, may-alias: {2,5}]   ;;  %s3211_s6 = inlined_call_operand.vmem [shape: bf16[128,384], index: 6, kind: input, shape index: {}]   ;;  %s3212_s7 = inlined_call_operand.vmem [shape: f32[1,384], index: 7, kind: input, shape index: {}]   ;;  %s3213_s8 = inlined_call_operand.vmem [shape: bf16[128,128], index: 8, kind: input, shape index: {}]   ;;  %s3214_s9 = inlined_call_operand.vmem [shape: f32[1,128], index: 9, kind: input, shape index: {}]   ;;  %s3215_s10 = inlined_call_operand.vmem [shape: f32[8,8,128], index: 10, kind: output, shape index: {0}]   ;;  %s3216_s11 = inlined_call_operand.vmem [shape: f32[8,4,8,8], index: 11, kind: output, shape index: {1}]   ;;  %s3217_s12 = inlined_call_operand.vmem [shape: f32[4,2,128], index: 12, kind: output, shape index: {2}]  }
   0x1 LB: > { %s2836_s22 = sadd.s32 4294967295, %s2757_s21   ;;  %p2403_p0 = scmp.ge.s32.totalorder %s2757_s21, 1  ;;  %s2757_s21 = sphi %s2830_s21, %s23_s21  }
   0x2   : > { %p380_p1 = scmp.lt.s32.totalorder %s2757_s21, 5 }
   0x4   : > { %p381_p2 = pnand %p2403_p0, %p380_p1 }
   0x5   : > { %v2677_v0 = vld [vmem:[%s3211_s6 + $0x4] ss:$12 sps:$4 sm:$0xff] (!%p381_p2)   ;;  %v2679_v1 = vld [vmem:[%s3211_s6] ss:$12 sps:$4 sm:$0xff] (!%p381_p2)   ;;  %v2759_v2 = vmov (!%p381_p2), 0   ;;  %s2404_s27 = sshll.u32 (!%p381_p2), %s2836_s22, 1  ;;  %v486_v6 = vlaneseq (!%p381_p2) }
   0x6   : > { %384 = sbr.rel (%p381_p2) target bundleno = 3010 (0xbc2), region = 60  ;;  %712 = vmatprep.mubr.bf16.mxu1 (!%p381_p2), %v2759_v2  ;;  %680 = vmatprep.subr.bf16.mxu1 (!%p381_p2), %v2677_v0  ;;  %v2680_v3 = vld [vmem:[%s3211_s6 + $0x1c] ss:$12 sps:$4 sm:$0xff] (!%p381_p2)   ;;  %v2682_v4 = vld [vmem:[%s3211_s6 + $0x18] ss:$12 sps:$4 sm:$0xff] (!%p381_p2)   ;;  %p439_p3 = scmp.lt.s32.totalorder (!%p381_p2), %s2404_s27, 7 }
   0x7   : > { %681 = vmatpush1.bf16.msra.mxu1 (!%p381_p2), %v2679_v1  ;;  %v2683_v5 = vld [vmem:[%s3211_s6 + $0x34] ss:$12 sps:$4 sm:$0xff] (!%p381_p2)   ;;  %v2685_v7 = vld [vmem:[%s3211_s6 + $0x30] ss:$12 sps:$4 sm:$0xff] (!%p381_p2)   ;;  %v2686_v8 = vld [vmem:[%s3211_s6 + $0x4c] ss:$12 sps:$4 sm:$0xff] (!%p381_p2)  }
   0x8   : > { %682 = vmatprep.subr.bf16.mxu1 (!%p381_p2), %v2680_v3  ;;  %v2864_v9 = vshrl.u32 (!%p381_p2), %v486_v6, 7  ;;  %v2688_v10 = vld [vmem:[%s3211_s6 + $0x48] ss:$12 sps:$4 sm:$0xff] (!%p381_p2)   ;;  %v471_v11 = vld [vmem:[%s3208_s3] sm:$0x1] (!%p381_p2)  ;;  %v2760_v37 = vmov (!%p381_p2), 0.0  }
   0x9   : > { %v2689_v12 = vld [vmem:[%s3211_s6 + $0x64] ss:$12 sps:$4 sm:$0xff] (!%p381_p2)   ;;  %v472_v13 = vadd.f32 (!%p381_p2), 1e-05, %v471_v11  ;;  %v2691_v15 = vld [vmem:[%s3211_s6 + $0x60] ss:$12 sps:$4 sm:$0xff] (!%p381_p2)   ;;  %2548 = vmatprep.subr.mxu0 (!%p381_p2), %v2760_v37 }
   0xa   : > { %v488_v14 = vsub.s32 (!%p381_p2), 0, %v2864_v9  ;;  %v2692_v16 = vld [vmem:[%s3211_s6 + $0x7c] ss:$12 sps:$4 sm:$0xff] (!%p381_p2)   ;;  %v2694_v17 = vld [vmem:[%s3211_s6 + $0x78] ss:$12 sps:$4 sm:$0xff] (!%p381_p2)   ;;  %vm2761_vm0 = vmmov (!%p381_p2), 0  }
   0xb   : > { %683 = vmatpush1.bf16.msra.mxu1 (!%p381_p2), %v2682_v4  ;;  %2717 = vrsqrt.f32 (!%p381_p2), %v472_v13  ;;  %v2695_v18 = vld [vmem:[%s3211_s6 + $0x94] ss:$12 sps:$4 sm:$0xff] (!%p381_p2)   ;;  %v2697_v23 = vld [vmem:[%s3211_s6 + $0x90] ss:$12 sps:$4 sm:$0xff] (!%p381_p2)   ;;  %v2698_v25 = vld [vmem:[%s3211_s6 + $0xac] ss:$12 sps:$4 sm:$0xff] (!%p381_p2)   ;;  %2550 = vmatprep.mubr.msk.f32.mxu0 (!%p381_p2), %vm2761_vm0, %v2760_v37 }
   0xc   : > { %684 = vmatprep.subr.bf16.mxu1 (!%p381_p2), %v2683_v5  ;;  %v474_v21 = vld [vmem:[%s3209_s4] sm:$0x1] (!%p381_p2)  ;;  %v2700_v29 = vld [vmem:[%s3211_s6 + $0xa8] ss:$12 sps:$4 sm:$0xff] (!%p381_p2)   ;;  %v543_v39 = vsub.s32 (!%p381_p2), 1, %v2864_v9  ;;  %vm774_vm1 = vcmask (!%p381_p2), 261120  }
   0xd   : > { %s3219_s27 = smov (!%p439_p3, %s2404_s27), 7  ;;  %v2415_v22 = vld [vmem:[%s3207_s2] ss:$0 sm:$0xff]  ;;  %s2762_s25 = smov 96   ;;  %v2701_v52 = vld [vmem:[%s3211_s6 + $0x8] ss:$12 sps:$4 sm:$0xff]  }
   0xe   : > { %s2405_s29 = sshll.u32 %s3219_s27, 3  ;;  %v2416_v31 = vld [vmem:[%s3210_s5] ss:$0 sm:$0xff]  ;;  %v2703_v54 = vld [vmem:[%s3211_s6 + $0x38] ss:$12 sps:$4 sm:$0xff]   ;;  %s2476_s13 = sshll.u32 %s3219_s27, 5 }
   0xf   : > { %685 = vmatpush1.bf16.msra.mxu1 %v2685_v7  ;;  %s442_s20 = scalar_lea.vmem %s3205_s0, %s2405_s29  ;;  %v2927_v38 = vld [vmem:[%s3212_s7] sm:$0x7]  ;;  %v2704_v55 = vld [vmem:[%s3211_s6 + $0x50] ss:$12 sps:$4 sm:$0xff]   ;;  %v2705_v56 = vld [vmem:[%s3211_s6 + $0x68] ss:$12 sps:$4 sm:$0xff]   ;;  %s2994_s16 = scalar_lea.vmem %s3206_s1, %s2476_s13 }
  0x10   : > { %686 = vmatprep.subr.bf16.mxu1 %v2686_v8  ;;  %v469_v19 = vld [vmem:[%s442_s20] sm:$0xff]  ;;  %v470_v20 = vld [vmem:[%s442_s20 + $0x8] sm:$0xff]  ;;  %v540_v40 = vrot.slane %v2927_v38, %v488_v14  ;;  %v544_v41 = vrot.slane %v2927_v38, %v543_v39  ;;  %v2708_v59 = vld [vmem:[%s3211_s6 + $0xb0] ss:$12 sps:$4 sm:$0xff]   ;;  %s3000_s19 = scalar_lea.vmem %s3216_s11, %s2476_s13  ;;  %vm927_vm2 = vcmask 64512   ;;  %s2763_s20 = smov 64  }
  0x11   : > { %v483_v27 = vsub.f32 %v469_v19, %v2415_v22  ;;  %v484_v28 = vsub.f32 %v470_v20, %v2415_v22  ;;  %v2702_v53 = vld [vmem:[%s3211_s6 + $0x20] ss:$12 sps:$4 sm:$0xff]   ;;  %v2707_v58 = vld [vmem:[%s3211_s6 + $0x98] ss:$12 sps:$4 sm:$0xff]   ;;  %s2764_s23 = smov 32   ;;  %vm2122_vm3 = vcmask 523264   ;;  %s455_s15 = scalar_lea.vmem %s3215_s10, %s2405_s29 }
  0x12   : > { %v2706_v57 = vld [vmem:[%s3211_s6 + $0x80] ss:$12 sps:$4 sm:$0xff]   ;;  %vm2125_vm4 = vcmask 785408   ;;  %p464_p4 = scmp.lt.s32.totalorder %s2836_s22, 3  ;;  %vm2261_vm5 = vcmask 1040384  }
  0x13   : > { %687 = vmatpush1.bf16.msra.mxu1 %v2688_v10  ;;  %v766_v60 = vld [vmem:[%s2994_s16] sm:$0xff] }
  0x14   : > { %688 = vmatprep.subr.bf16.mxu1 %v2689_v12  ;;  %v770_v0 = vld [vmem:[%s2994_s16 + $0x20] sm:$0xff]  ;;  %s3221_s22 = smov (!%p464_p4, %s2836_s22), 3 }
  0x15   : > { %v2718_v24 = vpop.eup %2717  ;;  %s2414_s27 = sshll.u32 %s3221_s22, 1 }
  0x16   : > { %v475_v26 = vmul.f32 %v2718_v24, %v474_v21  ;;  %s467_s17 = scalar_lea.vmem %s3217_s12, %s2414_s27 }
  0x17   : > { %689 = vmatpush1.bf16.msra.mxu1 %v2691_v15 }
  0x18   : > { %690 = vmatprep.subr.bf16.mxu1 %v2692_v16  ;;  %v489_v30 = vrot.slane %v475_v26, %v488_v14 }
  0x1a   : > { %v491_v32 = vmul.f32 %v489_v30, %v483_v27  ;;  %v492_v33 = vmul.f32 %v489_v30, %v484_v28 }
  0x1b   : > { %691 = vmatpush1.bf16.msra.mxu1 %v2694_v17  ;;  %v547_v17 = vsub.s32 2, %v2864_v9 }
  0x1c   : > { %692 = vmatprep.subr.bf16.mxu1 %v2695_v18  ;;  %v2912_v34 = vadd.f32 %v2416_v31, %v491_v32  ;;  %v2914_v35 = vadd.f32 %v2416_v31, %v492_v33 }
  0x1d   : > { %v548_v20 = vrot.slane %v2927_v38, %v547_v17 }
  0x1e   : > { %v502_v36 = vpack.c.bf16 %v2914_v35, %v2912_v34 }
  0x1f   : > { %693 = vmatpush1.bf16.msra.mxu1 %v2697_v23 }
  0x20   : > { %694 = vmatprep.subr.bf16.mxu1 %v2698_v25 }
  0x23   : > { %695 = vmatpush1.bf16.msra.mxu1 %v2700_v29 }
  0x24   : > { %2528 = vmatprep.subr.bf16.mxu1 %v2760_v37 }
  0x26   : > { %713 = vmatmul.mubr.bf16.vlgmr.msra.gmra.mrb[0].mxu1 %v502_v36 }
  0x27   : > { %2544 = vmatprep.mubr.msk.bf16.mxu1 %vm2761_vm0, %v2760_v37  ;;  %2529 = vmatpush3.bf16.msra.mxu1 %v2701_v52 }
  0x28   : > { %2530 = vmatprep.subr.bf16.mxu1 %v2760_v37 }
  0x2b   : > { %2531 = vmatpush3.bf16.msra.mxu1 %v2702_v53 }
  0x2c   : > { %2532 = vmatprep.subr.bf16.mxu1 %v2760_v37 }
  0x2f   : > { %2533 = vmatpush3.bf16.msra.mxu1 %v2703_v54 }
  0x30   : > { %2534 = vmatprep.subr.bf16.mxu1 %v2760_v37 }
  0x33   : > { %2535 = vmatpush3.bf16.msra.mxu1 %v2704_v55 }
  0x34   : > { %2536 = vmatprep.subr.bf16.mxu1 %v2760_v37 }
  0x37   : > { %2537 = vmatpush3.bf16.msra.mxu1 %v2705_v56 }
  0x38   : > { %2538 = vmatprep.subr.bf16.mxu1 %v2760_v37 }
  0x3b   : > { %2539 = vmatpush3.bf16.msra.mxu1 %v2706_v57 }
  0x3c   : > { %2540 = vmatprep.subr.bf16.mxu1 %v2760_v37 }
  0x3f   : > { %2541 = vmatpush3.bf16.msra.mxu1 %v2707_v58 }
  0x40   : > { %2542 = vmatprep.subr.bf16.mxu1 %v2760_v37 }
  0x43   : > { %2543 = vmatpush3.bf16.msra.mxu1 %v2708_v59 }
  0x44   : > { %2593 = vmatprep.subr.mxu1 %v2760_v37 }
  0x46   : > { %2545 = vmatmul.mubr.bf16.vlgmr.msra.gmra.mrb[4].mxu1 %v502_v36 }
  0x47   : > { %2595 = vmatprep.mubr.msk.f32.mxu1 %vm2761_vm0, %v2760_v37 }
  0xf9   : > { %v714_v42 = vpop.f32.mrb[0].mxu1 }
  0xfa   : > { %v715_v43 = vadd.f32 %v714_v42, %v540_v40  ;;  %v716_v44 = vpop.f32.mrb[1].mxu1 }
  0xfb   : > { %v2932_v45 = vadd.f32 %v716_v44, %v544_v41  ;;  %v718_v46 = vpop.f32.mrb[2].mxu1 }
  0xfc   : > { %v2934_v47 = vmul.f32 0.17677669, %v715_v43  ;;  %v719_v48 = vadd.f32 %v718_v46, %v540_v40  ;;  %v720_v49 = vpop.f32.mrb[3].mxu1  ;;  %v771_v46 = vld [vmem:[%s2994_s16 + $0x28] sm:$0xff] }
  0xfd   : > { %2549 = vmatpush3.xpose.msk.msra.mxu0 %vm774_vm1, %v2932_v45  ;;  %v2941_v50 = vadd.f32 %v720_v49, %v544_v41  ;;  %v767_v41 = vld [vmem:[%s2994_s16 + $0x8] sm:$0xff] }
  0xfe   : > { %1096 = vrot.lane.b32.xlu1 %v2934_v47, %s2762_s25  ;;  %2553 = vmatprep.subr.mxu0 %v2760_v37  ;;  %v2949_v51 = vmul.f32 0.17677669, %v719_v48 }
 0x100   : > { %2551 = vmatmul.mubr.msk.f32.vlgmr.msra.gmra.mrb[0].mxu0 %vm774_vm1, %v2934_v47 }
 0x101   : > { %2554 = vmatpush3.xpose.msk.msra.mxu0 %vm774_vm1, %v2941_v50  ;;  %2555 = vmatprep.mubr.msk.f32.mxu0 %vm2761_vm0, %v2760_v37 }
 0x102   : > { %2558 = vmatprep.subr.mxu0 %v2760_v37 }
 0x104   : > { %2556 = vmatmul.mubr.msk.f32.vlgmr.msra.gmra.mrb[2].mxu0 %vm774_vm1, %v2949_v51 }
 0x105   : > { %2560 = vmatprep.mubr.msk.f32.mxu0 %vm2761_vm0, %v2760_v37 }
 0x119   : > { %v757_v18 = vpop.f32.mrb[4].mxu1 }
 0x11a   : > { %v2546_v19 = vpop.f32.mrb[5].mxu1  ;;  %v3017_v23 = vadd.f32 %v757_v18, %v548_v20 }
 0x11b   : > { %v760_v21 = vpop.f32.mrb[6].mxu1 }
 0x11c   : > { %v2547_v22 = vpop.f32.mrb[7].mxu1  ;;  %v3019_v24 = vadd.f32 %v760_v21, %v548_v20  ;;  %2559 = vmatpush3.msra.mxu0 %v3017_v23 }
 0x11d   : > { %2563 = vmatprep.subr.mxu0 %v2760_v37 }
 0x170   : > { %v1097_v9 = vpop.permute.xlu1 %1096 }
 0x1d3   : > { %v847_v61 = vpop.f32.mrb[0].mxu0 }
 0x1d4   : > { %v848_v62 = vadd.f32 %v847_v61, %v766_v60  ;;  %v2552_v63 = vpop.f32.mrb[1].mxu0 }
 0x1d6   : > { %2088 = vst.msk [vmem:[%s3000_s19] sm:$0xff] %vm927_vm2, %v848_v62  ;;  %v928_v1 = vsel %vm927_vm2, %v848_v62, -inf }
 0x1d7   : > { %929 = vmax.xlane.f32.xlu0 %v928_v1  ;;  %v923_v2 = vpop.f32.mrb[2].mxu0 }
 0x1d8   : > { %v924_v3 = vadd.f32 %v923_v2, %v770_v0  ;;  %v2557_v4 = vpop.f32.mrb[3].mxu0 }
 0x1da   : > { %2092 = vst.msk [vmem:[%s3000_s19 + $0x20] sm:$0xff] %vm927_vm2, %v924_v3  ;;  %v931_v5 = vsel %vm927_vm2, %v924_v3, -inf }
 0x1db   : > { %932 = vmax.xlane.f32.xlu0 %v931_v5 }
 0x1f1   : > { %1098 = vrot.lane.b32.xlu0 %v2932_v45, %s2762_s25 }
 0x264   : > { %v930_v6 = vpop.xlane.xlu0 %929 }
 0x265   : > { %v934_v7 = vsub.f32 %v848_v62, %v930_v6 }
 0x267   : > { %v936_v8 = vmul.f32 1.442695, %v934_v7 }
 0x268   : > { %v933_v10 = vpop.xlane.xlu0 %932 }
 0x269   : > { %2719 = vpow2.f32 %v936_v8  ;;  %v935_v11 = vsub.f32 %v924_v3, %v933_v10 }
 0x26b   : > { %v938_v12 = vmul.f32 1.442695, %v935_v11 }
 0x26c   : > { %v1099_v31 = vpop.permute.xlu0 %1098 }
 0x26d   : > { %2721 = vpow2.f32 %v938_v12 }
 0x273   : > { %v2720_v13 = vpop.eup %2719 }
 0x274   : > { %v940_v14 = vsel %vm927_vm2, %v2720_v13, 0.0 }
 0x275   : > { %941 = vadd.xlane.f32.xlu1 %v940_v14  ;;  %v772_v14 = vld [vmem:[%s2994_s16 + $0x30] sm:$0xff] }
 0x277   : > { %v2722_v15 = vpop.eup %2721 }
 0x278   : > { %v943_v16 = vsel %vm927_vm2, %v2722_v15, 0.0 }
 0x279   : > { %944 = vadd.xlane.f32.xlu1 %v943_v16 }
 0x28a   : > { %1176 = vrot.lane.b32.xlu1 %v2941_v50, %s2762_s25 }
 0x28e   : > { %1174 = vrot.lane.b32.xlu1 %v2949_v51, %s2762_s25 }
 0x302   : > { %v942_v25 = vpop.xlane.xlu1 %941 }
 0x303   : > { %2723 = vrcp.f32 %v942_v25 }
 0x306   : > { %v945_v26 = vpop.xlane.xlu1 %944 }
 0x307   : > { %2725 = vrcp.f32 %v945_v26 }
 0x30a   : > { %v1177_v32 = vpop.permute.xlu1 %1176 }
 0x30d   : > { %v2724_v27 = vpop.eup %2723 }
 0x30e   : > { %v948_v28 = vmul.f32 %v2724_v27, %v2720_v13  ;;  %v1175_v33 = vpop.permute.xlu1 %1174  ;;  %v768_v27 = vld [vmem:[%s2994_s16 + $0x10] sm:$0xff] }
 0x310   : > { %2561 = vmatmul.mubr.msk.f32.vlgmr.msra.gmra.mrb[4].mxu0 %vm927_vm2, %v948_v28 }
 0x311   : > { %v2726_v29 = vpop.eup %2725  ;;  %2564 = vmatpush3.msra.mxu0 %v3019_v24  ;;  %2565 = vmatprep.mubr.msk.f32.mxu0 %vm2761_vm0, %v2760_v37 }
 0x312   : > { %v949_v30 = vmul.f32 %v2726_v29, %v2722_v15  ;;  %2568 = vmatprep.subr.mxu0 %v2760_v37 }
 0x314   : > { %2566 = vmatmul.mubr.msk.f32.vlgmr.msra.gmra.mrb[6].mxu0 %vm927_vm2, %v949_v30 }
 0x315   : > { %2570 = vmatprep.mubr.msk.f32.mxu0 %vm2761_vm0, %v2760_v37 }
 0x318   : > { %2569 = vmatpush3.xpose.msk.msra.mxu0 %vm774_vm1, %v1099_v31 }
 0x319   : > { %2573 = vmatprep.subr.mxu0 %v2760_v37 }
 0x31b   : > { %2571 = vmatmul.mubr.msk.f32.vlgmr.msra.gmra.mrb[8].mxu0 %vm774_vm1, %v1097_v9 }
 0x31c   : > { %2574 = vmatpush3.xpose.msk.msra.mxu0 %vm774_vm1, %v1177_v32  ;;  %2575 = vmatprep.mubr.msk.f32.mxu0 %vm2761_vm0, %v2760_v37 }
 0x31d   : > { %2578 = vmatprep.subr.mxu0 %v2760_v37 }
 0x31f   : > { %2576 = vmatmul.mubr.msk.f32.vlgmr.msra.gmra.mrb[10].mxu0 %vm774_vm1, %v1175_v33 }
 0x320   : > { %2580 = vmatprep.mubr.msk.f32.mxu0 %vm2761_vm0, %v2760_v37 }
 0x3e3   : > { %v3043_v36 = vpop.f32.mrb[4].mxu0 }
 0x3e4   : > { %v2562_v38 = vpop.f32.mrb[5].mxu0 }
 0x3e7   : > { %v3045_v39 = vpop.f32.mrb[6].mxu0 }
 0x3e8   : > { %v2567_v40 = vpop.f32.mrb[7].mxu0 }
 0x3ee   : > { %v1170_v42 = vpop.f32.mrb[8].mxu0 }
 0x3ef   : > { %v1171_v43 = vadd.f32 %v1170_v42, %v767_v41  ;;  %v2572_v44 = vpop.f32.mrb[9].mxu0 }
 0x3f1   : > { %2089 = vst.msk [vmem:[%s3000_s19 + $0x8] sm:$0xff] %vm927_vm2, %v1171_v43  ;;  %v1252_v48 = vsel %vm927_vm2, %v1171_v43, -inf }
 0x3f2   : > { %1253 = vmax.xlane.f32.xlu0 %v1252_v48  ;;  %v1248_v49 = vpop.f32.mrb[10].mxu0 }
 0x3f3   : > { %v1249_v52 = vadd.f32 %v1248_v49, %v771_v46  ;;  %v2577_v53 = vpop.f32.mrb[11].mxu0 }
 0x3f5   : > { %2093 = vst.msk [vmem:[%s3000_s19 + $0x28] sm:$0xff] %vm927_vm2, %v1249_v52  ;;  %v1255_v54 = vsel %vm927_vm2, %v1249_v52, -inf }
 0x3f6   : > { %1256 = vmax.xlane.f32.xlu1 %v1255_v54 }
 0x407   : > { %1352 = vrot.lane.b32.xlu1 %v3019_v24, %s2762_s25 }
 0x40b   : > { %1430 = vrot.lane.b32.xlu1 %v2932_v45, %s2763_s20 }
 0x40f   : > { %1508 = vrot.lane.b32.xlu1 %v2941_v50, %s2763_s20 }
 0x413   : > { %1506 = vrot.lane.b32.xlu1 %v2949_v51, %s2763_s20 }
 0x47f   : > { %v1254_v55 = vpop.xlane.xlu0 %1253 }
 0x480   : > { %v1258_v56 = vsub.f32 %v1171_v43, %v1254_v55 }
 0x482   : > { %v1260_v57 = vmul.f32 1.442695, %v1258_v56 }
 0x483   : > { %v1257_v58 = vpop.xlane.xlu1 %1256 }
 0x484   : > { %2727 = vpow2.f32 %v1260_v57  ;;  %v1259_v1 = vsub.f32 %v1249_v52, %v1257_v58 }
 0x486   : > { %v1262_v2 = vmul.f32 1.442695, %v1259_v1 }
 0x487   : > { %v1353_v59 = vpop.permute.xlu1 %1352 }
 0x488   : > { %2729 = vpow2.f32 %v1262_v2 }
 0x48b   : > { %v1431_v60 = vpop.permute.xlu1 %1430 }
 0x48e   : > { %v2728_v61 = vpop.eup %2727 }
 0x48f   : > { %v1509_v62 = vpop.permute.xlu1 %1508  ;;  %v1264_v63 = vsel %vm927_vm2, %v2728_v61, 0.0 }
 0x490   : > { %1265 = vadd.xlane.f32.xlu0 %v1264_v63  ;;  %2594 = vmatpush3.xpose.msk.msra.mxu1 %vm774_vm1, %v1509_v62 }
 0x491   : > { %2603 = vmatprep.subr.mxu1 %v2760_v37 }
 0x492   : > { %v2730_v3 = vpop.eup %2729 }
 0x493   : > { %v1507_v0 = vpop.permute.xlu1 %1506  ;;  %v1267_v4 = vsel %vm927_vm2, %v2730_v3, 0.0 }
 0x494   : > { %2596 = vmatmul.mubr.msk.f32.vlgmr.msra.gmra.mrb[8].mxu1 %vm774_vm1, %v1507_v0 }
 0x495   : > { %2605 = vmatprep.mubr.msk.f32.mxu1 %vm2761_vm0, %v2760_v37 }
 0x4a6   : > { %1275 = vrot.lane.b32.xlu0 %v3017_v23, %s2762_s25 }
 0x4c5   : > { %1268 = vadd.xlane.f32.xlu0 %v1267_v4 }
 0x4db   : > { %1428 = vrot.lane.b32.xlu0 %v2934_v47, %s2763_s20 }
 0x51d   : > { %v1266_v5 = vpop.xlane.xlu0 %1265 }
 0x51e   : > { %2731 = vrcp.f32 %v1266_v5 }
 0x521   : > { %v1276_v6 = vpop.permute.xlu0 %1275 }
 0x522   : > { %2579 = vmatpush3.msra.mxu0 %v1276_v6 }
 0x523   : > { %2583 = vmatprep.subr.mxu0 %v2760_v37 }
 0x528   : > { %v2732_v7 = vpop.eup %2731 }
 0x529   : > { %v1272_v8 = vmul.f32 %v2732_v7, %v2728_v61  ;;  %v769_v7 = vld [vmem:[%s2994_s16 + $0x18] sm:$0xff] }
 0x52b   : > { %2581 = vmatmul.mubr.msk.f32.vlgmr.msra.gmra.mrb[12].mxu0 %vm927_vm2, %v1272_v8 }
 0x52c   : > { %2584 = vmatpush3.msra.mxu0 %v1353_v59  ;;  %2585 = vmatprep.mubr.msk.f32.mxu0 %vm2761_vm0, %v2760_v37  ;;  %v773_v59 = vld [vmem:[%s2994_s16 + $0x38] sm:$0xff] }
 0x52d   : > { %2588 = vmatprep.subr.mxu0 %v2760_v37 }
 0x552   : > { %v1269_v10 = vpop.xlane.xlu0 %1268 }
 0x553   : > { %2733 = vrcp.f32 %v1269_v10 }
 0x556   : > { %v1429_v13 = vpop.permute.xlu0 %1428 }
 0x55d   : > { %v2734_v11 = vpop.eup %2733 }
 0x55e   : > { %v1273_v12 = vmul.f32 %v2734_v11, %v2730_v3 }
 0x560   : > { %2586 = vmatmul.mubr.msk.f32.vlgmr.msra.gmra.mrb[14].mxu0 %vm927_vm2, %v1273_v12 }
 0x561   : > { %2589 = vmatpush3.xpose.msk.msra.mxu0 %vm774_vm1, %v1431_v60  ;;  %2590 = vmatprep.mubr.msk.f32.mxu0 %vm2761_vm0, %v2760_v37 }
 0x562   : > { %2598 = vmatprep.subr.mxu0 %v2760_v37 }
 0x564   : > { %2591 = vmatmul.mubr.msk.f32.vlgmr.msra.gmra.mrb[16].mxu0 %vm774_vm1, %v1429_v13 }
 0x565   : > { %2600 = vmatprep.mubr.msk.f32.mxu0 %vm2761_vm0, %v2760_v37 }
 0x567   : > { %v1580_v15 = vpop.f32.mrb[8].mxu1 }
 0x568   : > { %v1581_v16 = vadd.f32 %v1580_v15, %v772_v14  ;;  %v2597_v17 = vpop.f32.mrb[9].mxu1 }
 0x56a   : > { %v1587_v18 = vsel %vm927_vm2, %v1581_v16, -inf  ;;  %2094 = vst.msk [vmem:[%s3000_s19 + $0x30] sm:$0xff] %vm927_vm2, %v1581_v16 }
 0x56b   : > { %1588 = vmax.xlane.f32.xlu1 %v1587_v18 }
 0x57c   : > { %1682 = vrot.lane.b32.xlu1 %v3019_v24, %s2763_s20 }
 0x580   : > { %1760 = vrot.lane.b32.xlu1 %v2932_v45, %s2764_s23 }
 0x584   : > { %1838 = vrot.lane.b32.xlu1 %v2941_v50, %s2764_s23 }
 0x588   : > { %1836 = vrot.lane.b32.xlu1 %v2949_v51, %s2764_s23 }
 0x5f8   : > { %v1589_v19 = vpop.xlane.xlu1 %1588 }
 0x5f9   : > { %v1591_v9 = vsub.f32 %v1581_v16, %v1589_v19 }
 0x5fb   : > { %v1594_v25 = vmul.f32 1.442695, %v1591_v9 }
 0x5fc   : > { %v1683_v20 = vpop.permute.xlu1 %1682 }
 0x5fd   : > { %2604 = vmatpush3.msra.mxu1 %v1683_v20  ;;  %2735 = vpow2.f32 %v1594_v25 }
 0x5fe   : > { %v3097_v21 = vpop.f32.mrb[12].mxu0  ;;  %2613 = vmatprep.subr.mxu1 %v2760_v37 }
 0x5ff   : > { %v2582_v22 = vpop.f32.mrb[13].mxu0 }
 0x600   : > { %v1761_v43 = vpop.permute.xlu1 %1760 }
 0x604   : > { %v1839_v48 = vpop.permute.xlu1 %1838 }
 0x607   : > { %v2736_v31 = vpop.eup %2735 }
 0x608   : > { %v1599_v32 = vsel %vm927_vm2, %v2736_v31, 0.0  ;;  %v1837_v53 = vpop.permute.xlu1 %1836 }
 0x633   : > { %v1424_v45 = vpop.f32.mrb[14].mxu0 }
 0x634   : > { %v2662_v26 = vpack.i.bf16 %v1424_v45, %v3097_v21  ;;  %v2587_v50 = vpop.f32.mrb[15].mxu0 }
 0x637   : > { %v1502_v28 = vpop.f32.mrb[16].mxu0 }
 0x638   : > { %v1503_v51 = vadd.f32 %v1502_v28, %v768_v27  ;;  %v2592_v29 = vpop.f32.mrb[17].mxu0  ;;  %v2709_v27 = vld [vmem:[%s3213_s8] sm:$0xff]   ;;  %v2711_v28 = vld [vmem:[%s3213_s8 + $0x10] sm:$0xff]  }
 0x639   : > { %v2713_v29 = vld [vmem:[%s3213_s8 + $0x20] sm:$0xff]  }
 0x63a   : > { %2090 = vst.msk [vmem:[%s3000_s19 + $0x10] sm:$0xff] %vm927_vm2, %v1503_v51  ;;  %v1584_v30 = vsel %vm927_vm2, %v1503_v51, -inf }
 0x63b   : > { %1585 = vmax.xlane.f32.xlu0 %v1584_v30  ;;  %v2714_v30 = vld [vmem:[%s3213_s8 + $0x28] sm:$0xff]  }
 0x63f   : > { %1600 = vadd.xlane.f32.xlu0 %v1599_v32  ;;  %v2716_v32 = vld [vmem:[%s3213_s8 + $0x38] sm:$0xff]  }
 0x655   : > { %1606 = vrot.lane.b32.xlu0 %v3017_v23, %s2763_s20 }
 0x6c8   : > { %v1586_v33 = vpop.xlane.xlu0 %1585 }
 0x6c9   : > { %v1590_v38 = vsub.f32 %v1503_v51, %v1586_v33  ;;  %v2712_v51 = vld [vmem:[%s3213_s8 + $0x18] sm:$0xff]  }
 0x6cb   : > { %v1592_v40 = vmul.f32 1.442695, %v1590_v38 }
 0x6cc   : > { %v1601_v41 = vpop.xlane.xlu0 %1600 }
 0x6cd   : > { %2737 = vpow2.f32 %v1592_v40 }
 0x6ce   : > { %2739 = vrcp.f32 %v1601_v41 }
 0x6d0   : > { %v1607_v42 = vpop.permute.xlu0 %1606 }
 0x6d1   : > { %2599 = vmatpush3.msra.mxu0 %v1607_v42 }
 0x6d2   : > { %2608 = vmatprep.subr.mxu0 %v2760_v37 }
 0x6d7   : > { %v2738_v44 = vpop.eup %2737 }
 0x6d8   : > { %v2740_v46 = vpop.eup %2739  ;;  %v1596_v49 = vsel %vm927_vm2, %v2738_v44, 0.0 }
 0x6d9   : > { %v1605_v52 = vmul.f32 %v2740_v46, %v2736_v31  ;;  %1597 = vadd.xlane.f32.xlu0 %v1596_v49  ;;  %v2715_v31 = vld [vmem:[%s3213_s8 + $0x30] sm:$0xff]  }
 0x6db   : > { %2606 = vmatmul.mubr.msk.f32.vlgmr.msra.gmra.mrb[10].mxu1 %vm927_vm2, %v1605_v52 }
 0x6dc   : > { %2614 = vmatpush3.xpose.msk.msra.mxu1 %vm774_vm1, %v1839_v48  ;;  %2615 = vmatprep.mubr.msk.f32.mxu1 %vm2761_vm0, %v2760_v37 }
 0x6dd   : > { %2623 = vmatprep.subr.mxu1 %v2760_v37 }
 0x6df   : > { %2616 = vmatmul.mubr.msk.f32.vlgmr.msra.gmra.mrb[12].mxu1 %vm774_vm1, %v1837_v53 }
 0x6e0   : > { %2625 = vmatprep.mubr.msk.f32.mxu1 %vm2761_vm0, %v2760_v37 }
 0x6ef   : > { %1758 = vrot.lane.b32.xlu0 %v2934_v47, %s2764_s23 }
 0x766   : > { %v1598_v54 = vpop.xlane.xlu0 %1597 }
 0x767   : > { %2741 = vrcp.f32 %v1598_v54 }
 0x76a   : > { %v1759_v57 = vpop.permute.xlu0 %1758 }
 0x771   : > { %v2742_v55 = vpop.eup %2741 }
 0x772   : > { %v1604_v56 = vmul.f32 %v2742_v55, %v2738_v44 }
 0x774   : > { %2601 = vmatmul.mubr.msk.f32.vlgmr.msra.gmra.mrb[18].mxu0 %vm927_vm2, %v1604_v56 }
 0x775   : > { %2609 = vmatpush3.xpose.msk.msra.mxu0 %vm774_vm1, %v1761_v43  ;;  %2610 = vmatprep.mubr.msk.f32.mxu0 %vm2761_vm0, %v2760_v37 }
 0x776   : > { %2618 = vmatprep.subr.mxu0 %v2760_v37 }
 0x778   : > { %2611 = vmatmul.mubr.msk.f32.vlgmr.msra.gmra.mrb[20].mxu0 %vm774_vm1, %v1759_v57 }
 0x779   : > { %2620 = vmatprep.mubr.msk.f32.mxu0 %vm2761_vm0, %v2760_v37 }
 0x7ae   : > { %v1754_v47 = vpop.f32.mrb[10].mxu1 }
 0x7af   : > { %v2607_v58 = vpop.f32.mrb[11].mxu1 }
 0x7b2   : > { %v1910_v60 = vpop.f32.mrb[12].mxu1 }
 0x7b3   : > { %v1911_v61 = vadd.f32 %v1910_v60, %v773_v59  ;;  %v2617_v62 = vpop.f32.mrb[13].mxu1  ;;  %v2465_v59 = vld [vmem:[%s3214_s9] ss:$0 sm:$0xff] }
 0x7b5   : > { %v1917_v63 = vsel %vm927_vm2, %v1911_v61, -inf  ;;  %2095 = vst.msk [vmem:[%s3000_s19 + $0x38] sm:$0xff] %vm927_vm2, %v1911_v61 }
 0x7b6   : > { %1918 = vmax.xlane.f32.xlu1 %v1917_v63 }
 0x7c7   : > { %2012 = vrot.lane.b32.xlu1 %v3019_v24, %s2764_s23 }
 0x7cb   : > { %2663 = vrot.lane.b32.xlu1 %v2662_v26, %s2764_s23 }
 0x843   : > { %v1919_v0 = vpop.xlane.xlu1 %1918 }
 0x844   : > { %v1921_v1 = vsub.f32 %v1911_v61, %v1919_v0 }
 0x846   : > { %v1924_v2 = vmul.f32 1.442695, %v1921_v1 }
 0x847   : > { %v2013_v3 = vpop.permute.xlu1 %2012  ;;  %v1678_v4 = vpop.f32.mrb[18].mxu0 }
 0x848   : > { %2743 = vpow2.f32 %v1924_v2  ;;  %v2667_v5 = vpack.i.bf16 %v1754_v47, %v1678_v4  ;;  %2624 = vmatpush3.msra.mxu1 %v2013_v3  ;;  %v2602_v6 = vpop.f32.mrb[19].mxu0 }
 0x84a   : > { %2668 = vrot.lane.b32.xlu1 %v2667_v5, %s2763_s20 }
 0x84b   : > { %v1832_v8 = vpop.f32.mrb[20].mxu0  ;;  %v2664_v41 = vpop.permute.xlu1 %2663 }
 0x84c   : > { %v1833_v10 = vadd.f32 %v1832_v8, %v769_v7  ;;  %v2612_v11 = vpop.f32.mrb[21].mxu0  ;;  %v2666_v43 = vunpack.i.h.bf16 %v2664_v41  ;;  %v2665_v44 = vunpack.i.l.bf16 %v2664_v41 }
 0x84e   : > { %2091 = vst.msk [vmem:[%s3000_s19 + $0x18] sm:$0xff] %vm927_vm2, %v1833_v10  ;;  %v1914_v24 = vsel %vm927_vm2, %v1833_v10, -inf  ;;  %v2121_v49 = vsel %vm774_vm1, %v3045_v39, %v2666_v43  ;;  %v2120_v52 = vsel %vm774_vm1, %v3043_v36, %v2665_v44 }
 0x84f   : > { %1915 = vmax.xlane.f32.xlu0 %v1914_v24 }
 0x852   : > { %v2744_v12 = vpop.eup %2743 }
 0x853   : > { %v1929_v13 = vsel %vm927_vm2, %v2744_v12, 0.0 }
 0x854   : > { %1930 = vadd.xlane.f32.xlu0 %v1929_v13 }
 0x8bc   : > { %v2669_v42 = vpop.permute.xlu1 %2668 }
 0x8bd   : > { %v2671_v46 = vunpack.i.h.bf16 %v2669_v42  ;;  %v2670_v48 = vunpack.i.l.bf16 %v2669_v42 }
 0x8bf   : > { %v2124_v55 = vsel %vm2122_vm3, %v2121_v49, %v2671_v46  ;;  %v2123_v56 = vsel %vm2122_vm3, %v2120_v52, %v2670_v48 }
 0x8dc   : > { %v1916_v14 = vpop.xlane.xlu0 %1915 }
 0x8dd   : > { %v1920_v15 = vsub.f32 %v1833_v10, %v1916_v14 }
 0x8df   : > { %v1922_v16 = vmul.f32 1.442695, %v1920_v15 }
 0x8e1   : > { %2745 = vpow2.f32 %v1922_v16  ;;  %v1931_v17 = vpop.xlane.xlu0 %1930 }
 0x8e2   : > { %2747 = vrcp.f32 %v1931_v17 }
 0x8eb   : > { %v2746_v18 = vpop.eup %2745 }
 0x8ec   : > { %v2748_v19 = vpop.eup %2747  ;;  %v1926_v20 = vsel %vm927_vm2, %v2746_v18, 0.0 }
 0x8ed   : > { %v1935_v21 = vmul.f32 %v2748_v19, %v2744_v12  ;;  %1927 = vadd.xlane.f32.xlu0 %v1926_v20 }
 0x8ef   : > { %2626 = vmatmul.mubr.msk.f32.vlgmr.msra.gmra.mrb[14].mxu1 %vm927_vm2, %v1935_v21 }
 0x903   : > { %1936 = vrot.lane.b32.xlu0 %v3017_v23, %s2764_s23  ;;  %v2710_v23 = vld [vmem:[%s3213_s8 + $0x8] sm:$0xff]  }
 0x97a   : > { %v1928_v22 = vpop.xlane.xlu0 %1927 }
 0x97b   : > { %2749 = vrcp.f32 %v1928_v22 }
 0x97e   : > { %v1937_v9 = vpop.permute.xlu0 %1936 }
 0x97f   : > { %2619 = vmatpush3.msra.mxu0 %v1937_v9 }
 0x980   : > { %2628 = vmatprep.subr.bf16.mxu0 %v2760_v37 }
 0x985   : > { %v2750_v25 = vpop.eup %2749 }
 0x986   : > { %v1934_v45 = vmul.f32 %v2750_v25, %v2746_v18 }
 0x988   : > { %2621 = vmatmul.mubr.msk.f32.vlgmr.msra.gmra.mrb[22].mxu0 %vm927_vm2, %v1934_v45 }
 0x989   : > { %2644 = vmatprep.mubr.msk.bf16.mxu0 %vm2761_vm0, %v2760_v37  ;;  %2629 = vmatpush3.bf16.msra.mxu0 %v2709_v27 }
 0x98a   : > { %2630 = vmatprep.subr.bf16.mxu0 %v2760_v37 }
 0x98d   : > { %2631 = vmatpush3.bf16.msra.mxu0 %v2710_v23 }
 0x98e   : > { %2632 = vmatprep.subr.bf16.mxu0 %v2760_v37 }
 0x991   : > { %2633 = vmatpush3.bf16.msra.mxu0 %v2711_v28 }
 0x992   : > { %2634 = vmatprep.subr.bf16.mxu0 %v2760_v37 }
 0x995   : > { %2635 = vmatpush3.bf16.msra.mxu0 %v2712_v51 }
 0x996   : > { %2636 = vmatprep.subr.bf16.mxu0 %v2760_v37 }
 0x999   : > { %2637 = vmatpush3.bf16.msra.mxu0 %v2713_v29 }
 0x99a   : > { %2638 = vmatprep.subr.bf16.mxu0 %v2760_v37 }
 0x99d   : > { %2639 = vmatpush3.bf16.msra.mxu0 %v2714_v30 }
 0x99e   : > { %2640 = vmatprep.subr.bf16.mxu0 %v2760_v37 }
 0x9a1   : > { %2641 = vmatpush3.bf16.msra.mxu0 %v2715_v31 }
 0x9a2   : > { %2642 = vmatprep.subr.bf16.mxu0 %v2760_v37 }
 0x9a5   : > { %2643 = vmatpush3.bf16.msra.mxu0 %v2716_v32 }
 0x9c2   : > { %v2084_v26 = vpop.f32.mrb[14].mxu1 }
 0x9c3   : > { %v2627_v50 = vpop.f32.mrb[15].mxu1 }
 0xa5b   : > { %v2008_v33 = vpop.f32.mrb[22].mxu0 }
 0xa5c   : > { %v2672_v38 = vpack.i.bf16 %v2084_v26, %v2008_v33  ;;  %v2622_v40 = vpop.f32.mrb[23].mxu0 }
 0xa5e   : > { %2673 = vrot.lane.b32.xlu0 %v2672_v38, %s2762_s25 }
 0xad0   : > { %v2674_v37 = vpop.permute.xlu0 %2673 }
 0xad1   : > { %v2676_v53 = vunpack.i.h.bf16 %v2674_v37  ;;  %v2675_v54 = vunpack.i.l.bf16 %v2674_v37 }
 0xad3   : > { %v2127_v57 = vsel %vm2125_vm4, %v2124_v55, %v2676_v53  ;;  %v2126_v47 = vsel %vm2125_vm4, %v2123_v56, %v2675_v54 }
 0xad4   : > { %v2128_v58 = vpack.c.bf16 %v2127_v57, %v2126_v47 }
 0xad6   : > { %2645 = vmatmul.mubr.bf16.vlgmr.msra.gmra.mrb[24].mxu0 %v2128_v58 }
 0xba9   : > { %v2234_v60 = vpop.f32.mrb[24].mxu0 }
 0xbaa   : > { %v2235_v61 = vadd.f32 %v2465_v59, %v2234_v60  ;;  %v2646_v62 = vpop.f32.mrb[25].mxu0 }
 0xbab   : > { %v2237_v36 = vpop.f32.mrb[26].mxu0 }
 0xbac   : > { %v2241_v39 = vadd.f32 %v2235_v61, %v2912_v34  ;;  %v2238_v63 = vadd.f32 %v2465_v59, %v2237_v36  ;;  %v2647_v0 = vpop.f32.mrb[27].mxu0 }
 0xbae   : > { %2243 = vst [vmem:[%s455_s15] sm:$0xff] %v2241_v39  ;;  %v2242_v1 = vadd.f32 %v2238_v63, %v2914_v35  ;;  %v2252_v2 = vmul.f32 %v2241_v39, %v2241_v39 }
 0xbb0   : > { %2244 = vst [vmem:[%s455_s15 + $0x8] sm:$0xff] %v2242_v1  ;;  %v2245_v3 = vadd.f32 %v2242_v1, %v2241_v39  ;;  %v2253_v4 = vmul.f32 %v2242_v1, %v2242_v1 }
 0xbb2   : > { %v2246_v5 = vrot.slane %v2245_v3, 4  ;;  %v2254_v6 = vadd.f32 %v2253_v4, %v2252_v2 }
 0xbb4   : > { %v2247_v7 = vadd.f32 %v2246_v5, %v2245_v3  ;;  %v2255_v8 = vrot.slane %v2254_v6, 4 }
 0xbb6   : > { %v2248_v10 = vrot.slane %v2247_v7, 2  ;;  %v2256_v11 = vadd.f32 %v2255_v8, %v2254_v6 }
 0xbb8   : > { %v2249_v24 = vadd.f32 %v2248_v10, %v2247_v7  ;;  %v2257_v34 = vrot.slane %v2256_v11, 2 }
 0xbba   : > { %v2250_v12 = vrot.slane %v2249_v24, 1  ;;  %v2258_v13 = vadd.f32 %v2257_v34, %v2256_v11 }
 0xbbc   : > { %v2259_v14 = vrot.slane %v2258_v13, 1  ;;  %v2251_v35 = vadd.f32 %v2250_v12, %v2249_v24 }
 0xbbe   : > { %v2260_v15 = vadd.f32 %v2259_v14, %v2258_v13 }
 0xbc0   : > { %v2262_v16 = vsel %vm2261_vm5, %v2251_v35, %v2260_v15 }
 0xbc1   : > { %2263 = vst [vmem:[%s467_s17] sm:$0x3] %v2262_v16 }
 0xbc2 PF: > { %s23_s21 = sadd.s32 1, %s2757_s21  }
 0xbc3   : > { %p20_p5 = scmp.ge.s32.totalorder %s23_s21, 6  }
 0xbc5   :  { %22 = sbr.rel (!%p20_p5) target bundleno = 1 (0x1), region = 117 }

// kernel: tsti_encoder_forward.9
= control target key start
LH: loop header
LB: loop body
LE: loop exit
PB: predicated region body
PF: predicated region fallthrough
CT: control target
= control target key end

     0   :  { %s3401_s0 = inlined_call_operand.vmem [shape: f32[8,8,128], index: 0, kind: input, shape index: {}]   ;;  %s3402_s1 = inlined_call_operand.vmem [shape: f32[8,4,8,8], index: 1, kind: input, shape index: {}]   ;;  %s3403_s2 = inlined_call_operand.vmem [shape: f32[1,128], index: 2, kind: input, shape index: {}]   ;;  %s3404_s3 = inlined_call_operand.vmem [shape: f32[1,128], index: 3, kind: input, shape index: {}]   ;;  %s3405_s4 = inlined_call_operand.vmem [shape: f32[1,128], index: 4, kind: input, shape index: {}]   ;;  %s3406_s5 = inlined_call_operand.vmem [shape: f32[1,128], index: 5, kind: input, shape index: {}]   ;;  %s3407_s6 = inlined_call_operand.vmem [shape: bf16[128,384], index: 6, kind: input, shape index: {}]   ;;  %s3408_s7 = inlined_call_operand.vmem [shape: f32[1,384], index: 7, kind: input, shape index: {}]   ;;  %s3409_s8 = inlined_call_operand.vmem [shape: bf16[128,128], index: 8, kind: input, shape index: {}]   ;;  %s3410_s9 = inlined_call_operand.vmem [shape: f32[1,128], index: 9, kind: input, shape index: {}]   ;;  %s3411_s10 = inlined_call_operand.vmem [shape: f32[8,8,128], index: 10, kind: output, shape index: {0}]   ;;  %s3412_s11 = inlined_call_operand.hbm [shape: f32[8,4,8,8], index: 11, kind: output, shape index: {1}]   ;;  %s3413_s12 = inlined_call_operand.vmem [shape: f32[4,2,128], index: 12, kind: output, shape index: {2}]  }
   0x1   :  { %3417 = sst [smem:[#allocation8_spill]] %s3404_s3 }
   0x2   :  { %18 = vsyncpa [#allocation3], 0 }
   0x3   :  { %20 = vsyncpa [#allocation3 + $0x1], 0  ;;  %s2939_s21 = smov 0   ;;  %s2941_s22 = smov 0  }
   0x4   :  { %s2943_s23 = smov 0   ;;  %s2945_s24 = smov 0  }
   0x5 LB: > { %3418 = sst [smem:[#allocation5_spill]] %s2859_s23  ;;  %s2960_s25 = sadd.s32 4294967295, %s2863_s24   ;;  %s2863_s24 = sphi %s2945_s24, %s3424_s24   ;;  %s2859_s23 = sphi %s2943_s23, %s3426_s23   ;;  %s2855_s22 = sphi %s2941_s22, %s3428_s22   ;;  %s2851_s21 = sphi %s2939_s21, %s3427_s21  }
   0x6   : > { %s2414_s26 = sadd.s32 4294967294, %s2863_s24   ;;  %s2964_s27 = sadd.s32 1, %s2863_s24  }
   0x7   : > { %3419 = sst [smem:[#allocation6_spill]] %s2964_s27  ;;  %s279_s28 = sadd.s32 1, %s2859_s23 }
   0x8   : > { %s276_s29 = ssub.s32 %s2863_s24, %s2964_s27  ;;  %p289_p0 = scmp.ne.s32.totalorder %s2859_s23, %s2855_s22 }
   0x9   : > { %p277_p1 = scmp.eq.s32.totalorder %s276_s29, 0  ;;  %p290_p2 = scmp.eq.s32.totalorder %s2960_s25, 3 }
   0xa   : > { %p295_p3 = scmp.ne.s32.totalorder %s2855_s22, %s2851_s21  ;;  %p296_p4 = scmp.eq.s32.totalorder %s2414_s26, 3 }
   0xb   : > { %s2975_s30 = scalar_select %p277_p1, %s2859_s23, %s279_s28  }
   0xc   : > { %p2977_p5 = por %p290_p2, %p289_p0  ;;  %p2981_p6 = por %p296_p4, %p295_p3 }
   0xd   : > { %3420 = sst [smem:[#allocation7_spill]] %s2975_s30  ;;  %p2417_p7 = scmp.ge.s32.totalorder %s2863_s24, 1 }
   0xe   : > { %p383_p8 = scmp.lt.s32.totalorder %s2863_s24, 5 }
  0x10   : > { %p384_p9 = pnand %p2417_p7, %p383_p8 }
  0x11   : > { %v2727_v0 = vld [vmem:[%s3407_s6 + $0x4] ss:$12 sps:$4 sm:$0xff] (!%p384_p9)   ;;  %v2729_v1 = vld [vmem:[%s3407_s6] ss:$12 sps:$4 sm:$0xff] (!%p384_p9)   ;;  %v2865_v2 = vmov (!%p384_p9), 0   ;;  %s2419_s19 = sshll.u32 (!%p384_p9), %s2960_s25, 1  ;;  %v482_v6 = vlaneseq (!%p384_p9) }
  0x12   : > { %387 = sbr.rel (%p384_p9) target bundleno = 3022 (0xbce), region = 60  ;;  %708 = vmatprep.mubr.bf16.mxu1 (!%p384_p9), %v2865_v2  ;;  %676 = vmatprep.subr.bf16.mxu1 (!%p384_p9), %v2727_v0  ;;  %v2730_v3 = vld [vmem:[%s3407_s6 + $0x1c] ss:$12 sps:$4 sm:$0xff] (!%p384_p9)   ;;  %v2732_v4 = vld [vmem:[%s3407_s6 + $0x18] ss:$12 sps:$4 sm:$0xff] (!%p384_p9)   ;;  %p441_p10 = scmp.lt.s32.totalorder (!%p384_p9), %s2419_s19, 7 }
  0x13   : > { %677 = vmatpush1.bf16.msra.mxu1 (!%p384_p9), %v2729_v1  ;;  %v2733_v5 = vld [vmem:[%s3407_s6 + $0x34] ss:$12 sps:$4 sm:$0xff] (!%p384_p9)   ;;  %v2735_v7 = vld [vmem:[%s3407_s6 + $0x30] ss:$12 sps:$4 sm:$0xff] (!%p384_p9)   ;;  %v2736_v8 = vld [vmem:[%s3407_s6 + $0x4c] ss:$12 sps:$4 sm:$0xff] (!%p384_p9)  }
  0x14   : > { %678 = vmatprep.subr.bf16.mxu1 (!%p384_p9), %v2730_v3  ;;  %v3011_v9 = vshrl.u32 (!%p384_p9), %v482_v6, 7  ;;  %v2738_v10 = vld [vmem:[%s3407_s6 + $0x48] ss:$12 sps:$4 sm:$0xff] (!%p384_p9)   ;;  %s3423_s3 = sld [smem:[#allocation8_spill]] (!%p384_p9)  ;;  %v2739_v12 = vld [vmem:[%s3407_s6 + $0x64] ss:$12 sps:$4 sm:$0xff] (!%p384_p9)  }
  0x15   : > { %v2741_v15 = vld [vmem:[%s3407_s6 + $0x60] ss:$12 sps:$4 sm:$0xff] (!%p384_p9)   ;;  %v2742_v16 = vld [vmem:[%s3407_s6 + $0x7c] ss:$12 sps:$4 sm:$0xff] (!%p384_p9)   ;;  %v2744_v17 = vld [vmem:[%s3407_s6 + $0x78] ss:$12 sps:$4 sm:$0xff] (!%p384_p9)  }
  0x16   : > { %v484_v14 = vsub.s32 (!%p384_p9), 0, %v3011_v9  ;;  %v2745_v18 = vld [vmem:[%s3407_s6 + $0x94] ss:$12 sps:$4 sm:$0xff] (!%p384_p9)   ;;  %v2747_v23 = vld [vmem:[%s3407_s6 + $0x90] ss:$12 sps:$4 sm:$0xff] (!%p384_p9)   ;;  %v2866_v37 = vmov (!%p384_p9), 0.0  }
  0x17   : > { %679 = vmatpush1.bf16.msra.mxu1 (!%p384_p9), %v2732_v4  ;;  %v470_v21 = vld [vmem:[%s3405_s4] sm:$0x1] (!%p384_p9)  ;;  %v2748_v25 = vld [vmem:[%s3407_s6 + $0xac] ss:$12 sps:$4 sm:$0xff] (!%p384_p9)   ;;  %v2750_v29 = vld [vmem:[%s3407_s6 + $0xa8] ss:$12 sps:$4 sm:$0xff] (!%p384_p9)   ;;  %2565 = vmatprep.subr.mxu0 (!%p384_p9), %v2866_v37 }
  0x18   : > { %680 = vmatprep.subr.bf16.mxu1 (!%p384_p9), %v2733_v5  ;;  %v2427_v22 = vld [vmem:[%s3403_s2] ss:$0 sm:$0xff] (!%p384_p9)  ;;  %vm2867_vm0 = vmmov (!%p384_p9), 0   ;;  %v539_v39 = vsub.s32 (!%p384_p9), 1, %v3011_v9  ;;  %vm770_vm1 = vcmask (!%p384_p9), 261120   ;;  %s2868_s28 = smov (!%p384_p9), 96  }
  0x19   : > { %s3430_s19 = smov (!%p441_p10, %s2419_s19), 7  ;;  %v2428_v31 = vld [vmem:[%s3406_s5] ss:$0 sm:$0xff]  ;;  %2567 = vmatprep.mubr.msk.f32.mxu0 %vm2867_vm0, %v2866_v37  ;;  %v2751_v52 = vld [vmem:[%s3407_s6 + $0x8] ss:$12 sps:$4 sm:$0xff]   ;;  %s431_s23 = sand.u32 1, %s2855_s22  }
  0x1a   : > { %v467_v11 = vld [vmem:[%s3423_s3] sm:$0x1]  ;;  %s2420_s20 = sshll.u32 %s3430_s19, 3  ;;  %v2753_v54 = vld [vmem:[%s3407_s6 + $0x38] ss:$12 sps:$4 sm:$0xff]   ;;  %s2418_s15 = sshll.u32 %s431_s23, 6 }
  0x1b   : > { %681 = vmatpush1.bf16.msra.mxu1 %v2735_v7  ;;  %v468_v13 = vadd.f32 1e-05, %v467_v11  ;;  %s444_s18 = scalar_lea.vmem %s3401_s0, %s2420_s20  ;;  %v3074_v38 = vld [vmem:[%s3408_s7] sm:$0x7]  ;;  %v2754_v55 = vld [vmem:[%s3407_s6 + $0x50] ss:$12 sps:$4 sm:$0xff]  }
  0x1c   : > { %682 = vmatprep.subr.bf16.mxu1 %v2736_v8  ;;  %v465_v19 = vld [vmem:[%s444_s18] sm:$0xff]  ;;  %v466_v20 = vld [vmem:[%s444_s18 + $0x8] sm:$0xff]  ;;  %v536_v40 = vrot.slane %v3074_v38, %v484_v14  ;;  %v540_v41 = vrot.slane %v3074_v38, %v539_v39  ;;  %v2758_v59 = vld [vmem:[%s3407_s6 + $0xb0] ss:$12 sps:$4 sm:$0xff]   ;;  %s2492_s18 = sshll.u32 %s3430_s19, 5  ;;  %vm923_vm2 = vcmask 64512  }
  0x1d   : > { %2767 = vrsqrt.f32 %v468_v13  ;;  %v479_v27 = vsub.f32 %v465_v19, %v2427_v22  ;;  %v480_v28 = vsub.f32 %v466_v20, %v2427_v22  ;;  %v2752_v53 = vld [vmem:[%s3407_s6 + $0x20] ss:$12 sps:$4 sm:$0xff]   ;;  %v2755_v56 = vld [vmem:[%s3407_s6 + $0x68] ss:$12 sps:$4 sm:$0xff]   ;;  %v2757_v58 = vld [vmem:[%s3407_s6 + $0x98] ss:$12 sps:$4 sm:$0xff]   ;;  %s3142_s29 = scalar_lea.vmem %s3402_s1, %s2492_s18 }
  0x1e   : > { %v2756_v57 = vld [vmem:[%s3407_s6 + $0x80] ss:$12 sps:$4 sm:$0xff]   ;;  %s3148_s3 = scalar_lea.vmem [#allocation2], %s2418_s15  ;;  %s2869_s27 = smov 64   ;;  %vm2118_vm3 = vcmask 523264   ;;  %vm2121_vm4 = vcmask 785408  }
  0x1f   : > { %683 = vmatpush1.bf16.msra.mxu1 %v2738_v10  ;;  %v762_v60 = vld [vmem:[%s3142_s29] sm:$0xff]  ;;  %s2870_s16 = smov 32   ;;  %s2288_s17 = sshll.u32 %s3148_s3, 4  ;;  %s3341_s17 = int_to_ptr.vmem [resolvable:$true] %s2288_s17 }
  0x20   : > { %684 = vmatprep.subr.bf16.mxu1 %v2739_v12  ;;  %v766_v0 = vld [vmem:[%s3142_s29 + $0x20] sm:$0xff]  ;;  %s2801_s15 = scalar_lea.vmem %s3341_s17, 1024 }
  0x21   : > { %p2802_p11 = scmp.ne.s32.totalorder %s3341_s17, %s2801_s15 }
  0x23   : > { %685 = vmatpush1.bf16.msra.mxu1 %v2741_v15  ;;  %p2803_p12 = pnand %p2802_p11, %p2977_p5 }
  0x24   : > { %686 = vmatprep.subr.bf16.mxu1 %v2742_v16 }
  0x25   : > { %p2804_p13 = pneg %p2803_p12 }
  0x27   : > { %687 = vmatpush1.bf16.msra.mxu1 %v2744_v17  ;;  %v2768_v24 = vpop.eup %2767  ;;  %v543_v17 = vsub.s32 2, %v3011_v9 }
  0x28   : > { %688 = vmatprep.subr.bf16.mxu1 %v2745_v18  ;;  %v471_v26 = vmul.f32 %v2768_v24, %v470_v21 }
  0x29   : > { %v544_v20 = vrot.slane %v3074_v38, %v543_v17 }
  0x2a   : > { %v485_v30 = vrot.slane %v471_v26, %v484_v14 }
  0x2b   : > { %689 = vmatpush1.bf16.msra.mxu1 %v2747_v23 }
  0x2c   : > { %690 = vmatprep.subr.bf16.mxu1 %v2748_v25  ;;  %v487_v32 = vmul.f32 %v485_v30, %v479_v27  ;;  %v488_v33 = vmul.f32 %v485_v30, %v480_v28 }
  0x2e   : > { %v3059_v34 = vadd.f32 %v2428_v31, %v487_v32  ;;  %v3061_v35 = vadd.f32 %v2428_v31, %v488_v33 }
  0x2f   : > { %691 = vmatpush1.bf16.msra.mxu1 %v2750_v29 }
  0x30   : > { %v498_v36 = vpack.c.bf16 %v3061_v35, %v3059_v34  ;;  %2545 = vmatprep.subr.bf16.mxu1 %v2866_v37 }
  0x32   : > { %709 = vmatmul.mubr.bf16.vlgmr.msra.gmra.mrb[0].mxu1 %v498_v36 }
  0x33   : > { %2561 = vmatprep.mubr.msk.bf16.mxu1 %vm2867_vm0, %v2866_v37  ;;  %2546 = vmatpush3.bf16.msra.mxu1 %v2751_v52 }
  0x34   : > { %2547 = vmatprep.subr.bf16.mxu1 %v2866_v37 }
  0x37   : > { %2548 = vmatpush3.bf16.msra.mxu1 %v2752_v53 }
  0x38   : > { %2549 = vmatprep.subr.bf16.mxu1 %v2866_v37 }
  0x3b   : > { %2550 = vmatpush3.bf16.msra.mxu1 %v2753_v54 }
  0x3c   : > { %2551 = vmatprep.subr.bf16.mxu1 %v2866_v37 }
  0x3f   : > { %2552 = vmatpush3.bf16.msra.mxu1 %v2754_v55 }
  0x40   : > { %2553 = vmatprep.subr.bf16.mxu1 %v2866_v37 }
  0x43   : > { %2554 = vmatpush3.bf16.msra.mxu1 %v2755_v56 }
  0x44   : > { %2555 = vmatprep.subr.bf16.mxu1 %v2866_v37 }
  0x47   : > { %2556 = vmatpush3.bf16.msra.mxu1 %v2756_v57 }
  0x48   : > { %2557 = vmatprep.subr.bf16.mxu1 %v2866_v37 }
  0x4b   : > { %2558 = vmatpush3.bf16.msra.mxu1 %v2757_v58 }
  0x4c   : > { %2559 = vmatprep.subr.bf16.mxu1 %v2866_v37 }
  0x4f   : > { %2560 = vmatpush3.bf16.msra.mxu1 %v2758_v59 }
  0x50   : > { %2610 = vmatprep.subr.mxu1 %v2866_v37 }
  0x52   : > { %2562 = vmatmul.mubr.bf16.vlgmr.msra.gmra.mrb[4].mxu1 %v498_v36 }
  0x53   : > { %2612 = vmatprep.mubr.msk.f32.mxu1 %vm2867_vm0, %v2866_v37 }
 0x105   : > { %v710_v42 = vpop.f32.mrb[0].mxu1 }
 0x106   : > { %v711_v43 = vadd.f32 %v710_v42, %v536_v40  ;;  %v712_v44 = vpop.f32.mrb[1].mxu1 }
 0x107   : > { %v3079_v45 = vadd.f32 %v712_v44, %v540_v41  ;;  %v714_v46 = vpop.f32.mrb[2].mxu1 }
 0x108   : > { %v3081_v47 = vmul.f32 0.17677669, %v711_v43  ;;  %v715_v48 = vadd.f32 %v714_v46, %v536_v40  ;;  %v716_v49 = vpop.f32.mrb[3].mxu1  ;;  %v767_v46 = vld [vmem:[%s3142_s29 + $0x28] sm:$0xff] }
 0x109   : > { %2566 = vmatpush3.xpose.msk.msra.mxu0 %vm770_vm1, %v3079_v45  ;;  %v3088_v50 = vadd.f32 %v716_v49, %v540_v41  ;;  %v763_v41 = vld [vmem:[%s3142_s29 + $0x8] sm:$0xff] }
 0x10a   : > { %1092 = vrot.lane.b32.xlu1 %v3081_v47, %s2868_s28  ;;  %2570 = vmatprep.subr.mxu0 %v2866_v37  ;;  %v3096_v51 = vmul.f32 0.17677669, %v715_v48 }
 0x10c   : > { %2568 = vmatmul.mubr.msk.f32.vlgmr.msra.gmra.mrb[0].mxu0 %vm770_vm1, %v3081_v47 }
 0x10d   : > { %2571 = vmatpush3.xpose.msk.msra.mxu0 %vm770_vm1, %v3088_v50  ;;  %2572 = vmatprep.mubr.msk.f32.mxu0 %vm2867_vm0, %v2866_v37 }
 0x10e   : > { %2575 = vmatprep.subr.mxu0 %v2866_v37 }
 0x110   : > { %2573 = vmatmul.mubr.msk.f32.vlgmr.msra.gmra.mrb[2].mxu0 %vm770_vm1, %v3096_v51 }
 0x111   : > { %2577 = vmatprep.mubr.msk.f32.mxu0 %vm2867_vm0, %v2866_v37 }
 0x125   : > { %v753_v18 = vpop.f32.mrb[4].mxu1 }
 0x126   : > { %v2563_v19 = vpop.f32.mrb[5].mxu1  ;;  %v3164_v23 = vadd.f32 %v753_v18, %v544_v20 }
 0x127   : > { %v756_v21 = vpop.f32.mrb[6].mxu1 }
 0x128   : > { %v2564_v22 = vpop.f32.mrb[7].mxu1  ;;  %v3166_v24 = vadd.f32 %v756_v21, %v544_v20  ;;  %2576 = vmatpush3.msra.mxu0 %v3164_v23 }
 0x129   : > { %2580 = vmatprep.subr.mxu0 %v2866_v37 }
 0x17c   : > { %v1093_v9 = vpop.permute.xlu1 %1092 }
 0x1df   : > { %v843_v61 = vpop.f32.mrb[0].mxu0 }
 0x1e0   : > { %v844_v62 = vadd.f32 %v843_v61, %v762_v60  ;;  %v2569_v63 = vpop.f32.mrb[1].mxu0 }
 0x1e2   : > { %2084 = vst.msk [vmem:[%s3148_s3] sm:$0xff] %vm923_vm2, %v844_v62  ;;  %v924_v1 = vsel %vm923_vm2, %v844_v62, -inf }
 0x1e3   : > { %925 = vmax.xlane.f32.xlu0 %v924_v1  ;;  %v919_v2 = vpop.f32.mrb[2].mxu0 }
 0x1e4   : > { %v920_v3 = vadd.f32 %v919_v2, %v766_v0  ;;  %v2574_v4 = vpop.f32.mrb[3].mxu0 }
 0x1e6   : > { %2088 = vst.msk [vmem:[%s3148_s3 + $0x20] sm:$0xff] %vm923_vm2, %v920_v3  ;;  %v927_v5 = vsel %vm923_vm2, %v920_v3, -inf }
 0x1e7   : > { %928 = vmax.xlane.f32.xlu0 %v927_v5 }
 0x1fd   : > { %1094 = vrot.lane.b32.xlu0 %v3079_v45, %s2868_s28 }
 0x270   : > { %v926_v6 = vpop.xlane.xlu0 %925 }
 0x271   : > { %v930_v7 = vsub.f32 %v844_v62, %v926_v6 }
 0x273   : > { %v932_v8 = vmul.f32 1.442695, %v930_v7 }
 0x274   : > { %v929_v10 = vpop.xlane.xlu0 %928 }
 0x275   : > { %2769 = vpow2.f32 %v932_v8  ;;  %v931_v11 = vsub.f32 %v920_v3, %v929_v10 }
 0x277   : > { %v934_v12 = vmul.f32 1.442695, %v931_v11 }
 0x278   : > { %v1095_v31 = vpop.permute.xlu0 %1094 }
 0x279   : > { %2771 = vpow2.f32 %v934_v12 }
 0x27f   : > { %v2770_v13 = vpop.eup %2769 }
 0x280   : > { %v936_v14 = vsel %vm923_vm2, %v2770_v13, 0.0 }
 0x281   : > { %937 = vadd.xlane.f32.xlu1 %v936_v14  ;;  %v768_v14 = vld [vmem:[%s3142_s29 + $0x30] sm:$0xff] }
 0x283   : > { %v2772_v15 = vpop.eup %2771 }
 0x284   : > { %v939_v16 = vsel %vm923_vm2, %v2772_v15, 0.0 }
 0x285   : > { %940 = vadd.xlane.f32.xlu1 %v939_v16 }
 0x296   : > { %1172 = vrot.lane.b32.xlu1 %v3088_v50, %s2868_s28 }
 0x29a   : > { %1170 = vrot.lane.b32.xlu1 %v3096_v51, %s2868_s28 }
 0x30e   : > { %v938_v25 = vpop.xlane.xlu1 %937 }
 0x30f   : > { %2773 = vrcp.f32 %v938_v25 }
 0x312   : > { %v941_v26 = vpop.xlane.xlu1 %940 }
 0x313   : > { %2775 = vrcp.f32 %v941_v26 }
 0x316   : > { %v1173_v32 = vpop.permute.xlu1 %1172 }
 0x319   : > { %v2774_v27 = vpop.eup %2773 }
 0x31a   : > { %v944_v28 = vmul.f32 %v2774_v27, %v2770_v13  ;;  %v1171_v33 = vpop.permute.xlu1 %1170 }
 0x31c   : > { %2578 = vmatmul.mubr.msk.f32.vlgmr.msra.gmra.mrb[4].mxu0 %vm923_vm2, %v944_v28 }
 0x31d   : > { %v2776_v29 = vpop.eup %2775  ;;  %2581 = vmatpush3.msra.mxu0 %v3166_v24  ;;  %2582 = vmatprep.mubr.msk.f32.mxu0 %vm2867_vm0, %v2866_v37 }
 0x31e   : > { %v945_v30 = vmul.f32 %v2776_v29, %v2772_v15  ;;  %2585 = vmatprep.subr.mxu0 %v2866_v37 }
 0x320   : > { %2583 = vmatmul.mubr.msk.f32.vlgmr.msra.gmra.mrb[6].mxu0 %vm923_vm2, %v945_v30 }
 0x321   : > { %2587 = vmatprep.mubr.msk.f32.mxu0 %vm2867_vm0, %v2866_v37 }
 0x324   : > { %2586 = vmatpush3.xpose.msk.msra.mxu0 %vm770_vm1, %v1095_v31 }
 0x325   : > { %2590 = vmatprep.subr.mxu0 %v2866_v37 }
 0x327   : > { %2588 = vmatmul.mubr.msk.f32.vlgmr.msra.gmra.mrb[8].mxu0 %vm770_vm1, %v1093_v9 }
 0x328   : > { %2591 = vmatpush3.xpose.msk.msra.mxu0 %vm770_vm1, %v1173_v32  ;;  %2592 = vmatprep.mubr.msk.f32.mxu0 %vm2867_vm0, %v2866_v37 }
 0x329   : > { %2595 = vmatprep.subr.mxu0 %v2866_v37 }
 0x32b   : > { %2593 = vmatmul.mubr.msk.f32.vlgmr.msra.gmra.mrb[10].mxu0 %vm770_vm1, %v1171_v33 }
 0x32c   : > { %2597 = vmatprep.mubr.msk.f32.mxu0 %vm2867_vm0, %v2866_v37 }
 0x3ef   : > { %v3190_v36 = vpop.f32.mrb[4].mxu0 }
 0x3f0   : > { %v2579_v38 = vpop.f32.mrb[5].mxu0 }
 0x3f3   : > { %v3192_v39 = vpop.f32.mrb[6].mxu0 }
 0x3f4   : > { %v2584_v40 = vpop.f32.mrb[7].mxu0 }
 0x3fa   : > { %v1166_v42 = vpop.f32.mrb[8].mxu0 }
 0x3fb   : > { %v1167_v43 = vadd.f32 %v1166_v42, %v763_v41  ;;  %v2589_v44 = vpop.f32.mrb[9].mxu0 }
 0x3fd   : > { %2085 = vst.msk [vmem:[%s3148_s3 + $0x8] sm:$0xff] %vm923_vm2, %v1167_v43  ;;  %v1248_v48 = vsel %vm923_vm2, %v1167_v43, -inf }
 0x3fe   : > { %1249 = vmax.xlane.f32.xlu0 %v1248_v48  ;;  %v1244_v49 = vpop.f32.mrb[10].mxu0 }
 0x3ff   : > { %v1245_v52 = vadd.f32 %v1244_v49, %v767_v46  ;;  %v2594_v53 = vpop.f32.mrb[11].mxu0 }
 0x401   : > { %2089 = vst.msk [vmem:[%s3148_s3 + $0x28] sm:$0xff] %vm923_vm2, %v1245_v52  ;;  %v1251_v54 = vsel %vm923_vm2, %v1245_v52, -inf }
 0x402   : > { %1252 = vmax.xlane.f32.xlu1 %v1251_v54 }
 0x413   : > { %1348 = vrot.lane.b32.xlu1 %v3166_v24, %s2868_s28 }
 0x417   : > { %1426 = vrot.lane.b32.xlu1 %v3079_v45, %s2869_s27 }
 0x41b   : > { %1504 = vrot.lane.b32.xlu1 %v3088_v50, %s2869_s27 }
 0x41f   : > { %1502 = vrot.lane.b32.xlu1 %v3096_v51, %s2869_s27 }
 0x48b   : > { %v1250_v55 = vpop.xlane.xlu0 %1249 }
 0x48c   : > { %v1254_v56 = vsub.f32 %v1167_v43, %v1250_v55 }
 0x48e   : > { %v1256_v57 = vmul.f32 1.442695, %v1254_v56 }
 0x48f   : > { %v1253_v58 = vpop.xlane.xlu1 %1252 }
 0x490   : > { %2777 = vpow2.f32 %v1256_v57  ;;  %v1255_v1 = vsub.f32 %v1245_v52, %v1253_v58 }
 0x492   : > { %v1258_v2 = vmul.f32 1.442695, %v1255_v1 }
 0x493   : > { %v1349_v59 = vpop.permute.xlu1 %1348 }
 0x494   : > { %2779 = vpow2.f32 %v1258_v2 }
 0x497   : > { %v1427_v60 = vpop.permute.xlu1 %1426 }
 0x49a   : > { %v2778_v61 = vpop.eup %2777 }
 0x49b   : > { %v1505_v62 = vpop.permute.xlu1 %1504  ;;  %v1260_v63 = vsel %vm923_vm2, %v2778_v61, 0.0 }
 0x49c   : > { %1261 = vadd.xlane.f32.xlu0 %v1260_v63  ;;  %2611 = vmatpush3.xpose.msk.msra.mxu1 %vm770_vm1, %v1505_v62 }
 0x49d   : > { %2620 = vmatprep.subr.mxu1 %v2866_v37 }
 0x49e   : > { %v2780_v3 = vpop.eup %2779 }
 0x49f   : > { %v1503_v0 = vpop.permute.xlu1 %1502  ;;  %v1263_v4 = vsel %vm923_vm2, %v2780_v3, 0.0 }
 0x4a0   : > { %2613 = vmatmul.mubr.msk.f32.vlgmr.msra.gmra.mrb[8].mxu1 %vm770_vm1, %v1503_v0 }
 0x4a1   : > { %2622 = vmatprep.mubr.msk.f32.mxu1 %vm2867_vm0, %v2866_v37 }
 0x4b2   : > { %1271 = vrot.lane.b32.xlu0 %v3164_v23, %s2868_s28 }
 0x4d1   : > { %1264 = vadd.xlane.f32.xlu0 %v1263_v4 }
 0x4e7   : > { %1424 = vrot.lane.b32.xlu0 %v3081_v47, %s2869_s27 }
 0x529   : > { %v1262_v5 = vpop.xlane.xlu0 %1261 }
 0x52a   : > { %2781 = vrcp.f32 %v1262_v5 }
 0x52d   : > { %v1272_v6 = vpop.permute.xlu0 %1271 }
 0x52e   : > { %2596 = vmatpush3.msra.mxu0 %v1272_v6 }
 0x52f   : > { %2600 = vmatprep.subr.mxu0 %v2866_v37 }
 0x534   : > { %v2782_v7 = vpop.eup %2781 }
 0x535   : > { %v1268_v8 = vmul.f32 %v2782_v7, %v2778_v61  ;;  %v765_v7 = vld [vmem:[%s3142_s29 + $0x18] sm:$0xff] }
 0x537   : > { %2598 = vmatmul.mubr.msk.f32.vlgmr.msra.gmra.mrb[12].mxu0 %vm923_vm2, %v1268_v8 }
 0x538   : > { %2601 = vmatpush3.msra.mxu0 %v1349_v59  ;;  %2602 = vmatprep.mubr.msk.f32.mxu0 %vm2867_vm0, %v2866_v37  ;;  %v769_v59 = vld [vmem:[%s3142_s29 + $0x38] sm:$0xff] }
 0x539   : > { %2605 = vmatprep.subr.mxu0 %v2866_v37 }
 0x55e   : > { %v1265_v10 = vpop.xlane.xlu0 %1264 }
 0x55f   : > { %2783 = vrcp.f32 %v1265_v10 }
 0x562   : > { %v1425_v13 = vpop.permute.xlu0 %1424 }
 0x569   : > { %v2784_v11 = vpop.eup %2783 }
 0x56a   : > { %v1269_v12 = vmul.f32 %v2784_v11, %v2780_v3 }
 0x56c   : > { %2603 = vmatmul.mubr.msk.f32.vlgmr.msra.gmra.mrb[14].mxu0 %vm923_vm2, %v1269_v12 }
 0x56d   : > { %2606 = vmatpush3.xpose.msk.msra.mxu0 %vm770_vm1, %v1427_v60  ;;  %2607 = vmatprep.mubr.msk.f32.mxu0 %vm2867_vm0, %v2866_v37 }
 0x56e   : > { %2615 = vmatprep.subr.mxu0 %v2866_v37 }
 0x570   : > { %2608 = vmatmul.mubr.msk.f32.vlgmr.msra.gmra.mrb[16].mxu0 %vm770_vm1, %v1425_v13 }
 0x571   : > { %2617 = vmatprep.mubr.msk.f32.mxu0 %vm2867_vm0, %v2866_v37 }
 0x573   : > { %v1576_v15 = vpop.f32.mrb[8].mxu1 }
 0x574   : > { %v1577_v16 = vadd.f32 %v1576_v15, %v768_v14  ;;  %v2614_v17 = vpop.f32.mrb[9].mxu1 }
 0x576   : > { %2090 = vst.msk [vmem:[%s3148_s3 + $0x30] sm:$0xff] %vm923_vm2, %v1577_v16  ;;  %v1583_v18 = vsel %vm923_vm2, %v1577_v16, -inf }
 0x577   : > { %1584 = vmax.xlane.f32.xlu1 %v1583_v18 }
 0x588   : > { %1678 = vrot.lane.b32.xlu1 %v3166_v24, %s2869_s27 }
 0x58c   : > { %1756 = vrot.lane.b32.xlu1 %v3079_v45, %s2870_s16 }
 0x590   : > { %1834 = vrot.lane.b32.xlu1 %v3088_v50, %s2870_s16  ;;  %v764_v50 = vld [vmem:[%s3142_s29 + $0x10] sm:$0xff]  ;;  %s3345_s29 = scalar_lea.sflag [#allocation3], %s431_s23 }
 0x594   : > { %1832 = vrot.lane.b32.xlu1 %v3096_v51, %s2870_s16 }
 0x604   : > { %v1585_v19 = vpop.xlane.xlu1 %1584 }
 0x605   : > { %v1587_v9 = vsub.f32 %v1577_v16, %v1585_v19 }
 0x607   : > { %v1590_v25 = vmul.f32 1.442695, %v1587_v9 }
 0x608   : > { %v1679_v20 = vpop.permute.xlu1 %1678 }
 0x609   : > { %2621 = vmatpush3.msra.mxu1 %v1679_v20  ;;  %2785 = vpow2.f32 %v1590_v25 }
 0x60a   : > { %v3246_v21 = vpop.f32.mrb[12].mxu0  ;;  %2630 = vmatprep.subr.mxu1 %v2866_v37 }
 0x60b   : > { %v2599_v22 = vpop.f32.mrb[13].mxu0 }
 0x60c   : > { %v1757_v43 = vpop.permute.xlu1 %1756 }
 0x610   : > { %v1835_v48 = vpop.permute.xlu1 %1834 }
 0x613   : > { %v2786_v31 = vpop.eup %2785 }
 0x614   : > { %v1595_v32 = vsel %vm923_vm2, %v2786_v31, 0.0  ;;  %v1833_v53 = vpop.permute.xlu1 %1832 }
 0x63f   : > { %v1420_v26 = vpop.f32.mrb[14].mxu0 }
 0x640   : > { %v2712_v45 = vpack.i.bf16 %v1420_v26, %v3246_v21  ;;  %v2604_v27 = vpop.f32.mrb[15].mxu0 }
 0x643   : > { %v1498_v28 = vpop.f32.mrb[16].mxu0 }
 0x644   : > { %v1499_v29 = vadd.f32 %v1498_v28, %v764_v50  ;;  %v2609_v51 = vpop.f32.mrb[17].mxu0  ;;  %v2759_v50 = vld [vmem:[%s3409_s8] sm:$0xff]   ;;  %v2761_v28 = vld [vmem:[%s3409_s8 + $0x10] sm:$0xff]  }
 0x645   : > { %v2763_v51 = vld [vmem:[%s3409_s8 + $0x20] sm:$0xff]  }
 0x646   : > { %2086 = vst.msk [vmem:[%s3148_s3 + $0x10] sm:$0xff] %vm923_vm2, %v1499_v29  ;;  %v1580_v30 = vsel %vm923_vm2, %v1499_v29, -inf }
 0x647   : > { %1581 = vmax.xlane.f32.xlu0 %v1580_v30  ;;  %v2764_v30 = vld [vmem:[%s3409_s8 + $0x28] sm:$0xff]  }
 0x64b   : > { %1596 = vadd.xlane.f32.xlu0 %v1595_v32  ;;  %v2766_v32 = vld [vmem:[%s3409_s8 + $0x38] sm:$0xff]  }
 0x661   : > { %1602 = vrot.lane.b32.xlu0 %v3164_v23, %s2869_s27 }
 0x6d4   : > { %v1582_v33 = vpop.xlane.xlu0 %1581 }
 0x6d5   : > { %v1586_v38 = vsub.f32 %v1499_v29, %v1582_v33  ;;  %v2762_v29 = vld [vmem:[%s3409_s8 + $0x18] sm:$0xff]  }
 0x6d7   : > { %v1588_v40 = vmul.f32 1.442695, %v1586_v38 }
 0x6d8   : > { %v1597_v41 = vpop.xlane.xlu0 %1596 }
 0x6d9   : > { %2787 = vpow2.f32 %v1588_v40 }
 0x6da   : > { %2789 = vrcp.f32 %v1597_v41 }
 0x6dc   : > { %v1603_v42 = vpop.permute.xlu0 %1602 }
 0x6dd   : > { %2616 = vmatpush3.msra.mxu0 %v1603_v42 }
 0x6de   : > { %2625 = vmatprep.subr.mxu0 %v2866_v37 }
 0x6e3   : > { %v2788_v44 = vpop.eup %2787 }
 0x6e4   : > { %v2790_v46 = vpop.eup %2789  ;;  %v1592_v49 = vsel %vm923_vm2, %v2788_v44, 0.0 }
 0x6e5   : > { %v1601_v52 = vmul.f32 %v2790_v46, %v2786_v31  ;;  %1593 = vadd.xlane.f32.xlu0 %v1592_v49  ;;  %v2765_v31 = vld [vmem:[%s3409_s8 + $0x30] sm:$0xff]  }
 0x6e7   : > { %2623 = vmatmul.mubr.msk.f32.vlgmr.msra.gmra.mrb[10].mxu1 %vm923_vm2, %v1601_v52 }
 0x6e8   : > { %2631 = vmatpush3.xpose.msk.msra.mxu1 %vm770_vm1, %v1835_v48  ;;  %2632 = vmatprep.mubr.msk.f32.mxu1 %vm2867_vm0, %v2866_v37 }
 0x6e9   : > { %2640 = vmatprep.subr.mxu1 %v2866_v37 }
 0x6eb   : > { %2633 = vmatmul.mubr.msk.f32.vlgmr.msra.gmra.mrb[12].mxu1 %vm770_vm1, %v1833_v53 }
 0x6ec   : > { %2642 = vmatprep.mubr.msk.f32.mxu1 %vm2867_vm0, %v2866_v37 }
 0x6fb   : > { %1754 = vrot.lane.b32.xlu0 %v3081_v47, %s2870_s16 }
 0x772   : > { %v1594_v54 = vpop.xlane.xlu0 %1593 }
 0x773   : > { %2791 = vrcp.f32 %v1594_v54 }
 0x776   : > { %v1755_v57 = vpop.permute.xlu0 %1754 }
 0x77d   : > { %v2792_v55 = vpop.eup %2791 }
 0x77e   : > { %v1600_v56 = vmul.f32 %v2792_v55, %v2788_v44 }
 0x780   : > { %2618 = vmatmul.mubr.msk.f32.vlgmr.msra.gmra.mrb[18].mxu0 %vm923_vm2, %v1600_v56 }
 0x781   : > { %2626 = vmatpush3.xpose.msk.msra.mxu0 %vm770_vm1, %v1757_v43  ;;  %2627 = vmatprep.mubr.msk.f32.mxu0 %vm2867_vm0, %v2866_v37 }
 0x782   : > { %2635 = vmatprep.subr.mxu0 %v2866_v37 }
 0x784   : > { %2628 = vmatmul.mubr.msk.f32.vlgmr.msra.gmra.mrb[20].mxu0 %vm770_vm1, %v1755_v57 }
 0x785   : > { %2637 = vmatprep.mubr.msk.f32.mxu0 %vm2867_vm0, %v2866_v37 }
 0x7ba   : > { %v1750_v47 = vpop.f32.mrb[10].mxu1 }
 0x7bb   : > { %v2624_v58 = vpop.f32.mrb[11].mxu1 }
 0x7be   : > { %v1906_v60 = vpop.f32.mrb[12].mxu1 }
 0x7bf   : > { %v1907_v61 = vadd.f32 %v1906_v60, %v769_v59  ;;  %v2634_v62 = vpop.f32.mrb[13].mxu1 }
 0x7c1   : > { %2091 = vst.msk [vmem:[%s3148_s3 + $0x38] sm:$0xff] %vm923_vm2, %v1907_v61  ;;  %v1913_v63 = vsel %vm923_vm2, %v1907_v61, -inf }
 0x7c2   : > { %1914 = vmax.xlane.f32.xlu1 %v1913_v63 }
 0x7d3   : > { %2008 = vrot.lane.b32.xlu1 %v3166_v24, %s2870_s16 }
 0x7d7   : > { %2713 = vrot.lane.b32.xlu1 %v2712_v45, %s2870_s16 }
 0x84f   : > { %v1915_v0 = vpop.xlane.xlu1 %1914 }
 0x850   : > { %v1917_v1 = vsub.f32 %v1907_v61, %v1915_v0 }
 0x852   : > { %v1920_v2 = vmul.f32 1.442695, %v1917_v1 }
 0x853   : > { %v2009_v3 = vpop.permute.xlu1 %2008  ;;  %v1674_v4 = vpop.f32.mrb[18].mxu0 }
 0x854   : > { %2793 = vpow2.f32 %v1920_v2  ;;  %v2717_v5 = vpack.i.bf16 %v1750_v47, %v1674_v4  ;;  %2641 = vmatpush3.msra.mxu1 %v2009_v3  ;;  %v2619_v6 = vpop.f32.mrb[19].mxu0 }
 0x856   : > { %2718 = vrot.lane.b32.xlu1 %v2717_v5, %s2869_s27  ;;  %s2871_s27 = smov [#allocation2]  }
 0x857   : > { %v1828_v8 = vpop.f32.mrb[20].mxu0  ;;  %v2714_v41 = vpop.permute.xlu1 %2713 }
 0x858   : > { %v1829_v10 = vadd.f32 %v1828_v8, %v765_v7  ;;  %v2629_v11 = vpop.f32.mrb[21].mxu0  ;;  %v2716_v43 = vunpack.i.h.bf16 %v2714_v41  ;;  %v2715_v44 = vunpack.i.l.bf16 %v2714_v41 }
 0x85a   : > { %2087 = vst.msk [vmem:[%s3148_s3 + $0x18] sm:$0xff] %vm923_vm2, %v1829_v10  ;;  %v1910_v24 = vsel %vm923_vm2, %v1829_v10, -inf  ;;  %v2117_v49 = vsel %vm770_vm1, %v3192_v39, %v2716_v43  ;;  %v2116_v52 = vsel %vm770_vm1, %v3190_v36, %v2715_v44  ;;  %s2805_s3 = sshll.u32 %s2871_s27, 4  ;;  %s2806_s3 = int_to_ptr.vmem [resolvable:$false] %s2805_s3 }
 0x85b   : > { %1911 = vmax.xlane.f32.xlu0 %v1910_v24  ;;  %p2808_p0 = scmp.lt.s32.totalorder %s3341_s17, %s2806_s3 }
 0x85e   : > { %v2794_v12 = vpop.eup %2793 }
 0x85f   : > { %v1925_v13 = vsel %vm923_vm2, %v2794_v12, 0.0 }
 0x860   : > { %1926 = vadd.xlane.f32.xlu0 %v1925_v13 }
 0x8c8   : > { %v2719_v42 = vpop.permute.xlu1 %2718 }
 0x8c9   : > { %v2721_v46 = vunpack.i.h.bf16 %v2719_v42  ;;  %v2720_v48 = vunpack.i.l.bf16 %v2719_v42 }
 0x8cb   : > { %v2120_v55 = vsel %vm2118_vm3, %v2117_v49, %v2721_v46  ;;  %v2119_v56 = vsel %vm2118_vm3, %v2116_v52, %v2720_v48 }
 0x8e8   : > { %v1912_v14 = vpop.xlane.xlu0 %1911 }
 0x8e9   : > { %v1916_v15 = vsub.f32 %v1829_v10, %v1912_v14 }
 0x8eb   : > { %v1918_v16 = vmul.f32 1.442695, %v1916_v15 }
 0x8ed   : > { %2795 = vpow2.f32 %v1918_v16  ;;  %v1927_v17 = vpop.xlane.xlu0 %1926 }
 0x8ee   : > { %2797 = vrcp.f32 %v1927_v17 }
 0x8f7   : > { %v2796_v18 = vpop.eup %2795 }
 0x8f8   : > { %v2798_v19 = vpop.eup %2797  ;;  %v1922_v20 = vsel %vm923_vm2, %v2796_v18, 0.0 }
 0x8f9   : > { %v1931_v21 = vmul.f32 %v2798_v19, %v2794_v12  ;;  %1923 = vadd.xlane.f32.xlu0 %v1922_v20 }
 0x8fb   : > { %2643 = vmatmul.mubr.msk.f32.vlgmr.msra.gmra.mrb[14].mxu1 %vm923_vm2, %v1931_v21 }
 0x90f   : > { %1932 = vrot.lane.b32.xlu0 %v3164_v23, %s2870_s16  ;;  %v2760_v23 = vld [vmem:[%s3409_s8 + $0x8] sm:$0xff]   ;;  %s2807_s16 = scalar_lea.vmem %s2806_s3, 2048 }
 0x910   : > { %p2809_p1 = scmp.lt.s32.totalorder %s2807_s16, %s2801_s15 }
 0x912   : > { %p2810_p2 = por %p2809_p1, %p2808_p0 }
 0x914   : > { %p2811_p3 = pnand %p2810_p2, %p2804_p13 }
 0x986   : > { %v1924_v22 = vpop.xlane.xlu0 %1923 }
 0x987   : > { %2799 = vrcp.f32 %v1924_v22 }
 0x98a   : > { %v1933_v9 = vpop.permute.xlu0 %1932 }
 0x98b   : > { %2636 = vmatpush3.msra.mxu0 %v1933_v9 }
 0x98c   : > { %2645 = vmatprep.subr.bf16.mxu0 %v2866_v37 }
 0x991   : > { %v2800_v25 = vpop.eup %2799 }
 0x992   : > { %v1930_v26 = vmul.f32 %v2800_v25, %v2796_v18 }
 0x994   : > { %2638 = vmatmul.mubr.msk.f32.vlgmr.msra.gmra.mrb[22].mxu0 %vm923_vm2, %v1930_v26 }
 0x995   : > { %2661 = vmatprep.mubr.msk.bf16.mxu0 %vm2867_vm0, %v2866_v37  ;;  %2646 = vmatpush3.bf16.msra.mxu0 %v2759_v50 }
 0x996   : > { %2647 = vmatprep.subr.bf16.mxu0 %v2866_v37 }
 0x999   : > { %2648 = vmatpush3.bf16.msra.mxu0 %v2760_v23 }
 0x99a   : > { %2649 = vmatprep.subr.bf16.mxu0 %v2866_v37 }
 0x99d   : > { %2650 = vmatpush3.bf16.msra.mxu0 %v2761_v28 }
 0x99e   : > { %2651 = vmatprep.subr.bf16.mxu0 %v2866_v37 }
 0x9a1   : > { %2652 = vmatpush3.bf16.msra.mxu0 %v2762_v29 }
 0x9a2   : > { %2653 = vmatprep.subr.bf16.mxu0 %v2866_v37 }
 0x9a5   : > { %2654 = vmatpush3.bf16.msra.mxu0 %v2763_v51 }
 0x9a6   : > { %2655 = vmatprep.subr.bf16.mxu0 %v2866_v37 }
 0x9a9   : > { %2656 = vmatpush3.bf16.msra.mxu0 %v2764_v30 }
 0x9aa   : > { %2657 = vmatprep.subr.bf16.mxu0 %v2866_v37 }
 0x9ad   : > { %2658 = vmatpush3.bf16.msra.mxu0 %v2765_v31 }
 0x9ae   : > { %2659 = vmatprep.subr.bf16.mxu0 %v2866_v37 }
 0x9b1   : > { %2660 = vmatpush3.bf16.msra.mxu0 %v2766_v32 }
 0x9ce   : > { %v2080_v45 = vpop.f32.mrb[14].mxu1 }
 0x9cf   : > { %v2644_v27 = vpop.f32.mrb[15].mxu1 }
 0xa67   : > { %v2004_v33 = vpop.f32.mrb[22].mxu0 }
 0xa68   : > { %v2722_v38 = vpack.i.bf16 %v2080_v45, %v2004_v33  ;;  %v2639_v40 = vpop.f32.mrb[23].mxu0 }
 0xa6a   : > { %2723 = vrot.lane.b32.xlu0 %v2722_v38, %s2868_s28  ;;  %s2494_s28 = sshll.u32 %s2960_s25, 10 }
 0xa6b   : > { %s3339_s26 = scalar_lea.hbm %s3412_s11, %s2494_s28 }
 0xadc   : > { %v2724_v37 = vpop.permute.xlu0 %2723 }
 0xadd   : > { %v2726_v53 = vunpack.i.h.bf16 %v2724_v37  ;;  %v2725_v54 = vunpack.i.l.bf16 %v2724_v37 }
 0xadf   : > { %v2123_v57 = vsel %vm2121_vm4, %v2120_v55, %v2726_v53  ;;  %v2122_v47 = vsel %vm2121_vm4, %v2119_v56, %v2725_v54 }
 0xae0   : > { %v2124_v58 = vpack.c.bf16 %v2123_v57, %v2122_v47 }
 0xae2   : > { %2662 = vmatmul.mubr.bf16.vlgmr.msra.gmra.mrb[24].mxu0 %v2124_v58 }
 0xae3   : > { %2814 = shalt.err (!%p2811_p3)
}
 0xae4   : > { %s2815_s23 = scalar_lea.hbm %s3339_s26, 1024  ;;  %s2819_s30 = scalar_lea.hbm %s3412_s11, 4096 }
 0xae5   : > { %p2816_p4 = scmp.ne.s32.totalorder %s3339_s26, %s2815_s23  ;;  %p2820_p9 = scmp.lt.u32.totalorder %s3339_s26, %s3412_s11 }
 0xae6   : > { %p2821_p10 = scmp.lt.u32.totalorder %s2819_s30, %s2815_s23  ;;  %p2823_p12 = scmp.lt.u32.totalorder %s2815_s23, %s3339_s26 }
 0xae7   : > { %p2817_p7 = pnand %p2816_p4, %p2977_p5 }
 0xae8   : > { %p2822_p11 = por %p2821_p10, %p2820_p9 }
 0xae9   : > { %p2818_p8 = pneg %p2817_p7 }
 0xaea   : > { %p2824_p13 = por %p2823_p12, %p2822_p11 }
 0xaec   : > { %p2825_p0 = pnand %p2824_p13, %p2818_p8 }
 0xaee   : > { %2828 = shalt.err (!%p2825_p0)
}
 0xaef   : > { %s2872_s15 = smov 128   ;;  %s2873_s16 = smov 8   ;;  %v2477_v36 = vld [vmem:[%s3410_s9] ss:$0 sm:$0xff]  ;;  %vm2257_vm5 = vcmask 1040384  }
 0xaf0   : > { %2665 = dma.vmem_to_hbm [thread:$0]  (%p2977_p5), %s3341_s17, 1024, %s3339_s26, %s3345_s29, %s2872_s15, %s2872_s15, %s2873_s16  }
 0xaf1   : > { %s457_s27 = scalar_lea.vmem %s3411_s10, %s2420_s20  ;;  %p460_p5 = scmp.lt.s32.totalorder %s2960_s25, 3 }
 0xaf3   : > { %s3432_s25 = smov (!%p460_p5, %s2960_s25), 3 }
 0xaf4   : > { %s2426_s13 = sshll.u32 %s3432_s25, 1 }
 0xaf5   : > { %s463_s17 = scalar_lea.vmem %s3413_s12, %s2426_s13 }
 0xbb5   : > { %v2230_v39 = vpop.f32.mrb[24].mxu0 }
 0xbb6   : > { %v2231_v59 = vadd.f32 %v2477_v36, %v2230_v39  ;;  %v2663_v60 = vpop.f32.mrb[25].mxu0 }
 0xbb7   : > { %v2233_v61 = vpop.f32.mrb[26].mxu0 }
 0xbb8   : > { %v2237_v62 = vadd.f32 %v2231_v59, %v3059_v34  ;;  %v2234_v63 = vadd.f32 %v2477_v36, %v2233_v61  ;;  %v2664_v0 = vpop.f32.mrb[27].mxu0 }
 0xbba   : > { %2239 = vst [vmem:[%s457_s27] sm:$0xff] %v2237_v62  ;;  %v2238_v1 = vadd.f32 %v2234_v63, %v3061_v35  ;;  %v2248_v2 = vmul.f32 %v2237_v62, %v2237_v62 }
 0xbbc   : > { %2240 = vst [vmem:[%s457_s27 + $0x8] sm:$0xff] %v2238_v1  ;;  %v2241_v3 = vadd.f32 %v2238_v1, %v2237_v62  ;;  %v2249_v4 = vmul.f32 %v2238_v1, %v2238_v1 }
 0xbbe   : > { %v2242_v5 = vrot.slane %v2241_v3, 4  ;;  %v2250_v6 = vadd.f32 %v2249_v4, %v2248_v2 }
 0xbc0   : > { %v2243_v7 = vadd.f32 %v2242_v5, %v2241_v3  ;;  %v2251_v8 = vrot.slane %v2250_v6, 4 }
 0xbc2   : > { %v2244_v10 = vrot.slane %v2243_v7, 2  ;;  %v2252_v11 = vadd.f32 %v2251_v8, %v2250_v6 }
 0xbc4   : > { %v2245_v24 = vadd.f32 %v2244_v10, %v2243_v7  ;;  %v2253_v34 = vrot.slane %v2252_v11, 2 }
 0xbc6   : > { %v2246_v12 = vrot.slane %v2245_v24, 1  ;;  %v2254_v13 = vadd.f32 %v2253_v34, %v2252_v11 }
 0xbc8   : > { %v2255_v14 = vrot.slane %v2254_v13, 1  ;;  %v2247_v35 = vadd.f32 %v2246_v12, %v2245_v24 }
 0xbca   : > { %v2256_v15 = vadd.f32 %v2255_v14, %v2254_v13 }
 0xbcc   : > { %v2258_v16 = vsel %vm2257_vm5, %v2247_v35, %v2256_v15 }
 0xbcd   : > { %2259 = vst [vmem:[%s463_s17] sm:$0x3] %v2258_v16 }
 0xbce PF: > { %p2671_p1 = scmp.ge.s32.totalorder %s2863_s24, 2  ;;  %s2314_s26 = sand.u32 1, %s2851_s21  }
 0xbcf   : > { %s2315_s29 = scalar_lea.sflag [#allocation3], %s2314_s26 }
 0xbd0   : > { %p2668_p2 = pnand %p2671_p1, %p2981_p6 }
 0xbd2   : > { %2846 = dma.done.wait (!%p2668_p2), %s2315_s29, 1024  }
 0xbd3   : > { %2848 = vsyncadd (!%p2668_p2), %s2315_s29, 4294966272  ;;  %s3424_s24 = sld [smem:[#allocation6_spill]]  ;;  %s3425_s25 = sld [smem:[#allocation5_spill]] }
 0xbd4   : > { %s3426_s23 = sld [smem:[#allocation7_spill]]  ;;  %s3427_s21 = smov %s2855_s22 }
 0xbd9   : > { %p23_p3 = scmp.ge.s32.totalorder %s3424_s24, 6   ;;  %s3428_s22 = smov %s3425_s25 }
 0xbdb   :  { %25 = sbr.rel (!%p23_p3) target bundleno = 5 (0x5), region = 122 }
 0xbe2   :  { %2327 = vsyncpa [#allocation3], 1 }
 0xbe3   :  { %2329 = vsyncpa [#allocation3 + $0x1], 1 }

</bundles_post_ra>
